<compile_context>
chip_gen: v6e
topology: v6e:2x2x1
jax: 0.10.0
libtpu: 0.0.40
codegen_flags: <defaults>
</compile_context>

<pallas_src>
import jax
import jax.numpy as jnp
from jax.experimental import pallas as pl
from jax.experimental.pallas import tpu as pltpu

EPS = 1e-5


# --------------------------- VMEM budgeting helpers ---------------------------
def _pad_bytes(shape, itemsize=4):
    """Real VMEM footprint of an f32 block: sublane dim -> 8, lane dim -> 128."""
    dims = list(shape)
    if len(dims) == 1:
        dims = [1] + dims
    lead = 1
    for d in dims[:-2]:
        lead *= int(d)
    sub = -(-int(dims[-2]) // 8) * 8
    lane = -(-int(dims[-1]) // 128) * 128
    return lead * sub * lane * itemsize


_VMEM_LIMIT_CACHE = [None]


def _vmem_limit_bytes():
    """Generation-aware scoped-VMEM limit (128 MiB parts -> 96 MiB, v7x's
    64 MiB part -> 48 MiB; conservative fallback if the query fails)."""
    if _VMEM_LIMIT_CACHE[0] is None:
        try:
            cap = int(pltpu.get_tpu_info().vmem_capacity_bytes)
        except Exception:
            cap = 64 * 1024 * 1024
        _VMEM_LIMIT_CACHE[0] = max(32 * 1024 * 1024,
                                   min((cap * 3) // 4, 96 * 1024 * 1024))
    return _VMEM_LIMIT_CACHE[0]


def _tile_budget():
    return (_vmem_limit_bytes() * 3) // 5      # headroom under the scoped limit


# --------------------- conv 3x3 (+ fused input BN, BN stats) ------------------
def _make_conv_kernel(tile_h, W, Cin, Cout, fuse_input_bn):
    """3x3 same-pad conv tile kernel with optional fused input BN+ReLU and
    fused per-tile centered BN statistics of its own output."""
    inv_cnt = 1.0 / float(tile_h * W)

    def body(a_ref, top_ref, bot_ref, w_ref, sc_ref, sh_ref, y_ref, st_ref,
             patch_ref):
        # a_ref    : (1, tile_h, W, Cin)   this tile's input rows
        # top_ref  : (1, 1, W, Cin)        input row above the tile (clamped)
        # bot_ref  : (1, 1, W, Cin)        input row below the tile (clamped)
        # w_ref    : (3, 3*Cin, Cout)      per-kh weights, lane order (kw, ci)
        # sc_ref/sh_ref : (1, Cin)         fused input BN scale/shift (optional)
        # y_ref    : (1, tile_h, W, Cout)  raw conv output tile (bias-free)
        # st_ref   : (1, 1, 2, Cout)       per-tile [sum, centered sum-of-squares]
        # patch_ref: (tile_h+2, W, 3*Cin)  kw-merged im2col scratch; row p holds
        #            input row (t*tile_h - 1 + p), zero outside the image.
        t = pl.program_id(1)
        nt = pl.num_programs(1)

        if fuse_input_bn:
            sc = sc_ref[...]
            sh = sh_ref[...]
            act = lambda v: jnp.maximum(v * sc + sh, 0.0)
        else:
            act = lambda v: v

        def fill(r0, r1, v):
            # Rows [r0, r1) of the patch from v: (r1-r0, W, Cin); the three lane
            # slots hold v shifted by (kw - 1) along W with zeroed W edges.
            zc = jnp.zeros((r1 - r0, 1, Cin), jnp.float32)
            patch_ref[r0:r1, :, 0:Cin] = jnp.concatenate(
                [zc, v[:, 0:W - 1, :]], axis=1)
            patch_ref[r0:r1, :, Cin:2 * Cin] = v
            patch_ref[r0:r1, :, 2 * Cin:3 * Cin] = jnp.concatenate(
                [v[:, 1:W, :], zc], axis=1)

        # Patch is (re)built once per tile: 3 kw-shifted stores for the body,
        # plus the two 1-row halos (or zero rows at the image borders).
        fill(1, tile_h + 1, act(a_ref[0]))

        zrow = jnp.zeros((1, W, 3 * Cin), jnp.float32)

        @pl.when(t == 0)
        def _():
            patch_ref[0:1, :, :] = zrow                     # image top border

        @pl.when(t > 0)
        def _():
            fill(0, 1, act(top_ref[0]))

        @pl.when(t == nt - 1)
        def _():
            patch_ref[tile_h + 1:tile_h + 2, :, :] = zrow   # image bottom border

        @pl.when(t < nt - 1)
        def _():
            fill(tile_h + 1, tile_h + 2, act(bot_ref[0]))

        # 3 MXU taps (one per kh), each with contraction K = 3*Cin.
        # TODO(synk): cast patch/weights to bf16 for the MXU on v6e/v7x (kept
        # f32 here to preserve exact PyTorch f32 forward parity).
        acc = jnp.zeros((tile_h, W, Cout), jnp.float32)
        for kh in range(3):                                  # static unroll
            acc = acc + jax.lax.dot_general(
                patch_ref[kh:kh + tile_h], w_ref[kh],
                dimension_numbers=(((2,), (0,)), ((), ())),
                preferred_element_type=jnp.float32)

        # TODO(synk): a lane-dense (tile_h, W*Cout) store would avoid masked
        # narrow-lane vst at small Cout (needs an in-kernel relayout).
        y_ref[0] = acc.astype(y_ref.dtype)

        # Fused per-tile *centered* BN statistics (exact Chan combine happens
        # in the wrapper) -> the activation is never re-read from HBM for stats.
        s = jnp.sum(jnp.sum(acc, axis=0), axis=0, keepdims=True)       # (1, Cout)
        d = acc - s * inv_cnt
        css = jnp.sum(jnp.sum(d * d, axis=0), axis=0, keepdims=True)   # (1, Cout)
        st_ref[0, 0, 0:1, :] = s
        st_ref[0, 0, 1:2, :] = css

    if fuse_input_bn:
        return body

    def body_nofuse(a_ref, top_ref, bot_ref, w_ref, y_ref, st_ref, patch_ref):
        body(a_ref, top_ref, bot_ref, w_ref, None, None, y_ref, st_ref,
             patch_ref)

    return body_nofuse


def _pick_tile_h(N, H, W, Cin, Cout, budget):
    """Largest divisor of H whose padded, double-buffered working set fits the
    budget.  H is a leading block dim, so any divisor is layout-legal."""
    def working_set(th):
        a = _pad_bytes((th, W, Cin))
        halo = 2 * _pad_bytes((1, W, Cin))
        wts = _pad_bytes((3, 3 * Cin, Cout))
        y = _pad_bytes((th, W, Cout))
        st = _pad_bytes((1, 2, Cout))
        patch = _pad_bytes((th + 2, W, 3 * Cin))
        acc = 2 * _pad_bytes((th, W, Cout))          # acc + centered temp
        return 2 * (a + halo + wts + y + st) + patch + acc

    divisors = [d for d in range(H, 0, -1) if H % d == 0]
    # Keep >= 2 grid steps on a batch-1 input so both TensorCores of a dual-TC
    # chip (v7x) get work.
    want_split = (N == 1 and H > 1)
    for th in divisors:
        if want_split and th == H:
            continue
        if working_set(th) <= budget:
            return th
    return 1


def conv3x3_stats(x_nhwc, w_hwio, in_scale=None, in_shift=None):
    """Bias-free 3x3 same-pad conv with (a) optional fused per-channel
    scale/shift + ReLU applied to the *input* tile as it lands in VMEM and
    (b) fused per-tile centered BN statistics of the output.

    Returns (y_raw, stats, count_per_tile);
      y_raw : (N, H, W, Cout),
      stats : (N, T, 2, Cout) per-tile [sum, centered sum-of-squares].
    """
    N, H, W, Cin = x_nhwc.shape
    Cout = w_hwio.shape[-1]
    w_flat = w_hwio.reshape(3, 3 * Cin, Cout)        # lane order (kw, ci)

    vmem_limit = _vmem_limit_bytes()
    tile_h = _pick_tile_h(N, H, W, Cin, Cout, _tile_budget())
    T = H // tile_h
    fuse = in_scale is not None

    kernel = _make_conv_kernel(tile_h, W, Cin, Cout, fuse)

    in_specs = [
        pl.BlockSpec((1, tile_h, W, Cin), lambda n, t: (n, t, 0, 0)),
        # 1-row halos above/below the tile; the row index is clamped at the
        # image border and the kernel overwrites those rows with zeros there.
        pl.BlockSpec((1, 1, W, Cin),
                     lambda n, t: (n, jnp.maximum(t * tile_h - 1, 0), 0, 0)),
        pl.BlockSpec((1, 1, W, Cin),
                     lambda n, t: (n, jnp.minimum((t + 1) * tile_h, H - 1), 0, 0)),
        pl.BlockSpec((3, 3 * Cin, Cout), lambda n, t: (0, 0, 0)),
    ]
    inputs = [x_nhwc, x_nhwc, x_nhwc, w_flat]
    if fuse:
        in_specs += [pl.BlockSpec((1, Cin), lambda n, t: (0, 0)),
                     pl.BlockSpec((1, Cin), lambda n, t: (0, 0))]
        inputs += [in_scale.reshape(1, Cin).astype(jnp.float32),
                   in_shift.reshape(1, Cin).astype(jnp.float32)]

    y, st = pl.pallas_call(
        kernel,
        out_shape=(jax.ShapeDtypeStruct((N, H, W, Cout), x_nhwc.dtype),
                   jax.ShapeDtypeStruct((N, T, 2, Cout), jnp.float32)),
        grid_spec=pltpu.PrefetchScalarGridSpec(
            num_scalar_prefetch=0,
            grid=(N, T),
            in_specs=in_specs,
            out_specs=(
                pl.BlockSpec((1, tile_h, W, Cout), lambda n, t: (n, t, 0, 0)),
                pl.BlockSpec((1, 1, 2, Cout), lambda n, t: (n, t, 0, 0)),
            ),
            scratch_shapes=[pltpu.VMEM((tile_h + 2, W, 3 * Cin), jnp.float32)],
        ),
        compiler_params=pltpu.CompilerParams(
            dimension_semantics=("parallel", "parallel"),
            vmem_limit_bytes=vmem_limit),
    )(*inputs)
    return y, st, tile_h * W


def _bn_scale_shift(st, count_per_tile, total_count, gamma, beta):
    """Combine per-tile [sum, centered sum-of-squares] into BN scale/shift
    (Chan-style parallel-variance combine; exact and cancellation-free)."""
    sums = st[:, :, 0, :]                               # (N, T, C)
    css = st[:, :, 1, :]
    mean = jnp.sum(sums, axis=(0, 1)) / total_count     # (C,)
    m_t = sums / count_per_tile
    m2 = jnp.sum(css, axis=(0, 1)) + count_per_tile * jnp.sum(
        (m_t - mean) ** 2, axis=(0, 1))
    var = jnp.maximum(m2 / total_count, 0.0)            # biased batch variance
    scale = gamma * jax.lax.rsqrt(var + EPS)
    shift = beta - mean * scale
    return scale, shift


# ------------------- BN-apply (scale/shift) + ReLU, lane-dense ----------------
def _scale_relu_kernel(y_ref, sc_ref, sh_ref, o_ref):
    # y_ref/o_ref: (TR, W*C) lane-dense rows; sc/sh: (1, W*C) per-channel affine
    # already tiled along W in the wrapper.
    o_ref[...] = jnp.maximum(y_ref[...] * sc_ref[...] + sh_ref[...],
                             0.0).astype(o_ref.dtype)


def _pick_rows(M, WC, budget):
    """Row-tile for the elementwise BN+ReLU pass (padded-bytes aware)."""
    per8 = 4 * _pad_bytes((8, WC))          # 8 rows of in + out, double-buffered
    small = 4 * _pad_bytes((1, WC))         # the two (1, WC) affine rows
    groups = max(1, (budget - small) // max(per8, 1))
    tr = int(min(groups * 8, 4096))
    if tr >= M:
        return M
    return max(8, (tr // 8) * 8)


def bn_relu(y_nhwc, scale, shift):
    """y * scale + shift (per channel) then ReLU, as a tiled lane-dense kernel."""
    N, H, W, C = y_nhwc.shape
    M, WC = N * H, W * C
    y2 = y_nhwc.reshape(M, WC)                               # row-major reshape
    sc = jnp.broadcast_to(scale, (W, C)).reshape(1, WC)
    sh = jnp.broadcast_to(shift, (W, C)).reshape(1, WC)
    vmem_limit = _vmem_limit_bytes()
    tr = _pick_rows(M, WC, _tile_budget())
    out2 = pl.pallas_call(
        _scale_relu_kernel,
        out_shape=jax.ShapeDtypeStruct((M, WC), y_nhwc.dtype),
        grid_spec=pltpu.PrefetchScalarGridSpec(
            num_scalar_prefetch=0,
            grid=(pl.cdiv(M, tr),),
            in_specs=[
                pl.BlockSpec((tr, WC), lambda i: (i, 0)),
                pl.BlockSpec((1, WC), lambda i: (0, 0)),
                pl.BlockSpec((1, WC), lambda i: (0, 0)),
            ],
            out_specs=pl.BlockSpec((tr, WC), lambda i: (i, 0)),
        ),
        compiler_params=pltpu.CompilerParams(
            dimension_semantics=("parallel",),
            vmem_limit_bytes=vmem_limit),
    )(y2, sc, sh)
    return out2.reshape(N, H, W, C)


# -------------------------------- DoubleConv ----------------------------------
def double_conv(x_nchw, params):
    """(Conv2d 3x3 pad=1 => BatchNorm2d (train) => ReLU) * 2. NCHW in / NCHW out.

    Conv biases are intentionally not applied in the kernels: training-mode
    BatchNorm subtracts the per-channel batch mean, which absorbs any constant
    per-channel bias exactly, leaving the DoubleConv output unchanged.
    (Valid only for batch-statistics BN; eval-mode/running-stats BN would need
    the bias added back.)
    """
    x = jnp.transpose(x_nchw, (0, 2, 3, 1))             # NCHW -> NHWC
    N, H, W, _ = x.shape
    total = float(N * H * W)

    # conv1 -> fused per-tile stats (the BN1 apply is deferred into conv2).
    y1, st1, cnt1 = conv3x3_stats(x, params["w1"])
    sc1, sh1 = _bn_scale_shift(st1, cnt1, total, params["gamma1"], params["beta1"])

    # conv2 consumes y1 with BN1 + ReLU fused into its input path.
    y2, st2, cnt2 = conv3x3_stats(y1, params["w2"], sc1, sh1)
    sc2, sh2 = _bn_scale_shift(st2, cnt2, total, params["gamma2"], params["beta2"])

    # Final BN2-apply + ReLU as a single lane-dense elementwise pass.
    out = bn_relu(y2, sc2, sh2)
    return jnp.transpose(out, (0, 3, 1, 2))             # NHWC -> NCHW


def init_params(key, in_channels, out_channels, mid_channels=None):
    if not mid_channels:
        mid_channels = out_channels
    k1, k2, k3, k4 = jax.random.split(key, 4)
    # Deterministic synthetic init (shapes match nn.Conv2d(.., 3, padding=1)).
    w1 = 0.1 * jax.random.normal(k1, (3, 3, in_channels, mid_channels), jnp.float32)
    b1 = 0.1 * jax.random.normal(k2, (mid_channels,), jnp.float32)
    w2 = 0.1 * jax.random.normal(k3, (3, 3, mid_channels, out_channels), jnp.float32)
    b2 = 0.1 * jax.random.normal(k4, (out_channels,), jnp.float32)
    return dict(
        w1=w1, b1=b1,
        gamma1=jnp.ones((mid_channels,), jnp.float32),
        beta1=jnp.zeros((mid_channels,), jnp.float32),
        w2=w2, b2=b2,
        gamma2=jnp.ones((out_channels,), jnp.float32),
        beta2=jnp.zeros((out_channels,), jnp.float32),
    )


if __name__ == "__main__":
    key = jax.random.PRNGKey(0)
    kx, kp = jax.random.split(key)

    N, Cin, H, W = 2, 4, 16, 16
    Cout = 8
    x = jax.random.normal(kx, (N, Cin, H, W), jnp.float32)
    params = init_params(kp, Cin, Cout)

    out = jax.jit(double_conv)(x, params)
    out = jax.block_until_ready(out)
    assert out.shape == (N, Cout, H, W), out.shape

    # Pure-JAX reference of the same math (conv WITH bias -> the bias must be
    # absorbed exactly by the batch-mean subtraction in BN).
    def ref(x_nchw, p):
        xh = jnp.transpose(x_nchw, (0, 2, 3, 1))

        def block(xi, w, b, g, bt):
            y = jax.lax.conv_general_dilated(
                xi, w, (1, 1), "SAME",
                dimension_numbers=("NHWC", "HWIO", "NHWC")) + b
            m = jnp.mean(y, axis=(0, 1, 2), keepdims=True)
            v = jnp.mean((y - m) ** 2, axis=(0, 1, 2), keepdims=True)
            return jnp.maximum((y - m) * jax.lax.rsqrt(v + EPS) * g + bt, 0.0)

        y = block(xh, p["w1"], p["b1"], p["gamma1"], p["beta1"])
        y = block(y, p["w2"], p["b2"], p["gamma2"], p["beta2"])
        return jnp.transpose(y, (0, 3, 1, 2))

    ref_out = ref(x, params)
    err = float(jnp.max(jnp.abs(out - ref_out)))
    assert jnp.allclose(out, ref_out, atol=5e-4, rtol=5e-4), f"max abs err {err}"

    print("KERNEL_OK")
</pallas_src>

<mosaic_0001>
module attributes {stable_mosaic.version = 11 : i64} {
  func.func @body_nofuse(%arg0: i32, %arg1: i32, %arg2: memref<1x16x16x4xf32, #tpu.memory_space<vmem>>, %arg3: memref<1x1x16x4xf32, #tpu.memory_space<vmem>>, %arg4: memref<1x1x16x4xf32, #tpu.memory_space<vmem>>, %arg5: memref<3x12x8xf32, #tpu.memory_space<vmem>>, %arg6: memref<1x16x16x8xf32, #tpu.memory_space<vmem>>, %arg7: memref<1x1x2x8xf32, #tpu.memory_space<vmem>>, %arg8: memref<18x16x12xf32, #tpu.memory_space<vmem>>) attributes {dimension_semantics = [#tpu.dimension_semantics<parallel>, #tpu.dimension_semantics<parallel>], iteration_bounds = array<i64: 2, 1>, scalar_prefetch = 0 : i64, scratch_operands = 1 : i64, tpu.core_type = #tpu.core_type<tc>, window_params = [{transform_indices = @transform_0, window_bounds = array<i64: 1, 16, 16, 4>}, {transform_indices = @transform_1, window_bounds = array<i64: 1, 1, 16, 4>}, {transform_indices = @transform_2, window_bounds = array<i64: 1, 1, 16, 4>}, {pipeline_mode = #tpu.pipeline_mode<synchronous>, transform_indices = @transform_3, window_bounds = array<i64: 3, 12, 8>}, {transform_indices = @transform_4, window_bounds = array<i64: 1, 16, 16, 8>}, {transform_indices = @transform_5, window_bounds = array<i64: 1, 1, 2, 8>}]} {
    %c0 = arith.constant 0 : index
    %c0_0 = arith.constant 0 : index
    %c0_1 = arith.constant 0 : index
    %c0_2 = arith.constant 0 : index
    %0 = vector.load %arg2[%c0, %c0_0, %c0_1, %c0_2] : memref<1x16x16x4xf32, #tpu.memory_space<vmem>>, vector<1x16x16x4xf32>
    %1 = vector.shape_cast %0 : vector<1x16x16x4xf32> to vector<16x16x4xf32>
    %cst = arith.constant 0.000000e+00 : f32
    %2 = vector.broadcast %cst : f32 to vector<16x1x4xf32>
    %3 = vector.extract_strided_slice %1 {offsets = [0, 0, 0], sizes = [16, 15, 4], strides = [1, 1, 1]} : vector<16x16x4xf32> to vector<16x15x4xf32>
    %4 = tpu.concatenate %2, %3 in 1 : vector<16x1x4xf32>, vector<16x15x4xf32> -> vector<16x16x4xf32>
    %c1 = arith.constant 1 : index
    %c0_3 = arith.constant 0 : index
    %c0_4 = arith.constant 0 : index
    %5 = vector.load %arg8[%c1, %c0_3, %c0_4] : memref<18x16x12xf32, #tpu.memory_space<vmem>>, vector<16x16x4xf32>
    tpu.vector_store %arg8[%c1, %c0_3, %c0_4], %4 {strides = array<i32>} : memref<18x16x12xf32, #tpu.memory_space<vmem>>, vector<16x16x4xf32>,
    %c1_5 = arith.constant 1 : index
    %c0_6 = arith.constant 0 : index
    %c4 = arith.constant 4 : index
    %6 = vector.load %arg8[%c1_5, %c0_6, %c4] : memref<18x16x12xf32, #tpu.memory_space<vmem>>, vector<16x16x4xf32>
    tpu.vector_store %arg8[%c1_5, %c0_6, %c4], %1 {strides = array<i32>} : memref<18x16x12xf32, #tpu.memory_space<vmem>>, vector<16x16x4xf32>,
    %7 = vector.extract_strided_slice %1 {offsets = [0, 1, 0], sizes = [16, 15, 4], strides = [1, 1, 1]} : vector<16x16x4xf32> to vector<16x15x4xf32>
    %8 = tpu.concatenate %7, %2 in 1 : vector<16x15x4xf32>, vector<16x1x4xf32> -> vector<16x16x4xf32>
    %c1_7 = arith.constant 1 : index
    %c0_8 = arith.constant 0 : index
    %c8 = arith.constant 8 : index
    %9 = vector.load %arg8[%c1_7, %c0_8, %c8] : memref<18x16x12xf32, #tpu.memory_space<vmem>>, vector<16x16x4xf32>
    tpu.vector_store %arg8[%c1_7, %c0_8, %c8], %8 {strides = array<i32>} : memref<18x16x12xf32, #tpu.memory_space<vmem>>, vector<16x16x4xf32>,
    %cst_9 = arith.constant 0.000000e+00 : f32
    %10 = vector.broadcast %cst_9 : f32 to vector<1x16x12xf32>
    %c0_i32 = arith.constant 0 : i32
    %11 = arith.cmpi eq, %arg1, %c0_i32 : i32
    %12 = arith.extui %11 : i1 to i32
    %c0_i32_10 = arith.constant 0 : i32
    %13 = arith.cmpi ne, %12, %c0_i32_10 : i32
    scf.if %13 {
      %c0_55 = arith.constant 0 : index
      %c0_56 = arith.constant 0 : index
      %c0_57 = arith.constant 0 : index
      %60 = vector.load %arg8[%c0_55, %c0_56, %c0_57] : memref<18x16x12xf32, #tpu.memory_space<vmem>>, vector<1x16x12xf32>
      tpu.vector_store %arg8[%c0_55, %c0_56, %c0_57], %10 {strides = array<i32>} : memref<18x16x12xf32, #tpu.memory_space<vmem>>, vector<1x16x12xf32>,
    } else {
    }
    %c0_i32_11 = arith.constant 0 : i32
    %14 = arith.cmpi sgt, %arg1, %c0_i32_11 : i32
    %15 = arith.extui %14 : i1 to i32
    %c0_i32_12 = arith.constant 0 : i32
    %16 = arith.cmpi ne, %15, %c0_i32_12 : i32
    scf.if %16 {
      %c0_55 = arith.constant 0 : index
      %c0_56 = arith.constant 0 : index
      %c0_57 = arith.constant 0 : index
      %c0_58 = arith.constant 0 : index
      %60 = vector.load %arg3[%c0_55, %c0_56, %c0_57, %c0_58] : memref<1x1x16x4xf32, #tpu.memory_space<vmem>>, vector<1x1x16x4xf32>
      %61 = vector.shape_cast %60 : vector<1x1x16x4xf32> to vector<1x16x4xf32>
      %cst_59 = arith.constant 0.000000e+00 : f32
      %62 = vector.broadcast %cst_59 : f32 to vector<1x1x4xf32>
      %63 = vector.extract_strided_slice %61 {offsets = [0, 0, 0], sizes = [1, 15, 4], strides = [1, 1, 1]} : vector<1x16x4xf32> to vector<1x15x4xf32>
      %64 = tpu.concatenate %62, %63 in 1 : vector<1x1x4xf32>, vector<1x15x4xf32> -> vector<1x16x4xf32>
      %c0_60 = arith.constant 0 : index
      %c0_61 = arith.constant 0 : index
      %c0_62 = arith.constant 0 : index
      %65 = vector.load %arg8[%c0_60, %c0_61, %c0_62] : memref<18x16x12xf32, #tpu.memory_space<vmem>>, vector<1x16x4xf32>
      tpu.vector_store %arg8[%c0_60, %c0_61, %c0_62], %64 {strides = array<i32>} : memref<18x16x12xf32, #tpu.memory_space<vmem>>, vector<1x16x4xf32>,
      %c0_63 = arith.constant 0 : index
      %c0_64 = arith.constant 0 : index
      %c4_65 = arith.constant 4 : index
      %66 = vector.load %arg8[%c0_63, %c0_64, %c4_65] : memref<18x16x12xf32, #tpu.memory_space<vmem>>, vector<1x16x4xf32>
      tpu.vector_store %arg8[%c0_63, %c0_64, %c4_65], %61 {strides = array<i32>} : memref<18x16x12xf32, #tpu.memory_space<vmem>>, vector<1x16x4xf32>,
      %67 = vector.extract_strided_slice %61 {offsets = [0, 1, 0], sizes = [1, 15, 4], strides = [1, 1, 1]} : vector<1x16x4xf32> to vector<1x15x4xf32>
      %68 = tpu.concatenate %67, %62 in 1 : vector<1x15x4xf32>, vector<1x1x4xf32> -> vector<1x16x4xf32>
      %c0_66 = arith.constant 0 : index
      %c0_67 = arith.constant 0 : index
      %c8_68 = arith.constant 8 : index
      %69 = vector.load %arg8[%c0_66, %c0_67, %c8_68] : memref<18x16x12xf32, #tpu.memory_space<vmem>>, vector<1x16x4xf32>
      tpu.vector_store %arg8[%c0_66, %c0_67, %c8_68], %68 {strides = array<i32>} : memref<18x16x12xf32, #tpu.memory_space<vmem>>, vector<1x16x4xf32>,
    } else {
    }
    %c0_i32_13 = arith.constant 0 : i32
    %17 = arith.cmpi eq, %arg1, %c0_i32_13 : i32
    %18 = arith.extui %17 : i1 to i32
    %c0_i32_14 = arith.constant 0 : i32
    %19 = arith.cmpi ne, %18, %c0_i32_14 : i32
    scf.if %19 {
      %c17 = arith.constant 17 : index
      %c0_55 = arith.constant 0 : index
      %c0_56 = arith.constant 0 : index
      %60 = vector.load %arg8[%c17, %c0_55, %c0_56] : memref<18x16x12xf32, #tpu.memory_space<vmem>>, vector<1x16x12xf32>
      tpu.vector_store %arg8[%c17, %c0_55, %c0_56], %10 {strides = array<i32>} : memref<18x16x12xf32, #tpu.memory_space<vmem>>, vector<1x16x12xf32>,
    } else {
    }
    %c0_i32_15 = arith.constant 0 : i32
    %20 = arith.cmpi slt, %arg1, %c0_i32_15 : i32
    %21 = arith.extui %20 : i1 to i32
    %c0_i32_16 = arith.constant 0 : i32
    %22 = arith.cmpi ne, %21, %c0_i32_16 : i32
    scf.if %22 {
      %c0_55 = arith.constant 0 : index
      %c0_56 = arith.constant 0 : index
      %c0_57 = arith.constant 0 : index
      %c0_58 = arith.constant 0 : index
      %60 = vector.load %arg4[%c0_55, %c0_56, %c0_57, %c0_58] : memref<1x1x16x4xf32, #tpu.memory_space<vmem>>, vector<1x1x16x4xf32>
      %61 = vector.shape_cast %60 : vector<1x1x16x4xf32> to vector<1x16x4xf32>
      %cst_59 = arith.constant 0.000000e+00 : f32
      %62 = vector.broadcast %cst_59 : f32 to vector<1x1x4xf32>
      %63 = vector.extract_strided_slice %61 {offsets = [0, 0, 0], sizes = [1, 15, 4], strides = [1, 1, 1]} : vector<1x16x4xf32> to vector<1x15x4xf32>
      %64 = tpu.concatenate %62, %63 in 1 : vector<1x1x4xf32>, vector<1x15x4xf32> -> vector<1x16x4xf32>
      %c17 = arith.constant 17 : index
      %c0_60 = arith.constant 0 : index
      %c0_61 = arith.constant 0 : index
      %65 = vector.load %arg8[%c17, %c0_60, %c0_61] : memref<18x16x12xf32, #tpu.memory_space<vmem>>, vector<1x16x4xf32>
      tpu.vector_store %arg8[%c17, %c0_60, %c0_61], %64 {strides = array<i32>} : memref<18x16x12xf32, #tpu.memory_space<vmem>>, vector<1x16x4xf32>,
      %c17_62 = arith.constant 17 : index
      %c0_63 = arith.constant 0 : index
      %c4_64 = arith.constant 4 : index
      %66 = vector.load %arg8[%c17_62, %c0_63, %c4_64] : memref<18x16x12xf32, #tpu.memory_space<vmem>>, vector<1x16x4xf32>
      tpu.vector_store %arg8[%c17_62, %c0_63, %c4_64], %61 {strides = array<i32>} : memref<18x16x12xf32, #tpu.memory_space<vmem>>, vector<1x16x4xf32>,
      %67 = vector.extract_strided_slice %61 {offsets = [0, 1, 0], sizes = [1, 15, 4], strides = [1, 1, 1]} : vector<1x16x4xf32> to vector<1x15x4xf32>
      %68 = tpu.concatenate %67, %62 in 1 : vector<1x15x4xf32>, vector<1x1x4xf32> -> vector<1x16x4xf32>
      %c17_65 = arith.constant 17 : index
      %c0_66 = arith.constant 0 : index
      %c8_67 = arith.constant 8 : index
      %69 = vector.load %arg8[%c17_65, %c0_66, %c8_67] : memref<18x16x12xf32, #tpu.memory_space<vmem>>, vector<1x16x4xf32>
      tpu.vector_store %arg8[%c17_65, %c0_66, %c8_67], %68 {strides = array<i32>} : memref<18x16x12xf32, #tpu.memory_space<vmem>>, vector<1x16x4xf32>,
    } else {
    }
    %cst_17 = arith.constant 0.000000e+00 : f32
    %23 = vector.broadcast %cst_17 : f32 to vector<16x16x8xf32>
    %c0_18 = arith.constant 0 : index
    %c0_19 = arith.constant 0 : index
    %c0_20 = arith.constant 0 : index
    %24 = vector.load %arg8[%c0_18, %c0_19, %c0_20] : memref<18x16x12xf32, #tpu.memory_space<vmem>>, vector<16x16x12xf32>
    %c0_21 = arith.constant 0 : index
    %c0_22 = arith.constant 0 : index
    %c0_23 = arith.constant 0 : index
    %25 = vector.load %arg5[%c0_21, %c0_22, %c0_23] : memref<3x12x8xf32, #tpu.memory_space<vmem>>, vector<1x12x8xf32>
    %26 = vector.shape_cast %25 : vector<1x12x8xf32> to vector<12x8xf32>
    %cst_24 = arith.constant dense<0.000000e+00> : vector<16x16x8xf32>
    %27 = tpu.matmul %24, %26, %cst_24 {dimension_numbers = #tpu.dot_dimension_numbers<[2], [0], [0, 1], [1], [0, 0, 0, 1, 1, 1], [], []>} : vector<16x16x12xf32>, vector<12x8xf32>, vector<16x16x8xf32> -> vector<16x16x8xf32>
    %28 = arith.addf %23, %27 : vector<16x16x8xf32>
    %c1_25 = arith.constant 1 : index
    %c0_26 = arith.constant 0 : index
    %c0_27 = arith.constant 0 : index
    %29 = vector.load %arg8[%c1_25, %c0_26, %c0_27] : memref<18x16x12xf32, #tpu.memory_space<vmem>>, vector<16x16x12xf32>
    %c1_28 = arith.constant 1 : index
    %c0_29 = arith.constant 0 : index
    %c0_30 = arith.constant 0 : index
    %30 = vector.load %arg5[%c1_28, %c0_29, %c0_30] : memref<3x12x8xf32, #tpu.memory_space<vmem>>, vector<1x12x8xf32>
    %31 = vector.shape_cast %30 : vector<1x12x8xf32> to vector<12x8xf32>
    %cst_31 = arith.constant dense<0.000000e+00> : vector<16x16x8xf32>
    %32 = tpu.matmul %29, %31, %cst_31 {dimension_numbers = #tpu.dot_dimension_numbers<[2], [0], [0, 1], [1], [0, 0, 0, 1, 1, 1], [], []>} : vector<16x16x12xf32>, vector<12x8xf32>, vector<16x16x8xf32> -> vector<16x16x8xf32>
    %33 = arith.addf %28, %32 : vector<16x16x8xf32>
    %c2 = arith.constant 2 : index
    %c0_32 = arith.constant 0 : index
    %c0_33 = arith.constant 0 : index
    %34 = vector.load %arg8[%c2, %c0_32, %c0_33] : memref<18x16x12xf32, #tpu.memory_space<vmem>>, vector<16x16x12xf32>
    %c2_34 = arith.constant 2 : index
    %c0_35 = arith.constant 0 : index
    %c0_36 = arith.constant 0 : index
    %35 = vector.load %arg5[%c2_34, %c0_35, %c0_36] : memref<3x12x8xf32, #tpu.memory_space<vmem>>, vector<1x12x8xf32>
    %36 = vector.shape_cast %35 : vector<1x12x8xf32> to vector<12x8xf32>
    %cst_37 = arith.constant dense<0.000000e+00> : vector<16x16x8xf32>
    %37 = tpu.matmul %34, %36, %cst_37 {dimension_numbers = #tpu.dot_dimension_numbers<[2], [0], [0, 1], [1], [0, 0, 0, 1, 1, 1], [], []>} : vector<16x16x12xf32>, vector<12x8xf32>, vector<16x16x8xf32> -> vector<16x16x8xf32>
    %38 = arith.addf %33, %37 : vector<16x16x8xf32>
    %c0_38 = arith.constant 0 : index
    %c0_39 = arith.constant 0 : index
    %c0_40 = arith.constant 0 : index
    %c0_41 = arith.constant 0 : index
    %39 = vector.load %arg6[%c0_38, %c0_39, %c0_40, %c0_41] : memref<1x16x16x8xf32, #tpu.memory_space<vmem>>, vector<1x16x16x8xf32>
    %40 = vector.shape_cast %39 : vector<1x16x16x8xf32> to vector<16x16x8xf32>
    %41 = vector.shape_cast %38 : vector<16x16x8xf32> to vector<1x16x16x8xf32>
    tpu.vector_store %arg6[%c0_38, %c0_39, %c0_40, %c0_41], %41 {strides = array<i32>} : memref<1x16x16x8xf32, #tpu.memory_space<vmem>>, vector<1x16x16x8xf32>,
    %cst_42 = arith.constant dense<0.000000e+00> : vector<16x8xf32>
    %42 = vector.multi_reduction <add>, %38, %cst_42 [0] : vector<16x16x8xf32> to vector<16x8xf32>
    %cst_43 = arith.constant dense<0.000000e+00> : vector<8xf32>
    %43 = vector.multi_reduction <add>, %42, %cst_43 [0] : vector<16x8xf32> to vector<8xf32>
    %44 = vector.shape_cast %43 : vector<8xf32> to vector<1x8xf32>
    %cst_44 = arith.constant 3.906250e-03 : f32
    %45 = vector.broadcast %cst_44 : f32 to vector<1x8xf32>
    %46 = arith.mulf %44, %45 : vector<1x8xf32>
    %47 = vector.shape_cast %46 : vector<1x8xf32> to vector<1x1x8xf32>
    %48 = vector.broadcast %47 : vector<1x1x8xf32> to vector<16x16x8xf32>
    %49 = arith.subf %38, %48 : vector<16x16x8xf32>
    %50 = arith.mulf %49, %49 : vector<16x16x8xf32>
    %cst_45 = arith.constant dense<0.000000e+00> : vector<16x8xf32>
    %51 = vector.multi_reduction <add>, %50, %cst_45 [0] : vector<16x16x8xf32> to vector<16x8xf32>
    %cst_46 = arith.constant dense<0.000000e+00> : vector<8xf32>
    %52 = vector.multi_reduction <add>, %51, %cst_46 [0] : vector<16x8xf32> to vector<8xf32>
    %53 = vector.shape_cast %52 : vector<8xf32> to vector<1x8xf32>
    %c0_47 = arith.constant 0 : index
    %c0_48 = arith.constant 0 : index
    %c0_49 = arith.constant 0 : index
    %c0_50 = arith.constant 0 : index
    %54 = vector.load %arg7[%c0_47, %c0_48, %c0_49, %c0_50] : memref<1x1x2x8xf32, #tpu.memory_space<vmem>>, vector<1x1x1x8xf32>
    %55 = vector.shape_cast %54 : vector<1x1x1x8xf32> to vector<1x8xf32>
    %56 = vector.shape_cast %44 : vector<1x8xf32> to vector<1x1x1x8xf32>
    tpu.vector_store %arg7[%c0_47, %c0_48, %c0_49, %c0_50], %56 {strides = array<i32>} : memref<1x1x2x8xf32, #tpu.memory_space<vmem>>, vector<1x1x1x8xf32>,
    %c0_51 = arith.constant 0 : index
    %c0_52 = arith.constant 0 : index
    %c1_53 = arith.constant 1 : index
    %c0_54 = arith.constant 0 : index
    %57 = vector.load %arg7[%c0_51, %c0_52, %c1_53, %c0_54] : memref<1x1x2x8xf32, #tpu.memory_space<vmem>>, vector<1x1x1x8xf32>
    %58 = vector.shape_cast %57 : vector<1x1x1x8xf32> to vector<1x8xf32>
    %59 = vector.shape_cast %53 : vector<1x8xf32> to vector<1x1x1x8xf32>
    tpu.vector_store %arg7[%c0_51, %c0_52, %c1_53, %c0_54], %59 {strides = array<i32>} : memref<1x1x2x8xf32, #tpu.memory_space<vmem>>, vector<1x1x1x8xf32>,
    return
  }
  func.func @transform_0(%arg0: i32, %arg1: i32) -> (i32, i32, i32, i32) {
    %c0_i32 = arith.constant 0 : i32
    %c0_i32_0 = arith.constant 0 : i32
    %c0_i32_1 = arith.constant 0 : i32
    return %arg0, %arg1, %c0_i32, %c0_i32_0 : i32, i32, i32, i32
  }
  func.func @transform_1(%arg0: i32, %arg1: i32) -> (i32, i32, i32, i32) {
    %c16_i32 = arith.constant 16 : i32
    %0 = arith.muli %arg1, %c16_i32 : i32
    %c1_i32 = arith.constant 1 : i32
    %1 = arith.subi %0, %c1_i32 : i32
    %c0_i32 = arith.constant 0 : i32
    %2 = arith.maxsi %1, %c0_i32 : i32
    %c0_i32_0 = arith.constant 0 : i32
    %c0_i32_1 = arith.constant 0 : i32
    %c0_i32_2 = arith.constant 0 : i32
    return %arg0, %2, %c0_i32_0, %c0_i32_1 : i32, i32, i32, i32
  }
  func.func @transform_2(%arg0: i32, %arg1: i32) -> (i32, i32, i32, i32) {
    %c1_i32 = arith.constant 1 : i32
    %0 = arith.addi %arg1, %c1_i32 : i32
    %c16_i32 = arith.constant 16 : i32
    %1 = arith.muli %0, %c16_i32 : i32
    %c15_i32 = arith.constant 15 : i32
    %2 = arith.minsi %1, %c15_i32 : i32
    %c0_i32 = arith.constant 0 : i32
    %c0_i32_0 = arith.constant 0 : i32
    %c0_i32_1 = arith.constant 0 : i32
    return %arg0, %2, %c0_i32, %c0_i32_0 : i32, i32, i32, i32
  }
  func.func @transform_3(%arg0: i32, %arg1: i32) -> (i32, i32, i32) {
    %c0_i32 = arith.constant 0 : i32
    %c0_i32_0 = arith.constant 0 : i32
    %c0_i32_1 = arith.constant 0 : i32
    %c0_i32_2 = arith.constant 0 : i32
    return %c0_i32, %c0_i32_0, %c0_i32_1 : i32, i32, i32
  }
  func.func @transform_4(%arg0: i32, %arg1: i32) -> (i32, i32, i32, i32) {
    %c0_i32 = arith.constant 0 : i32
    %c0_i32_0 = arith.constant 0 : i32
    %c0_i32_1 = arith.constant 0 : i32
    return %arg0, %arg1, %c0_i32, %c0_i32_0 : i32, i32, i32, i32
  }
  func.func @transform_5(%arg0: i32, %arg1: i32) -> (i32, i32, i32, i32) {
    %c0_i32 = arith.constant 0 : i32
    %c0_i32_0 = arith.constant 0 : i32
    %c0_i32_1 = arith.constant 0 : i32
    return %arg0, %arg1, %c0_i32, %c0_i32_0 : i32, i32, i32, i32
  }
}

module attributes {stable_mosaic.version = 11 : i64} {
  func.func @body(%arg0: i32, %arg1: i32, %arg2: memref<1x16x16x8xf32, #tpu.memory_space<vmem>>, %arg3: memref<1x1x16x8xf32, #tpu.memory_space<vmem>>, %arg4: memref<1x1x16x8xf32, #tpu.memory_space<vmem>>, %arg5: memref<3x24x8xf32, #tpu.memory_space<vmem>>, %arg6: memref<1x8xf32, #tpu.memory_space<vmem>>, %arg7: memref<1x8xf32, #tpu.memory_space<vmem>>, %arg8: memref<1x16x16x8xf32, #tpu.memory_space<vmem>>, %arg9: memref<1x1x2x8xf32, #tpu.memory_space<vmem>>, %arg10: memref<18x16x24xf32, #tpu.memory_space<vmem>>) attributes {dimension_semantics = [#tpu.dimension_semantics<parallel>, #tpu.dimension_semantics<parallel>], iteration_bounds = array<i64: 2, 1>, scalar_prefetch = 0 : i64, scratch_operands = 1 : i64, tpu.core_type = #tpu.core_type<tc>, window_params = [{transform_indices = @transform_0, window_bounds = array<i64: 1, 16, 16, 8>}, {transform_indices = @transform_1, window_bounds = array<i64: 1, 1, 16, 8>}, {transform_indices = @transform_2, window_bounds = array<i64: 1, 1, 16, 8>}, {pipeline_mode = #tpu.pipeline_mode<synchronous>, transform_indices = @transform_3, window_bounds = array<i64: 3, 24, 8>}, {pipeline_mode = #tpu.pipeline_mode<synchronous>, transform_indices = @transform_4, window_bounds = array<i64: 1, 8>}, {pipeline_mode = #tpu.pipeline_mode<synchronous>, transform_indices = @transform_5, window_bounds = array<i64: 1, 8>}, {transform_indices = @transform_6, window_bounds = array<i64: 1, 16, 16, 8>}, {transform_indices = @transform_7, window_bounds = array<i64: 1, 1, 2, 8>}]} {
    %c0 = arith.constant 0 : index
    %c0_0 = arith.constant 0 : index
    %0 = vector.load %arg6[%c0, %c0_0] : memref<1x8xf32, #tpu.memory_space<vmem>>, vector<1x8xf32>
    %c0_1 = arith.constant 0 : index
    %c0_2 = arith.constant 0 : index
    %1 = vector.load %arg7[%c0_1, %c0_2] : memref<1x8xf32, #tpu.memory_space<vmem>>, vector<1x8xf32>
    %c0_3 = arith.constant 0 : index
    %c0_4 = arith.constant 0 : index
    %c0_5 = arith.constant 0 : index
    %c0_6 = arith.constant 0 : index
    %2 = vector.load %arg2[%c0_3, %c0_4, %c0_5, %c0_6] : memref<1x16x16x8xf32, #tpu.memory_space<vmem>>, vector<1x16x16x8xf32>
    %3 = vector.shape_cast %2 : vector<1x16x16x8xf32> to vector<16x16x8xf32>
    %4 = vector.shape_cast %0 : vector<1x8xf32> to vector<1x1x8xf32>
    %5 = vector.broadcast %4 : vector<1x1x8xf32> to vector<16x16x8xf32>
    %6 = arith.mulf %3, %5 : vector<16x16x8xf32>
    %7 = vector.shape_cast %1 : vector<1x8xf32> to vector<1x1x8xf32>
    %8 = vector.broadcast %7 : vector<1x1x8xf32> to vector<16x16x8xf32>
    %9 = arith.addf %6, %8 : vector<16x16x8xf32>
    %cst = arith.constant 0.000000e+00 : f32
    %10 = vector.broadcast %cst : f32 to vector<16x16x8xf32>
    %11 = arith.maximumf %9, %10 : vector<16x16x8xf32>
    %cst_7 = arith.constant 0.000000e+00 : f32
    %12 = vector.broadcast %cst_7 : f32 to vector<16x1x8xf32>
    %13 = vector.extract_strided_slice %11 {offsets = [0, 0, 0], sizes = [16, 15, 8], strides = [1, 1, 1]} : vector<16x16x8xf32> to vector<16x15x8xf32>
    %14 = tpu.concatenate %12, %13 in 1 : vector<16x1x8xf32>, vector<16x15x8xf32> -> vector<16x16x8xf32>
    %c1 = arith.constant 1 : index
    %c0_8 = arith.constant 0 : index
    %c0_9 = arith.constant 0 : index
    %15 = vector.load %arg10[%c1, %c0_8, %c0_9] : memref<18x16x24xf32, #tpu.memory_space<vmem>>, vector<16x16x8xf32>
    tpu.vector_store %arg10[%c1, %c0_8, %c0_9], %14 {strides = array<i32>} : memref<18x16x24xf32, #tpu.memory_space<vmem>>, vector<16x16x8xf32>,
    %c1_10 = arith.constant 1 : index
    %c0_11 = arith.constant 0 : index
    %c8 = arith.constant 8 : index
    %16 = vector.load %arg10[%c1_10, %c0_11, %c8] : memref<18x16x24xf32, #tpu.memory_space<vmem>>, vector<16x16x8xf32>
    tpu.vector_store %arg10[%c1_10, %c0_11, %c8], %11 {strides = array<i32>} : memref<18x16x24xf32, #tpu.memory_space<vmem>>, vector<16x16x8xf32>,
    %17 = vector.extract_strided_slice %11 {offsets = [0, 1, 0], sizes = [16, 15, 8], strides = [1, 1, 1]} : vector<16x16x8xf32> to vector<16x15x8xf32>
    %18 = tpu.concatenate %17, %12 in 1 : vector<16x15x8xf32>, vector<16x1x8xf32> -> vector<16x16x8xf32>
    %c1_12 = arith.constant 1 : index
    %c0_13 = arith.constant 0 : index
    %c16 = arith.constant 16 : index
    %19 = vector.load %arg10[%c1_12, %c0_13, %c16] : memref<18x16x24xf32, #tpu.memory_space<vmem>>, vector<16x16x8xf32>
    tpu.vector_store %arg10[%c1_12, %c0_13, %c16], %18 {strides = array<i32>} : memref<18x16x24xf32, #tpu.memory_space<vmem>>, vector<16x16x8xf32>,
    %cst_14 = arith.constant 0.000000e+00 : f32
    %20 = vector.broadcast %cst_14 : f32 to vector<1x16x24xf32>
    %c0_i32 = arith.constant 0 : i32
    %21 = arith.cmpi eq, %arg1, %c0_i32 : i32
    %22 = arith.extui %21 : i1 to i32
    %c0_i32_15 = arith.constant 0 : i32
    %23 = arith.cmpi ne, %22, %c0_i32_15 : i32
    scf.if %23 {
      %c0_60 = arith.constant 0 : index
      %c0_61 = arith.constant 0 : index
      %c0_62 = arith.constant 0 : index
      %70 = vector.load %arg10[%c0_60, %c0_61, %c0_62] : memref<18x16x24xf32, #tpu.memory_space<vmem>>, vector<1x16x24xf32>
      tpu.vector_store %arg10[%c0_60, %c0_61, %c0_62], %20 {strides = array<i32>} : memref<18x16x24xf32, #tpu.memory_space<vmem>>, vector<1x16x24xf32>,
    } else {
    }
    %c0_i32_16 = arith.constant 0 : i32
    %24 = arith.cmpi sgt, %arg1, %c0_i32_16 : i32
    %25 = arith.extui %24 : i1 to i32
    %c0_i32_17 = arith.constant 0 : i32
    %26 = arith.cmpi ne, %25, %c0_i32_17 : i32
    scf.if %26 {
      %c0_60 = arith.constant 0 : index
      %c0_61 = arith.constant 0 : index
      %c0_62 = arith.constant 0 : index
      %c0_63 = arith.constant 0 : index
      %70 = vector.load %arg3[%c0_60, %c0_61, %c0_62, %c0_63] : memref<1x1x16x8xf32, #tpu.memory_space<vmem>>, vector<1x1x16x8xf32>
      %71 = vector.shape_cast %70 : vector<1x1x16x8xf32> to vector<1x16x8xf32>
      %72 = vector.shape_cast %0 : vector<1x8xf32> to vector<1x1x8xf32>
      %73 = vector.broadcast %72 : vector<1x1x8xf32> to vector<1x16x8xf32>
      %74 = arith.mulf %71, %73 : vector<1x16x8xf32>
      %75 = vector.shape_cast %1 : vector<1x8xf32> to vector<1x1x8xf32>
      %76 = vector.broadcast %75 : vector<1x1x8xf32> to vector<1x16x8xf32>
      %77 = arith.addf %74, %76 : vector<1x16x8xf32>
      %cst_64 = arith.constant 0.000000e+00 : f32
      %78 = vector.broadcast %cst_64 : f32 to vector<1x16x8xf32>
      %79 = arith.maximumf %77, %78 : vector<1x16x8xf32>
      %cst_65 = arith.constant 0.000000e+00 : f32
      %80 = vector.broadcast %cst_65 : f32 to vector<1x1x8xf32>
      %81 = vector.extract_strided_slice %79 {offsets = [0, 0, 0], sizes = [1, 15, 8], strides = [1, 1, 1]} : vector<1x16x8xf32> to vector<1x15x8xf32>
      %82 = tpu.concatenate %80, %81 in 1 : vector<1x1x8xf32>, vector<1x15x8xf32> -> vector<1x16x8xf32>
      %c0_66 = arith.constant 0 : index
      %c0_67 = arith.constant 0 : index
      %c0_68 = arith.constant 0 : index
      %83 = vector.load %arg10[%c0_66, %c0_67, %c0_68] : memref<18x16x24xf32, #tpu.memory_space<vmem>>, vector<1x16x8xf32>
      tpu.vector_store %arg10[%c0_66, %c0_67, %c0_68], %82 {strides = array<i32>} : memref<18x16x24xf32, #tpu.memory_space<vmem>>, vector<1x16x8xf32>,
      %c0_69 = arith.constant 0 : index
      %c0_70 = arith.constant 0 : index
      %c8_71 = arith.constant 8 : index
      %84 = vector.load %arg10[%c0_69, %c0_70, %c8_71] : memref<18x16x24xf32, #tpu.memory_space<vmem>>, vector<1x16x8xf32>
      tpu.vector_store %arg10[%c0_69, %c0_70, %c8_71], %79 {strides = array<i32>} : memref<18x16x24xf32, #tpu.memory_space<vmem>>, vector<1x16x8xf32>,
      %85 = vector.extract_strided_slice %79 {offsets = [0, 1, 0], sizes = [1, 15, 8], strides = [1, 1, 1]} : vector<1x16x8xf32> to vector<1x15x8xf32>
      %86 = tpu.concatenate %85, %80 in 1 : vector<1x15x8xf32>, vector<1x1x8xf32> -> vector<1x16x8xf32>
      %c0_72 = arith.constant 0 : index
      %c0_73 = arith.constant 0 : index
      %c16_74 = arith.constant 16 : index
      %87 = vector.load %arg10[%c0_72, %c0_73, %c16_74] : memref<18x16x24xf32, #tpu.memory_space<vmem>>, vector<1x16x8xf32>
      tpu.vector_store %arg10[%c0_72, %c0_73, %c16_74], %86 {strides = array<i32>} : memref<18x16x24xf32, #tpu.memory_space<vmem>>, vector<1x16x8xf32>,
    } else {
    }
    %c0_i32_18 = arith.constant 0 : i32
    %27 = arith.cmpi eq, %arg1, %c0_i32_18 : i32
    %28 = arith.extui %27 : i1 to i32
    %c0_i32_19 = arith.constant 0 : i32
    %29 = arith.cmpi ne, %28, %c0_i32_19 : i32
    scf.if %29 {
      %c17 = arith.constant 17 : index
      %c0_60 = arith.constant 0 : index
      %c0_61 = arith.constant 0 : index
      %70 = vector.load %arg10[%c17, %c0_60, %c0_61] : memref<18x16x24xf32, #tpu.memory_space<vmem>>, vector<1x16x24xf32>
      tpu.vector_store %arg10[%c17, %c0_60, %c0_61], %20 {strides = array<i32>} : memref<18x16x24xf32, #tpu.memory_space<vmem>>, vector<1x16x24xf32>,
    } else {
    }
    %c0_i32_20 = arith.constant 0 : i32
    %30 = arith.cmpi slt, %arg1, %c0_i32_20 : i32
    %31 = arith.extui %30 : i1 to i32
    %c0_i32_21 = arith.constant 0 : i32
    %32 = arith.cmpi ne, %31, %c0_i32_21 : i32
    scf.if %32 {
      %c0_60 = arith.constant 0 : index
      %c0_61 = arith.constant 0 : index
      %c0_62 = arith.constant 0 : index
      %c0_63 = arith.constant 0 : index
      %70 = vector.load %arg4[%c0_60, %c0_61, %c0_62, %c0_63] : memref<1x1x16x8xf32, #tpu.memory_space<vmem>>, vector<1x1x16x8xf32>
      %71 = vector.shape_cast %70 : vector<1x1x16x8xf32> to vector<1x16x8xf32>
      %72 = vector.shape_cast %0 : vector<1x8xf32> to vector<1x1x8xf32>
      %73 = vector.broadcast %72 : vector<1x1x8xf32> to vector<1x16x8xf32>
      %74 = arith.mulf %71, %73 : vector<1x16x8xf32>
      %75 = vector.shape_cast %1 : vector<1x8xf32> to vector<1x1x8xf32>
      %76 = vector.broadcast %75 : vector<1x1x8xf32> to vector<1x16x8xf32>
      %77 = arith.addf %74, %76 : vector<1x16x8xf32>
      %cst_64 = arith.constant 0.000000e+00 : f32
      %78 = vector.broadcast %cst_64 : f32 to vector<1x16x8xf32>
      %79 = arith.maximumf %77, %78 : vector<1x16x8xf32>
      %cst_65 = arith.constant 0.000000e+00 : f32
      %80 = vector.broadcast %cst_65 : f32 to vector<1x1x8xf32>
      %81 = vector.extract_strided_slice %79 {offsets = [0, 0, 0], sizes = [1, 15, 8], strides = [1, 1, 1]} : vector<1x16x8xf32> to vector<1x15x8xf32>
      %82 = tpu.concatenate %80, %81 in 1 : vector<1x1x8xf32>, vector<1x15x8xf32> -> vector<1x16x8xf32>
      %c17 = arith.constant 17 : index
      %c0_66 = arith.constant 0 : index
      %c0_67 = arith.constant 0 : index
      %83 = vector.load %arg10[%c17, %c0_66, %c0_67] : memref<18x16x24xf32, #tpu.memory_space<vmem>>, vector<1x16x8xf32>
      tpu.vector_store %arg10[%c17, %c0_66, %c0_67], %82 {strides = array<i32>} : memref<18x16x24xf32, #tpu.memory_space<vmem>>, vector<1x16x8xf32>,
      %c17_68 = arith.constant 17 : index
      %c0_69 = arith.constant 0 : index
      %c8_70 = arith.constant 8 : index
      %84 = vector.load %arg10[%c17_68, %c0_69, %c8_70] : memref<18x16x24xf32, #tpu.memory_space<vmem>>, vector<1x16x8xf32>
      tpu.vector_store %arg10[%c17_68, %c0_69, %c8_70], %79 {strides = array<i32>} : memref<18x16x24xf32, #tpu.memory_space<vmem>>, vector<1x16x8xf32>,
      %85 = vector.extract_strided_slice %79 {offsets = [0, 1, 0], sizes = [1, 15, 8], strides = [1, 1, 1]} : vector<1x16x8xf32> to vector<1x15x8xf32>
      %86 = tpu.concatenate %85, %80 in 1 : vector<1x15x8xf32>, vector<1x1x8xf32> -> vector<1x16x8xf32>
      %c17_71 = arith.constant 17 : index
      %c0_72 = arith.constant 0 : index
      %c16_73 = arith.constant 16 : index
      %87 = vector.load %arg10[%c17_71, %c0_72, %c16_73] : memref<18x16x24xf32, #tpu.memory_space<vmem>>, vector<1x16x8xf32>
      tpu.vector_store %arg10[%c17_71, %c0_72, %c16_73], %86 {strides = array<i32>} : memref<18x16x24xf32, #tpu.memory_space<vmem>>, vector<1x16x8xf32>,
    } else {
    }
    %cst_22 = arith.constant 0.000000e+00 : f32
    %33 = vector.broadcast %cst_22 : f32 to vector<16x16x8xf32>
    %c0_23 = arith.constant 0 : index
    %c0_24 = arith.constant 0 : index
    %c0_25 = arith.constant 0 : index
    %34 = vector.load %arg10[%c0_23, %c0_24, %c0_25] : memref<18x16x24xf32, #tpu.memory_space<vmem>>, vector<16x16x24xf32>
    %c0_26 = arith.constant 0 : index
    %c0_27 = arith.constant 0 : index
    %c0_28 = arith.constant 0 : index
    %35 = vector.load %arg5[%c0_26, %c0_27, %c0_28] : memref<3x24x8xf32, #tpu.memory_space<vmem>>, vector<1x24x8xf32>
    %36 = vector.shape_cast %35 : vector<1x24x8xf32> to vector<24x8xf32>
    %cst_29 = arith.constant dense<0.000000e+00> : vector<16x16x8xf32>
    %37 = tpu.matmul %34, %36, %cst_29 {dimension_numbers = #tpu.dot_dimension_numbers<[2], [0], [0, 1], [1], [0, 0, 0, 1, 1, 1], [], []>} : vector<16x16x24xf32>, vector<24x8xf32>, vector<16x16x8xf32> -> vector<16x16x8xf32>
    %38 = arith.addf %33, %37 : vector<16x16x8xf32>
    %c1_30 = arith.constant 1 : index
    %c0_31 = arith.constant 0 : index
    %c0_32 = arith.constant 0 : index
    %39 = vector.load %arg10[%c1_30, %c0_31, %c0_32] : memref<18x16x24xf32, #tpu.memory_space<vmem>>, vector<16x16x24xf32>
    %c1_33 = arith.constant 1 : index
    %c0_34 = arith.constant 0 : index
    %c0_35 = arith.constant 0 : index
    %40 = vector.load %arg5[%c1_33, %c0_34, %c0_35] : memref<3x24x8xf32, #tpu.memory_space<vmem>>, vector<1x24x8xf32>
    %41 = vector.shape_cast %40 : vector<1x24x8xf32> to vector<24x8xf32>
    %cst_36 = arith.constant dense<0.000000e+00> : vector<16x16x8xf32>
    %42 = tpu.matmul %39, %41, %cst_36 {dimension_numbers = #tpu.dot_dimension_numbers<[2], [0], [0, 1], [1], [0, 0, 0, 1, 1, 1], [], []>} : vector<16x16x24xf32>, vector<24x8xf32>, vector<16x16x8xf32> -> vector<16x16x8xf32>
    %43 = arith.addf %38, %42 : vector<16x16x8xf32>
    %c2 = arith.constant 2 : index
    %c0_37 = arith.constant 0 : index
    %c0_38 = arith.constant 0 : index
    %44 = vector.load %arg10[%c2, %c0_37, %c0_38] : memref<18x16x24xf32, #tpu.memory_space<vmem>>, vector<16x16x24xf32>
    %c2_39 = arith.constant 2 : index
    %c0_40 = arith.constant 0 : index
    %c0_41 = arith.constant 0 : index
    %45 = vector.load %arg5[%c2_39, %c0_40, %c0_41] : memref<3x24x8xf32, #tpu.memory_space<vmem>>, vector<1x24x8xf32>
    %46 = vector.shape_cast %45 : vector<1x24x8xf32> to vector<24x8xf32>
    %cst_42 = arith.constant dense<0.000000e+00> : vector<16x16x8xf32>
    %47 = tpu.matmul %44, %46, %cst_42 {dimension_numbers = #tpu.dot_dimension_numbers<[2], [0], [0, 1], [1], [0, 0, 0, 1, 1, 1], [], []>} : vector<16x16x24xf32>, vector<24x8xf32>, vector<16x16x8xf32> -> vector<16x16x8xf32>
    %48 = arith.addf %43, %47 : vector<16x16x8xf32>
    %c0_43 = arith.constant 0 : index
    %c0_44 = arith.constant 0 : index
    %c0_45 = arith.constant 0 : index
    %c0_46 = arith.constant 0 : index
    %49 = vector.load %arg8[%c0_43, %c0_44, %c0_45, %c0_46] : memref<1x16x16x8xf32, #tpu.memory_space<vmem>>, vector<1x16x16x8xf32>
    %50 = vector.shape_cast %49 : vector<1x16x16x8xf32> to vector<16x16x8xf32>
    %51 = vector.shape_cast %48 : vector<16x16x8xf32> to vector<1x16x16x8xf32>
    tpu.vector_store %arg8[%c0_43, %c0_44, %c0_45, %c0_46], %51 {strides = array<i32>} : memref<1x16x16x8xf32, #tpu.memory_space<vmem>>, vector<1x16x16x8xf32>,
    %cst_47 = arith.constant dense<0.000000e+00> : vector<16x8xf32>
    %52 = vector.multi_reduction <add>, %48, %cst_47 [0] : vector<16x16x8xf32> to vector<16x8xf32>
    %cst_48 = arith.constant dense<0.000000e+00> : vector<8xf32>
    %53 = vector.multi_reduction <add>, %52, %cst_48 [0] : vector<16x8xf32> to vector<8xf32>
    %54 = vector.shape_cast %53 : vector<8xf32> to vector<1x8xf32>
    %cst_49 = arith.constant 3.906250e-03 : f32
    %55 = vector.broadcast %cst_49 : f32 to vector<1x8xf32>
    %56 = arith.mulf %54, %55 : vector<1x8xf32>
    %57 = vector.shape_cast %56 : vector<1x8xf32> to vector<1x1x8xf32>
    %58 = vector.broadcast %57 : vector<1x1x8xf32> to vector<16x16x8xf32>
    %59 = arith.subf %48, %58 : vector<16x16x8xf32>
    %60 = arith.mulf %59, %59 : vector<16x16x8xf32>
    %cst_50 = arith.constant dense<0.000000e+00> : vector<16x8xf32>
    %61 = vector.multi_reduction <add>, %60, %cst_50 [0] : vector<16x16x8xf32> to vector<16x8xf32>
    %cst_51 = arith.constant dense<0.000000e+00> : vector<8xf32>
    %62 = vector.multi_reduction <add>, %61, %cst_51 [0] : vector<16x8xf32> to vector<8xf32>
    %63 = vector.shape_cast %62 : vector<8xf32> to vector<1x8xf32>
    %c0_52 = arith.constant 0 : index
    %c0_53 = arith.constant 0 : index
    %c0_54 = arith.constant 0 : index
    %c0_55 = arith.constant 0 : index
    %64 = vector.load %arg9[%c0_52, %c0_53, %c0_54, %c0_55] : memref<1x1x2x8xf32, #tpu.memory_space<vmem>>, vector<1x1x1x8xf32>
    %65 = vector.shape_cast %64 : vector<1x1x1x8xf32> to vector<1x8xf32>
    %66 = vector.shape_cast %54 : vector<1x8xf32> to vector<1x1x1x8xf32>
    tpu.vector_store %arg9[%c0_52, %c0_53, %c0_54, %c0_55], %66 {strides = array<i32>} : memref<1x1x2x8xf32, #tpu.memory_space<vmem>>, vector<1x1x1x8xf32>,
    %c0_56 = arith.constant 0 : index
    %c0_57 = arith.constant 0 : index
    %c1_58 = arith.constant 1 : index
    %c0_59 = arith.constant 0 : index
    %67 = vector.load %arg9[%c0_56, %c0_57, %c1_58, %c0_59] : memref<1x1x2x8xf32, #tpu.memory_space<vmem>>, vector<1x1x1x8xf32>
    %68 = vector.shape_cast %67 : vector<1x1x1x8xf32> to vector<1x8xf32>
    %69 = vector.shape_cast %63 : vector<1x8xf32> to vector<1x1x1x8xf32>
    tpu.vector_store %arg9[%c0_56, %c0_57, %c1_58, %c0_59], %69 {strides = array<i32>} : memref<1x1x2x8xf32, #tpu.memory_space<vmem>>, vector<1x1x1x8xf32>,
    return
  }
  func.func @transform_0(%arg0: i32, %arg1: i32) -> (i32, i32, i32, i32) {
    %c0_i32 = arith.constant 0 : i32
    %c0_i32_0 = arith.constant 0 : i32
    %c0_i32_1 = arith.constant 0 : i32
    return %arg0, %arg1, %c0_i32, %c0_i32_0 : i32, i32, i32, i32
  }
  func.func @transform_1(%arg0: i32, %arg1: i32) -> (i32, i32, i32, i32) {
    %c16_i32 = arith.constant 16 : i32
    %0 = arith.muli %arg1, %c16_i32 : i32
    %c1_i32 = arith.constant 1 : i32
    %1 = arith.subi %0, %c1_i32 : i32
    %c0_i32 = arith.constant 0 : i32
    %2 = arith.maxsi %1, %c0_i32 : i32
    %c0_i32_0 = arith.constant 0 : i32
    %c0_i32_1 = arith.constant 0 : i32
    %c0_i32_2 = arith.constant 0 : i32
    return %arg0, %2, %c0_i32_0, %c0_i32_1 : i32, i32, i32, i32
  }
  func.func @transform_2(%arg0: i32, %arg1: i32) -> (i32, i32, i32, i32) {
    %c1_i32 = arith.constant 1 : i32
    %0 = arith.addi %arg1, %c1_i32 : i32
    %c16_i32 = arith.constant 16 : i32
    %1 = arith.muli %0, %c16_i32 : i32
    %c15_i32 = arith.constant 15 : i32
    %2 = arith.minsi %1, %c15_i32 : i32
    %c0_i32 = arith.constant 0 : i32
    %c0_i32_0 = arith.constant 0 : i32
    %c0_i32_1 = arith.constant 0 : i32
    return %arg0, %2, %c0_i32, %c0_i32_0 : i32, i32, i32, i32
  }
  func.func @transform_3(%arg0: i32, %arg1: i32) -> (i32, i32, i32) {
    %c0_i32 = arith.constant 0 : i32
    %c0_i32_0 = arith.constant 0 : i32
    %c0_i32_1 = arith.constant 0 : i32
    %c0_i32_2 = arith.constant 0 : i32
    return %c0_i32, %c0_i32_0, %c0_i32_1 : i32, i32, i32
  }
  func.func @transform_4(%arg0: i32, %arg1: i32) -> (i32, i32) {
    %c0_i32 = arith.constant 0 : i32
    %c0_i32_0 = arith.constant 0 : i32
    %c0_i32_1 = arith.constant 0 : i32
    return %c0_i32, %c0_i32_0 : i32, i32
  }
  func.func @transform_5(%arg0: i32, %arg1: i32) -> (i32, i32) {
    %c0_i32 = arith.constant 0 : i32
    %c0_i32_0 = arith.constant 0 : i32
    %c0_i32_1 = arith.constant 0 : i32
    return %c0_i32, %c0_i32_0 : i32, i32
  }
  func.func @transform_6(%arg0: i32, %arg1: i32) -> (i32, i32, i32, i32) {
    %c0_i32 = arith.constant 0 : i32
    %c0_i32_0 = arith.constant 0 : i32
    %c0_i32_1 = arith.constant 0 : i32
    return %arg0, %arg1, %c0_i32, %c0_i32_0 : i32, i32, i32, i32
  }
  func.func @transform_7(%arg0: i32, %arg1: i32) -> (i32, i32, i32, i32) {
    %c0_i32 = arith.constant 0 : i32
    %c0_i32_0 = arith.constant 0 : i32
    %c0_i32_1 = arith.constant 0 : i32
    return %arg0, %arg1, %c0_i32, %c0_i32_0 : i32, i32, i32, i32
  }
}

module attributes {stable_mosaic.version = 11 : i64} {
  func.func @_scale_relu_kernel(%arg0: i32, %arg1: memref<32x128xf32, #tpu.memory_space<vmem>>, %arg2: memref<1x128xf32, #tpu.memory_space<vmem>>, %arg3: memref<1x128xf32, #tpu.memory_space<vmem>>, %arg4: memref<32x128xf32, #tpu.memory_space<vmem>>) attributes {dimension_semantics = [#tpu.dimension_semantics<parallel>], iteration_bounds = array<i64: 1>, scalar_prefetch = 0 : i64, scratch_operands = 0 : i64, tpu.core_type = #tpu.core_type<tc>, window_params = [{transform_indices = @transform_0, window_bounds = array<i64: 32, 128>}, {pipeline_mode = #tpu.pipeline_mode<synchronous>, transform_indices = @transform_1, window_bounds = array<i64: 1, 128>}, {pipeline_mode = #tpu.pipeline_mode<synchronous>, transform_indices = @transform_2, window_bounds = array<i64: 1, 128>}, {transform_indices = @transform_3, window_bounds = array<i64: 32, 128>}]} {
    %c0 = arith.constant 0 : index
    %c0_0 = arith.constant 0 : index
    %0 = vector.load %arg1[%c0, %c0_0] : memref<32x128xf32, #tpu.memory_space<vmem>>, vector<32x128xf32>
    %c0_1 = arith.constant 0 : index
    %c0_2 = arith.constant 0 : index
    %1 = vector.load %arg2[%c0_1, %c0_2] : memref<1x128xf32, #tpu.memory_space<vmem>>, vector<1x128xf32>
    %2 = vector.broadcast %1 : vector<1x128xf32> to vector<32x128xf32>
    %3 = arith.mulf %0, %2 : vector<32x128xf32>
    %c0_3 = arith.constant 0 : index
    %c0_4 = arith.constant 0 : index
    %4 = vector.load %arg3[%c0_3, %c0_4] : memref<1x128xf32, #tpu.memory_space<vmem>>, vector<1x128xf32>
    %5 = vector.broadcast %4 : vector<1x128xf32> to vector<32x128xf32>
    %6 = arith.addf %3, %5 : vector<32x128xf32>
    %cst = arith.constant 0.000000e+00 : f32
    %7 = vector.broadcast %cst : f32 to vector<32x128xf32>
    %8 = arith.maximumf %6, %7 : vector<32x128xf32>
    %c0_5 = arith.constant 0 : index
    %c0_6 = arith.constant 0 : index
    %9 = vector.load %arg4[%c0_5, %c0_6] : memref<32x128xf32, #tpu.memory_space<vmem>>, vector<32x128xf32>
    tpu.vector_store %arg4[%c0_5, %c0_6], %8 {strides = array<i32>} : memref<32x128xf32, #tpu.memory_space<vmem>>, vector<32x128xf32>,
    return
  }
  func.func @transform_0(%arg0: i32) -> (i32, i32) {
    %c0_i32 = arith.constant 0 : i32
    %c0_i32_0 = arith.constant 0 : i32
    return %arg0, %c0_i32 : i32, i32
  }
  func.func @transform_1(%arg0: i32) -> (i32, i32) {
    %c0_i32 = arith.constant 0 : i32
    %c0_i32_0 = arith.constant 0 : i32
    %c0_i32_1 = arith.constant 0 : i32
    return %c0_i32, %c0_i32_0 : i32, i32
  }
  func.func @transform_2(%arg0: i32) -> (i32, i32) {
    %c0_i32 = arith.constant 0 : i32
    %c0_i32_0 = arith.constant 0 : i32
    %c0_i32_1 = arith.constant 0 : i32
    return %c0_i32, %c0_i32_0 : i32, i32
  }
  func.func @transform_3(%arg0: i32) -> (i32, i32) {
    %c0_i32 = arith.constant 0 : i32
    %c0_i32_0 = arith.constant 0 : i32
    return %arg0, %c0_i32 : i32, i32
  }
}

</mosaic_0001>

<bundles_post_ra>
// kernel: double_conv.5
= control target key start
LH: loop header
LB: loop body
LE: loop exit
PB: predicated region body
PF: predicated region fallthrough
CT: control target
= control target key end

     0   :  { %s104_s0 = inlined_call_operand.vmem [shape: f32[32,128], index: 0, kind: input, shape index: {}]   ;;  %s105_s1 = inlined_call_operand.vmem [shape: f32[1,128], index: 1, kind: input, shape index: {}]   ;;  %s106_s2 = inlined_call_operand.vmem [shape: f32[1,128], index: 2, kind: input, shape index: {}]   ;;  %s107_s3 = inlined_call_operand.vmem [shape: f32[32,128], index: 3, kind: output, shape index: {}]  }
   0x1   :  { %v14_v0 = vld [vmem:[%s104_s0] sm:$0xff]  ;;  %v15_v4 = vld [vmem:[%s104_s0 + $0x8] sm:$0xff]  ;;  %v16_v5 = vld [vmem:[%s104_s0 + $0x10] sm:$0xff] }
   0x2   :  { %v52_v1 = vld [vmem:[%s105_s1] ss:$0 sm:$0xff]  ;;  %v17_v6 = vld [vmem:[%s104_s0 + $0x18] sm:$0xff] }
   0x3   :  { %v53_v2 = vld [vmem:[%s106_s2] ss:$0 sm:$0xff]  ;;  %v25_v3 = vmul.f32 %v52_v1, %v14_v0  ;;  %v26_v7 = vmul.f32 %v52_v1, %v15_v4  ;;  %v27_v8 = vmul.f32 %v52_v1, %v16_v5  ;;  %v28_v9 = vmul.f32 %v52_v1, %v17_v6 }
   0x5   :  { %v36_v10 = vadd.f32 %v53_v2, %v25_v3  ;;  %v37_v11 = vadd.f32 %v53_v2, %v26_v7  ;;  %v38_v12 = vadd.f32 %v53_v2, %v27_v8  ;;  %v39_v13 = vadd.f32 %v53_v2, %v28_v9 }
   0x7   :  { %v40_v14 = vmax.f32 %v36_v10, 0.0  ;;  %v41_v15 = vmax.f32 %v37_v11, 0.0  ;;  %v42_v16 = vmax.f32 %v38_v12, 0.0  ;;  %v43_v17 = vmax.f32 %v39_v13, 0.0 }
   0x9   :  { %44 = vst [vmem:[%s107_s3] sm:$0xff] %v40_v14  ;;  %45 = vst [vmem:[%s107_s3 + $0x8] sm:$0xff] %v41_v15 }
   0xa   :  { %46 = vst [vmem:[%s107_s3 + $0x10] sm:$0xff] %v42_v16  ;;  %47 = vst [vmem:[%s107_s3 + $0x18] sm:$0xff] %v43_v17 }

// kernel: double_conv.4
= control target key start
LH: loop header
LB: loop body
LE: loop exit
PB: predicated region body
PF: predicated region fallthrough
CT: control target
= control target key end

     0   :  { %s3246_s24 = smov 0   ;;  %s3248_s1 = smov 0   ;;  %s4519_s0 = inlined_call_operand.vmem [shape: f32[2,16,16,8], index: 0, kind: input, shape index: {}, may-alias: {0,1,2}]   ;;  %s4520_s1 = inlined_call_operand.vmem [shape: f32[2,16,16,8], index: 1, kind: input, shape index: {}, may-alias: {0,1,2}]   ;;  %s4521_s2 = inlined_call_operand.vmem [shape: f32[2,16,16,8], index: 2, kind: input, shape index: {}, may-alias: {0,1,2}]   ;;  %s4522_s3 = inlined_call_operand.vmem [shape: f32[3,24,8], index: 3, kind: input, shape index: {}]   ;;  %s4523_s4 = inlined_call_operand.vmem [shape: f32[1,8], index: 4, kind: input, shape index: {}]   ;;  %s4524_s5 = inlined_call_operand.vmem [shape: f32[1,8], index: 5, kind: input, shape index: {}]   ;;  %s4525_s6 = inlined_call_operand.vmem [shape: f32[2,16,16,8], index: 6, kind: output, shape index: {0}]   ;;  %s4526_s7 = inlined_call_operand.vmem [shape: f32[2,1,2,8], index: 7, kind: output, shape index: {1}]  }
   0x1   :  { %s3250_s2 = smov 0  }
   0x2 LB: > { %s30_s25 = sadd.s32 1, %s3197_s1  ;;  %p2758_p0 = scmp.ge.s32.totalorder %s3201_s2, 1  ;;  %s3201_s2 = sphi %s3250_s2, %s18_s2   ;;  %s3197_s1 = sphi %s3248_s1, %s4528_s1   ;;  %s3193_s24 = sphi %s3246_s24, %s4527_s24  }
   0x3   : > { %p32_p1 = scmp.ge.s32.totalorder %s30_s25, 2  ;;  %p328_p2 = scmp.lt.s32.totalorder %s3201_s2, 3 }
   0x5   : > { %s4530_s25 = smov (%p32_p1, %s30_s25), 0  ;;  %p329_p3 = pnand %p2758_p0, %p328_p2 }
   0x6   : > { %p404_p4 = scmp.lt.s32.totalorder (!%p329_p3), %s3193_s24, 1  ;;  %s3203_s11 = smov (!%p329_p3), 8  }
   0x7   : > { %332 = sbr.rel (%p329_p3) target bundleno = 610 (0x262), region = 44  ;;  %s3204_s18 = smov (!%p329_p3), 16  }
   0xc   : > { %s4532_s24 = smov (!%p404_p4, %s3193_s24), 1  ;;  %v3270_v0 = vld [vmem:[%s4523_s4] ss:$0 sm:$0xff]  ;;  %vm900_vm0 = vcmask 1046528   ;;  %v2772_v33 = vld [vmem:[%s4522_s3 + $0x28] sm:$0xff]  ;;  %v2770_v43 = vld [vmem:[%s4522_s3 + $0x18] sm:$0xff] }
   0xd   : > { %s2874_s26 = sshll.u32 %s4532_s24, 8  ;;  %v3282_v1 = vld [vmem:[%s4524_s5] ss:$0 sm:$0xff]  ;;  %2984 = vmatprep.subr.mxu0 %v2772_v33  ;;  %3146 = vmatprep.subr.mxu1 %v2772_v33  ;;  %vm640_vm1 = vcmask 1040384   ;;  %vm738_vm2 = vcmask 64512   ;;  %vm1130_vm3 = vcmask 195584  }
   0xe   : > { %s3277_s8 = scalar_lea.vmem %s4519_s0, %s2874_s26  ;;  %2985 = vmatpush3.msra.mxu0 %v2772_v33  ;;  %v2771_v40 = vld [vmem:[%s4522_s3 + $0x20] sm:$0xff]  ;;  %3149 = vmatpush3.msra.mxu1 %v2772_v33  ;;  %vm867_vm4 = vcmask 130112   ;;  %vm1093_vm5 = vcmask 195712   ;;  %s4146_s13 = scalar_lea.vmem %s4525_s6, %s2874_s26  ;;  %vm2572_vm6 = vcmask 57344  }
   0xf   : > { %v484_v2 = vld [vmem:[%s3277_s8 + $0x80] sm:$0xff]  ;;  %v485_v4 = vld [vmem:[%s3277_s8 + $0x88] sm:$0xff]  ;;  %v486_v9 = vld [vmem:[%s3277_s8 + $0x90] sm:$0xff]  ;;  %2986 = vmatprep.subr.mxu0 %v2771_v40  ;;  %3147 = vmatprep.subr.mxu1 %v2771_v40  ;;  %s2767_s26 = sshll.u32 %s4532_s24, 1 }
  0x10   : > { %v468_v3 = vld [vmem:[%s3277_s8] sm:$0xff]  ;;  %v522_v5 = vmul.f32 %v3270_v0, %v484_v2  ;;  %v523_v7 = vmul.f32 %v3270_v0, %v485_v4  ;;  %v469_v8 = vld [vmem:[%s3277_s8 + $0x8] sm:$0xff]  ;;  %v524_v14 = vmul.f32 %v3270_v0, %v486_v9  ;;  %v487_v16 = vld [vmem:[%s3277_s8 + $0x98] sm:$0xff]  ;;  %2987 = vmatpush3.msra.mxu0 %v2771_v40  ;;  %3150 = vmatpush3.msra.mxu1 %v2771_v40  ;;  %s4379_s16 = scalar_lea.vmem %s4526_s7, %s2767_s26 }
  0x11   : > { %v506_v6 = vmul.f32 %v3270_v0, %v468_v3  ;;  %v507_v10 = vmul.f32 %v3270_v0, %v469_v8  ;;  %v471_v20 = vld [vmem:[%s3277_s8 + $0x18] sm:$0xff]  ;;  %v525_v23 = vmul.f32 %v3270_v0, %v487_v16  ;;  %v470_v25 = vld [vmem:[%s3277_s8 + $0x10] sm:$0xff]  ;;  %v489_v27 = vld [vmem:[%s3277_s8 + $0xa8] sm:$0xff]  ;;  %2988 = vmatprep.subr.mxu0 %v2770_v43  ;;  %3148 = vmatprep.subr.mxu1 %v2770_v43 }
  0x12   : > { %v560_v11 = vadd.f32 %v3282_v1, %v522_v5  ;;  %v561_v13 = vadd.f32 %v3282_v1, %v523_v7  ;;  %v562_v22 = vadd.f32 %v3282_v1, %v524_v14  ;;  %v509_v26 = vmul.f32 %v3270_v0, %v471_v20  ;;  %v488_v28 = vld [vmem:[%s3277_s8 + $0xa0] sm:$0xff]  ;;  %v473_v32 = vld [vmem:[%s3277_s8 + $0x28] sm:$0xff]  ;;  %v490_v50 = vld [vmem:[%s3277_s8 + $0xb0] sm:$0xff]  ;;  %2989 = vmatpush3.msra.mxu0 %v2770_v43 }
  0x13   : > { %v544_v12 = vadd.f32 %v3282_v1, %v506_v6  ;;  %v545_v15 = vadd.f32 %v3282_v1, %v507_v10  ;;  %v563_v30 = vadd.f32 %v3282_v1, %v525_v23  ;;  %v508_v31 = vmul.f32 %v3270_v0, %v470_v25  ;;  %v472_v38 = vld [vmem:[%s3277_s8 + $0x20] sm:$0xff]  ;;  %v491_v51 = vld [vmem:[%s3277_s8 + $0xb8] sm:$0xff]  ;;  %v474_v62 = vld [vmem:[%s3277_s8 + $0x30] sm:$0xff]  ;;  %3151 = vmatpush3.msra.mxu1 %v2770_v43 }
  0x14   : > { %v3299_v17 = vmax.f32 %v560_v11, 0.0  ;;  %v3303_v19 = vmax.f32 %v561_v13, 0.0  ;;  %v3323_v29 = vmax.f32 %v562_v22, 0.0  ;;  %v527_v37 = vmul.f32 %v3270_v0, %v489_v27  ;;  %v475_v5 = vld [vmem:[%s3277_s8 + $0x38] sm:$0xff]  ;;  %v494_v10 = vld [vmem:[%s3277_s8 + $0xd0] sm:$0xff] }
  0x15   : > { %v3301_v18 = vmax.f32 %v544_v12, 0.0  ;;  %v3310_v21 = vmax.f32 %v545_v15, 0.0  ;;  %v547_v39 = vadd.f32 %v3282_v1, %v509_v26  ;;  %v526_v41 = vmul.f32 %v3270_v0, %v488_v28  ;;  %v495_v11 = vld [vmem:[%s3277_s8 + $0xd8] sm:$0xff]  ;;  %v478_v28 = vld [vmem:[%s3277_s8 + $0x50] sm:$0xff] }
  0x16   : > { %803 = vrot.lane.b32.xlu0 %v3299_v17, %s3203_s11  ;;  %v926_v24 = vrot.slane %v3303_v19, 1  ;;  %v511_v42 = vmul.f32 %v3270_v0, %v473_v32  ;;  %v3348_v44 = vmax.f32 %v563_v30, 0.0  ;;  %v546_v45 = vadd.f32 %v3282_v1, %v508_v31  ;;  %v479_v30 = vld [vmem:[%s3277_s8 + $0x58] sm:$0xff] }
  0x17   : > { %771 = vrot.lane.b32.xlu1 %v3301_v18, %s3203_s11  ;;  %v901_v35 = vrot.slane %v3301_v18, 1  ;;  %v902_v36 = vrot.slane %v3310_v21, 1  ;;  %v510_v46 = vmul.f32 %v3270_v0, %v472_v38  ;;  %v925_v48 = vrot.slane %v3299_v17, 1 }
  0x18   : > { %v973_v34 = vsel %vm900_vm0, %v926_v24, 0.0  ;;  %v565_v49 = vadd.f32 %v3282_v1, %v527_v37  ;;  %v928_v52 = vrot.slane %v3323_v29, 1  ;;  %v929_v53 = vrot.slane %v3348_v44, 1 }
  0x19   : > { %v903_v47 = vsel %vm900_vm0, %v901_v35, %v902_v36  ;;  %v3359_v54 = vmax.f32 %v547_v39, 0.0  ;;  %v666_v55 = vrot.slane %v3303_v19, 7  ;;  %v564_v56 = vadd.f32 %v3282_v1, %v526_v41 }
  0x1a   : > { %805 = vrot.lane.b32.xlu0 %v3303_v19, %s3203_s11  ;;  %v549_v57 = vadd.f32 %v3282_v1, %v511_v42  ;;  %v3367_v58 = vmax.f32 %v546_v45, 0.0  ;;  %v548_v59 = vadd.f32 %v3282_v1, %v510_v46  ;;  %v528_v60 = vmul.f32 %v3270_v0, %v490_v50 }
  0x1b   : > { %773 = vrot.lane.b32.xlu1 %v3310_v21, %s3203_s11  ;;  %v529_v61 = vmul.f32 %v3270_v0, %v491_v51  ;;  %v642_v63 = vrot.slane %v3310_v21, 7  ;;  %v927_v2 = vsel %vm900_vm0, %v925_v48, %v926_v24  ;;  %v965_v3 = vsel %vm900_vm0, %v902_v36, 0.0  ;;  %v492_v48 = vld [vmem:[%s3277_s8 + $0xc0] sm:$0xff] }
  0x1c   : > { %v3376_v4 = vmax.f32 %v565_v49, 0.0  ;;  %v669_v6 = vrot.slane %v3348_v44, 7  ;;  %v930_v7 = vsel %vm900_vm0, %v928_v52, %v929_v53  ;;  %v904_v8 = vrot.slane %v3367_v58, 1  ;;  %v493_v49 = vld [vmem:[%s3277_s8 + $0xc8] sm:$0xff] }
  0x1d   : > { %v905_v9 = vrot.slane %v3359_v54, 1  ;;  %v974_v12 = vsel %vm900_vm0, %v929_v53, 0.0  ;;  %v3386_v13 = vmax.f32 %v564_v56, 0.0  ;;  %v3388_v14 = vmax.f32 %v549_v57, 0.0  ;;  %v496_v56 = vld [vmem:[%s3277_s8 + $0xe0] sm:$0xff] }
  0x1e   : > { %1031 = vrot.lane.b32.xlu0 %v973_v34, %s3204_s18  ;;  %v512_v15 = vmul.f32 %v3270_v0, %v474_v62  ;;  %v3393_v16 = vmax.f32 %v548_v59, 0.0  ;;  %v566_v20 = vadd.f32 %v3282_v1, %v528_v60  ;;  %v567_v22 = vadd.f32 %v3282_v1, %v529_v61  ;;  %v497_v62 = vld [vmem:[%s3277_s8 + $0xe8] sm:$0xff] }
  0x1f   : > { %807 = vrot.lane.b32.xlu1 %v3323_v29, %s3203_s11  ;;  %v513_v23 = vmul.f32 %v3270_v0, %v475_v5  ;;  %v931_v24 = vrot.slane %v3386_v13, 1  ;;  %v932_v25 = vrot.slane %v3376_v4, 1  ;;  %v532_v26 = vmul.f32 %v3270_v0, %v494_v10 }
  0x20   : > { %v533_v27 = vmul.f32 %v3270_v0, %v495_v11  ;;  %v645_v31 = vrot.slane %v3359_v54, 7  ;;  %v906_v32 = vsel %vm900_vm0, %v904_v8, %v905_v9  ;;  %v3407_v33 = vsel %vm900_vm0, %v905_v9, 0.0  ;;  %v480_v8 = vld [vmem:[%s3277_s8 + $0x60] sm:$0xff] }
  0x21   : > { %v907_v34 = vrot.slane %v3393_v16, 1  ;;  %v908_v35 = vrot.slane %v3388_v14, 1  ;;  %v550_v36 = vadd.f32 %v3282_v1, %v512_v15  ;;  %v570_v37 = vadd.f32 %v3282_v1, %v532_v26  ;;  %v481_v15 = vld [vmem:[%s3277_s8 + $0x68] sm:$0xff] }
  0x22   : > { %997 = vrot.lane.b32.xlu0 %v903_v47, %s3204_s18  ;;  %v571_v38 = vadd.f32 %v3282_v1, %v533_v27  ;;  %v672_v39 = vrot.slane %v3376_v4, 7  ;;  %v551_v40 = vadd.f32 %v3282_v1, %v513_v23  ;;  %v516_v41 = vmul.f32 %v3270_v0, %v478_v28 }
  0x23   : > { %809 = vrot.lane.b32.xlu1 %v3348_v44, %s3203_s11  ;;  %v517_v42 = vmul.f32 %v3270_v0, %v479_v30  ;;  %v3422_v43 = vsel %vm900_vm0, %v931_v24, %v932_v25  ;;  %v3425_v45 = vsel %vm900_vm0, %v932_v25, 0.0  ;;  %v3427_v46 = vmax.f32 %v566_v20, 0.0  ;;  %v498_v20 = vld [vmem:[%s3277_s8 + $0xf0] sm:$0xff] }
  0x24   : > { %v3429_v47 = vmax.f32 %v567_v22, 0.0  ;;  %v3433_v50 = vmax.f32 %v570_v37, 0.0  ;;  %v3435_v51 = vmax.f32 %v571_v38, 0.0  ;;  %v554_v52 = vadd.f32 %v3282_v1, %v516_v41 }
  0x25   : > { %v555_v53 = vadd.f32 %v3282_v1, %v517_v42  ;;  %v648_v57 = vrot.slane %v3388_v14, 7  ;;  %v3444_v59 = vsel %vm900_vm0, %v907_v34, %v908_v35  ;;  %v3447_v61 = vmax.f32 %v550_v36, 0.0  ;;  %v499_v34 = vld [vmem:[%s3277_s8 + $0xf8] sm:$0xff] }
  0x26   : > { %999 = vrot.lane.b32.xlu0 %v965_v3, %s3204_s18  ;;  %v675_v60 = vrot.slane %v3429_v47, 7  ;;  %v940_v3 = vrot.slane %v3433_v50, 1  ;;  %v941_v5 = vrot.slane %v3435_v51, 1  ;;  %v530_v9 = vmul.f32 %v3270_v0, %v492_v48 }
  0x27   : > { %1029 = vrot.lane.b32.xlu1 %v927_v2, %s3204_s18  ;;  %v3453_v2 = vmax.f32 %v551_v40, 0.0  ;;  %v3462_v10 = vmul.f32 %v3270_v0, %v493_v49  ;;  %v3464_v11 = vmax.f32 %v555_v53, 0.0  ;;  %v535_v25 = vmul.f32 %v3270_v0, %v497_v62  ;;  %v482_v62 = vld [vmem:[%s3277_s8 + $0x70] sm:$0xff] }
  0x28   : > { %v3470_v22 = vsel %vm900_vm0, %v940_v3, %v941_v5  ;;  %v3473_v23 = vsel %vm900_vm0, %v941_v5, 0.0  ;;  %v518_v30 = vmul.f32 %v3270_v0, %v480_v8  ;;  %v519_v37 = vmul.f32 %v3270_v0, %v481_v15 }
  0x29   : > { %v651_v26 = vrot.slane %v3453_v2, 7  ;;  %v917_v27 = vrot.slane %v3464_v11, 1  ;;  %v573_v36 = vadd.f32 %v3282_v1, %v535_v25  ;;  %v536_v38 = vmul.f32 %v3270_v0, %v498_v20 }
  0x2a   : > { %1033 = vrot.lane.b32.xlu0 %v930_v7, %s3204_s18  ;;  %v3457_v7 = vmax.f32 %v554_v52, 0.0  ;;  %v665_v40 = vrot.slane %v3299_v17, 7  ;;  %v557_v52 = vadd.f32 %v3282_v1, %v519_v37  ;;  %v476_v17 = vld [vmem:[%s3277_s8 + $0x40] sm:$0xff]  ;;  %v568_v15 = vadd.f32 %v3282_v1, %v530_v9 }
  0x2b   : > { %775 = vrot.lane.b32.xlu1 %v3367_v58, %s3203_s11  ;;  %v3495_v48 = vsel %vm900_vm0, %v917_v27, 0.0  ;;  %v3498_v49 = vmax.f32 %v573_v36, 0.0  ;;  %v574_v53 = vadd.f32 %v3282_v1, %v536_v38  ;;  %v477_v38 = vld [vmem:[%s3277_s8 + $0x48] sm:$0xff]  ;;  %v644_v21 = vrot.slane %v3367_v58, 7 }
  0x2c   : > { %v916_v24 = vrot.slane %v3457_v7, 1  ;;  %v729_v8 = vsel %vm640_vm1, 0.0, %v665_v40 }
  0x2d   : > { %v944_v20 = vrot.slane %v3498_v49, 1  ;;  %v3518_v25 = vmax.f32 %v574_v53, 0.0  ;;  %755 = vst.msk [vmem:[#allocation2 + $0x90] sm:$0xff] %vm738_vm2, %v729_v8  ;;  %v668_v8 = vrot.slane %v3323_v29, 7  ;;  %v722_v58 = vsel %vm640_vm1, 0.0, %v644_v21 }
  0x2e   : > { %1035 = vrot.lane.b32.xlu0 %v974_v12, %s3204_s18  ;;  %v534_v12 = vmul.f32 %v3270_v0, %v496_v56  ;;  %v3490_v41 = vsel %vm900_vm0, %v916_v24, %v917_v27  ;;  %v537_v56 = vmul.f32 %v3270_v0, %v499_v34  ;;  %v3516_v24 = vmax.f32 %v557_v52, 0.0  ;;  %741 = vst.msk [vmem:[#allocation2 + $0x20] sm:$0xff] %vm738_vm2, %v722_v58 }
  0x2f   : > { %777 = vrot.lane.b32.xlu1 %v3359_v54, %s3203_s11  ;;  %v3527_v34 = vmul.f32 %v3270_v0, %v476_v17  ;;  %v3533_v36 = vsel %vm900_vm0, %v944_v20, 0.0  ;;  %v946_v52 = vrot.slane %v3518_v25, 1  ;;  %v670_v29 = vsel %vm640_vm1, %v668_v8, %v669_v6 }
  0x30   : > { %v572_v28 = vadd.f32 %v3282_v1, %v534_v12  ;;  %v641_v12 = vrot.slane %v3301_v18, 7  ;;  %v575_v18 = vadd.f32 %v3282_v1, %v537_v56  ;;  %v920_v37 = vrot.slane %v3516_v24, 1  ;;  %758 = vst.msk [vmem:[#allocation2 + $0xa8] sm:$0xff] %vm738_vm2, %v670_v29 }
  0x31   : > { %v667_v56 = vsel %vm640_vm1, %v665_v40, %v666_v55  ;;  %v647_v6 = vrot.slane %v3393_v16, 7 }
  0x32   : > { %1001 = vrot.lane.b32.xlu0 %v906_v32, %s3204_s18  ;;  %v3492_v42 = vmax.f32 %v572_v28, 0.0  ;;  %v556_v32 = vadd.f32 %v3282_v1, %v518_v30  ;;  %v520_v28 = vmul.f32 %v3270_v0, %v482_v62  ;;  %v483_v30 = vld [vmem:[%s3277_s8 + $0x78] sm:$0xff]  ;;  %v3553_v17 = vsel %vm900_vm0, %v920_v37, 0.0  ;;  %756 = vst.msk [vmem:[#allocation2 + $0x98] sm:$0xff] %vm738_vm2, %v667_v56 }
  0x33   : > { %811 = vrot.lane.b32.xlu1 %v3386_v13, %s3203_s11  ;;  %v643_v19 = vsel %vm640_vm1, %v641_v12, %v642_v63  ;;  %v521_v55 = vmul.f32 %v3270_v0, %v483_v30  ;;  %v671_v63 = vrot.slane %v3386_v13, 7  ;;  %v646_v13 = vsel %vm640_vm1, %v644_v21, %v645_v31 }
  0x34   : > { %v943_v3 = vrot.slane %v3492_v42, 1  ;;  %v3506_v5 = vmax.f32 %v556_v32, 0.0  ;;  %v3538_v32 = vmax.f32 %v575_v18, 0.0  ;;  %v558_v53 = vadd.f32 %v3282_v1, %v520_v28  ;;  %740 = vst.msk [vmem:[#allocation2 + $0x18] sm:$0xff] %vm738_vm2, %v643_v19  ;;  %742 = vst.msk [vmem:[#allocation2 + $0x28] sm:$0xff] %vm738_vm2, %v646_v13 }
  0x35   : > { %v730_v18 = vsel %vm640_vm1, 0.0, %v668_v8  ;;  %v673_v44 = vsel %vm640_vm1, %v671_v63, %v672_v39  ;;  %v674_v28 = vrot.slane %v3427_v46, 7  ;;  %v3602_v30 = vmax.f32 %v568_v15, 0.0 }
  0x36   : > { %1003 = vrot.lane.b32.xlu0 %v3407_v33, %s3204_s18  ;;  %v919_v27 = vrot.slane %v3506_v5, 1  ;;  %v721_v33 = vsel %vm640_vm1, 0.0, %v641_v12  ;;  %v3530_v9 = vsel %vm900_vm0, %v943_v3, %v944_v20  ;;  %v947_v40 = vrot.slane %v3538_v32, 1  ;;  %757 = vst.msk [vmem:[#allocation2 + $0xa0] sm:$0xff] %vm738_vm2, %v730_v18  ;;  %760 = vst.msk [vmem:[#allocation2 + $0xb8] sm:$0xff] %vm738_vm2, %v673_v44 }
  0x37   : > { %813 = vrot.lane.b32.xlu1 %v3376_v4, %s3203_s11  ;;  %739 = vst.msk [vmem:[#allocation2 + $0x10] sm:$0xff] %vm738_vm2, %v721_v33  ;;  %v3563_v3 = vmax.f32 %v558_v53, 0.0  ;;  %v515_v20 = vmul.f32 %v3270_v0, %v477_v38  ;;  %v723_v4 = vsel %vm640_vm1, 0.0, %v647_v6  ;;  %v732_v39 = vsel %vm640_vm1, 0.0, %v674_v28 }
  0x38   : > { %v3550_v62 = vsel %vm900_vm0, %v919_v27, %v920_v37  ;;  %v559_v27 = vadd.f32 %v3282_v1, %v521_v55  ;;  %v3572_v12 = vsel %vm900_vm0, %v946_v52, %v947_v40  ;;  %v650_v37 = vrot.slane %v3447_v61, 7  ;;  %743 = vst.msk [vmem:[#allocation2 + $0x30] sm:$0xff] %vm738_vm2, %v723_v4  ;;  %761 = vst.msk [vmem:[#allocation2 + $0xc0] sm:$0xff] %vm738_vm2, %v732_v39 }
  0x39   : > { %v922_v33 = vrot.slane %v3563_v3, 1  ;;  %v676_v15 = vsel %vm640_vm1, %v674_v28, %v675_v60  ;;  %v967_v60 = vsel %vm900_vm0, %v908_v35, 0.0  ;;  %v934_v53 = vrot.slane %v3427_v46, 1 }
  0x3a   : > { %1037 = vrot.lane.b32.xlu0 %v3422_v43, %s3204_s18  ;;  %v569_v43 = vadd.f32 %v3282_v1, %v3462_v10  ;;  %v3575_v10 = vsel %vm900_vm0, %v947_v40, 0.0  ;;  %v3583_v0 = vmax.f32 %v559_v27, 0.0  ;;  %762 = vst.msk [vmem:[#allocation2 + $0xc8] sm:$0xff] %vm738_vm2, %v676_v15  ;;  %v935_v56 = vrot.slane %v3429_v47, 1 }
  0x3b   : > { %779 = vrot.lane.b32.xlu1 %v3393_v16, %s3203_s11  ;;  %v649_v16 = vsel %vm640_vm1, %v647_v6, %v648_v57  ;;  %v724_v57 = vsel %vm640_vm1, 0.0, %v650_v37  ;;  %v677_v19 = vrot.slane %v3602_v30, 7  ;;  %v937_v29 = vrot.slane %v3602_v30, 1 }
  0x3c   : > { %v3604_v54 = vmax.f32 %v569_v43, 0.0  ;;  %v923_v31 = vrot.slane %v3583_v0, 1  ;;  %744 = vst.msk [vmem:[#allocation2 + $0x38] sm:$0xff] %vm738_vm2, %v649_v16  ;;  %745 = vst.msk [vmem:[#allocation2 + $0x40] sm:$0xff] %vm738_vm2, %v724_v57  ;;  %v552_v43 = vadd.f32 %v3282_v1, %v3527_v34  ;;  %v936_v35 = vsel %vm900_vm0, %v934_v53, %v935_v56 }
  0x3d   : > { %v656_v6 = vrot.slane %v3457_v7, 7  ;;  %v683_v39 = vrot.slane %v3492_v42, 7  ;;  %v684_v57 = vrot.slane %v3498_v49, 7  ;;  %v660_v53 = vrot.slane %v3516_v24, 7 }
  0x3e   : > { %1039 = vrot.lane.b32.xlu0 %v3425_v45, %s3204_s18  ;;  %v731_v45 = vsel %vm640_vm1, 0.0, %v671_v63  ;;  %v3623_v38 = vsel %vm900_vm0, %v922_v33, %v923_v31  ;;  %v3626_v52 = vsel %vm900_vm0, %v923_v31, 0.0  ;;  %v678_v55 = vrot.slane %v3604_v54, 7 }
  0x3f   : > { %781 = vrot.lane.b32.xlu1 %v3388_v14, %s3203_s11  ;;  %759 = vst.msk [vmem:[#allocation2 + $0xb0] sm:$0xff] %vm738_vm2, %v731_v45  ;;  %v553_v14 = vadd.f32 %v3282_v1, %v515_v20  ;;  %v910_v1 = vrot.slane %v3447_v61, 1  ;;  %v911_v20 = vrot.slane %v3453_v2, 1  ;;  %v938_v58 = vrot.slane %v3604_v54, 1 }
  0x40   : > { %v679_v40 = vsel %vm640_vm1, %v677_v19, %v678_v55  ;;  %v663_v55 = vrot.slane %v3583_v0, 7 }
  0x41   : > { %764 = vst.msk [vmem:[#allocation2 + $0xd8] sm:$0xff] %vm738_vm2, %v679_v40  ;;  %v585_v34 = vmax.f32 %v553_v14, 0.0  ;;  %v912_v63 = vsel %vm900_vm0, %v910_v1, %v911_v20  ;;  %v968_v33 = vsel %vm900_vm0, %v911_v20, 0.0  ;;  %v939_v45 = vsel %vm900_vm0, %v937_v29, %v938_v58 }
  0x42   : > { %1005 = vrot.lane.b32.xlu0 %v3444_v59, %s3204_s18  ;;  %v652_v59 = vsel %vm640_vm1, %v650_v37, %v651_v26  ;;  %v733_v26 = vsel %vm640_vm1, 0.0, %v677_v19  ;;  %v977_v28 = vsel %vm900_vm0, %v938_v58, 0.0  ;;  %v657_v37 = vrot.slane %v3464_v11, 7 }
  0x43   : > { %815 = vrot.lane.b32.xlu1 %v3427_v46, %s3203_s11  ;;  %746 = vst.msk [vmem:[#allocation2 + $0x48] sm:$0xff] %vm738_vm2, %v652_v59  ;;  %763 = vst.msk [vmem:[#allocation2 + $0xd0] sm:$0xff] %vm738_vm2, %v733_v26  ;;  %v584_v46 = vmax.f32 %v552_v43, 0.0  ;;  %v654_v27 = vrot.slane %v585_v34, 7  ;;  %v914_v31 = vrot.slane %v585_v34, 1  ;;  %v735_v59 = vsel %vm640_vm1, 0.0, %v683_v39 }
  0x44   : > { %v658_v16 = vsel %vm640_vm1, %v656_v6, %v657_v37  ;;  %767 = vst.msk [vmem:[#allocation2 + $0xf0] sm:$0xff] %vm738_vm2, %v735_v59 }
  0x45   : > { %v653_v8 = vrot.slane %v584_v46, 7  ;;  %750 = vst.msk [vmem:[#allocation2 + $0x68] sm:$0xff] %vm738_vm2, %v658_v16  ;;  %v969_v15 = vsel %vm900_vm0, %v914_v31, 0.0 }
  0x46   : > { %1007 = vrot.lane.b32.xlu0 %v967_v60, %s3204_s18  ;;  %v685_v60 = vsel %vm640_vm1, %v683_v39, %v684_v57 }
  0x47   : > { %817 = vrot.lane.b32.xlu1 %v3429_v47, %s3203_s11  ;;  %v976_v47 = vsel %vm900_vm0, %v935_v56, 0.0  ;;  %v725_v21 = vsel %vm640_vm1, 0.0, %v653_v8  ;;  %v655_v18 = vsel %vm640_vm1, %v653_v8, %v654_v27  ;;  %768 = vst.msk [vmem:[#allocation2 + $0xf8] sm:$0xff] %vm738_vm2, %v685_v60  ;;  %v1261_v8 = vld [vmem:[%s4522_s3] sm:$0xff] }
  0x48   : > { %747 = vst.msk [vmem:[#allocation2 + $0x50] sm:$0xff] %vm738_vm2, %v725_v21  ;;  %748 = vst.msk [vmem:[#allocation2 + $0x58] sm:$0xff] %vm738_vm2, %v655_v18 }
  0x4a   : > { %1041 = vrot.lane.b32.xlu0 %v936_v35, %s3204_s18 }
  0x4b   : > { %783 = vrot.lane.b32.xlu1 %v3447_v61, %s3203_s11  ;;  %v680_v61 = vrot.slane %v3433_v50, 7 }
  0x4d   : > { %v734_v13 = vsel %vm640_vm1, 0.0, %v680_v61 }
  0x4e   : > { %1043 = vrot.lane.b32.xlu0 %v976_v47, %s3204_s18  ;;  %765 = vst.msk [vmem:[#allocation2 + $0xe0] sm:$0xff] %vm738_vm2, %v734_v13  ;;  %v2837_v47 = vld [vmem:[%s4522_s3 + $0x30] sm:$0xff] }
  0x4f   : > { %785 = vrot.lane.b32.xlu1 %v3453_v2, %s3203_s11  ;;  %v681_v2 = vrot.slane %v3435_v51, 7 }
  0x51   : > { %v682_v44 = vsel %vm640_vm1, %v680_v61, %v681_v2 }
  0x52   : > { %1009 = vrot.lane.b32.xlu0 %v912_v63, %s3204_s18  ;;  %766 = vst.msk [vmem:[#allocation2 + $0xe8] sm:$0xff] %vm738_vm2, %v682_v44 }
  0x53   : > { %819 = vrot.lane.b32.xlu1 %v3602_v30, %s3203_s11  ;;  %v913_v30 = vrot.slane %v584_v46, 1 }
  0x55   : > { %v915_v4 = vsel %vm900_vm0, %v913_v30, %v914_v31 }
  0x56   : > { %1011 = vrot.lane.b32.xlu0 %v968_v33, %s3204_s18 }
  0x57   : > { %821 = vrot.lane.b32.xlu1 %v3604_v54, %s3203_s11  ;;  %v726_v54 = vsel %vm640_vm1, 0.0, %v656_v6 }
  0x58   : > { %749 = vst.msk [vmem:[#allocation2 + $0x60] sm:$0xff] %vm738_vm2, %v726_v54 }
  0x5a   : > { %1045 = vrot.lane.b32.xlu0 %v939_v45, %s3204_s18 }
  0x5b   : > { %787 = vrot.lane.b32.xlu1 %v584_v46, %s3203_s11  ;;  %v2838_v46 = vld [vmem:[%s4522_s3 + $0x38] sm:$0xff] }
  0x5e   : > { %1047 = vrot.lane.b32.xlu0 %v977_v28, %s3204_s18 }
  0x5f   : > { %789 = vrot.lane.b32.xlu1 %v585_v34, %s3203_s11  ;;  %v1262_v34 = vld [vmem:[%s4522_s3 + $0x8] sm:$0xff] }
  0x62   : > { %1013 = vrot.lane.b32.xlu0 %v915_v4, %s3204_s18 }
  0x63   : > { %823 = vrot.lane.b32.xlu1 %v3433_v50, %s3203_s11  ;;  %v659_v50 = vrot.slane %v3506_v5, 7 }
  0x65   : > { %v727_v56 = vsel %vm640_vm1, 0.0, %v659_v50 }
  0x66   : > { %1015 = vrot.lane.b32.xlu0 %v969_v15, %s3204_s18  ;;  %751 = vst.msk [vmem:[#allocation2 + $0x70] sm:$0xff] %vm738_vm2, %v727_v56 }
  0x67   : > { %825 = vrot.lane.b32.xlu1 %v3435_v51, %s3203_s11  ;;  %v3722_v51 = vld [vmem:[%s4522_s3 + $0x10] sm:$0xff] }
  0x68   : > { %3038 = vmatprep.subr.mxu1 %v3722_v51 }
  0x6a   : > { %1049 = vrot.lane.b32.xlu0 %v3470_v22, %s3204_s18  ;;  %v3733_v22 = vld [vmem:[%s4522_s3 + $0x40] sm:$0xff] }
  0x6b   : > { %791 = vrot.lane.b32.xlu1 %v3457_v7, %s3203_s11  ;;  %v661_v7 = vsel %vm640_vm1, %v659_v50, %v660_v53  ;;  %3092 = vmatprep.subr.mxu0 %v3733_v22 }
  0x6c   : > { %752 = vst.msk [vmem:[#allocation2 + $0x78] sm:$0xff] %vm738_vm2, %v661_v7 }
  0x6e   : > { %1051 = vrot.lane.b32.xlu0 %v3473_v23, %s3204_s18  ;;  %v686_v23 = vrot.slane %v3518_v25, 7 }
  0x6f   : > { %793 = vrot.lane.b32.xlu1 %v3464_v11, %s3203_s11  ;;  %v687_v11 = vrot.slane %v3538_v32, 7 }
  0x70   : > { %v736_v19 = vsel %vm640_vm1, 0.0, %v686_v23 }
  0x71   : > { %769 = vst.msk [vmem:[#allocation2 + $0x100] sm:$0xff] %vm738_vm2, %v736_v19 }
  0x72   : > { %1017 = vrot.lane.b32.xlu0 %v3490_v41, %s3204_s18  ;;  %v688_v41 = vsel %vm640_vm1, %v686_v23, %v687_v11 }
  0x73   : > { %827 = vrot.lane.b32.xlu1 %v3492_v42, %s3203_s11  ;;  %770 = vst.msk [vmem:[#allocation2 + $0x108] sm:$0xff] %vm738_vm2, %v688_v41  ;;  %v662_v42 = vrot.slane %v3563_v3, 7 }
  0x75   : > { %v728_v43 = vsel %vm640_vm1, 0.0, %v662_v42 }
  0x76   : > { %1019 = vrot.lane.b32.xlu0 %v3495_v48, %s3204_s18  ;;  %753 = vst.msk [vmem:[#allocation2 + $0x80] sm:$0xff] %vm738_vm2, %v728_v43  ;;  %v664_v48 = vsel %vm640_vm1, %v662_v42, %v663_v55 }
  0x77   : > { %829 = vrot.lane.b32.xlu1 %v3498_v49, %s3203_s11  ;;  %754 = vst.msk [vmem:[#allocation2 + $0x88] sm:$0xff] %vm738_vm2, %v664_v48  ;;  %v3205_v49 = vmov 0.0  }
  0x78   : > { %1131 = vst.msk [vmem:[#allocation2] sm:$0xff] %vm1130_vm3, %v3205_v49  ;;  %1132 = vst.msk [vmem:[#allocation2 + $0x8] sm:$0xff] %vm1130_vm3, %v3205_v49 }
  0x79   : > { %1182 = vst.msk [vmem:[#allocation2 + $0x110] sm:$0xff] %vm1130_vm3, %v3205_v49  ;;  %1183 = vst.msk [vmem:[#allocation2 + $0x118] sm:$0xff] %vm1130_vm3, %v3205_v49 }
  0x7a   : > { %1053 = vrot.lane.b32.xlu0 %v3530_v9, %s3204_s18 }
  0x7b   : > { %795 = vrot.lane.b32.xlu1 %v3506_v5, %s3203_s11 }
  0x7e   : > { %1055 = vrot.lane.b32.xlu0 %v3533_v36, %s3204_s18 }
  0x7f   : > { %797 = vrot.lane.b32.xlu1 %v3516_v24, %s3203_s11 }
  0x82   : > { %1021 = vrot.lane.b32.xlu0 %v3550_v62, %s3204_s18 }
  0x83   : > { %831 = vrot.lane.b32.xlu1 %v3518_v25, %s3203_s11 }
  0x86   : > { %1023 = vrot.lane.b32.xlu0 %v3553_v17, %s3204_s18 }
  0x87   : > { %833 = vrot.lane.b32.xlu1 %v3538_v32, %s3203_s11 }
  0x88   : > { %v804_v5 = vpop.permute.xlu0 %803 }
  0x89   : > { %v772_v24 = vpop.permute.xlu1 %771  ;;  %884 = vst.msk [vmem:[#allocation2 + $0x90] sm:$0xff] %vm867_vm4, %v804_v5 }
  0x8a   : > { %868 = vst.msk [vmem:[#allocation2 + $0x10] sm:$0xff] %vm867_vm4, %v772_v24  ;;  %1057 = vrot.lane.b32.xlu0 %v3572_v12, %s3204_s18 }
  0x8b   : > { %799 = vrot.lane.b32.xlu1 %v3563_v3, %s3203_s11 }
  0x8c   : > { %v806_v25 = vpop.permute.xlu0 %805 }
  0x8d   : > { %v774_v9 = vpop.permute.xlu1 %773  ;;  %885 = vst.msk [vmem:[#allocation2 + $0x98] sm:$0xff] %vm867_vm4, %v806_v25 }
  0x8e   : > { %869 = vst.msk [vmem:[#allocation2 + $0x18] sm:$0xff] %vm867_vm4, %v774_v9  ;;  %1059 = vrot.lane.b32.xlu0 %v3575_v10, %s3204_s18 }
  0x8f   : > { %801 = vrot.lane.b32.xlu1 %v3583_v0, %s3203_s11 }
  0x90   : > { %v1032_v36 = vpop.permute.xlu0 %1031 }
  0x91   : > { %v808_v32 = vpop.permute.xlu1 %807  ;;  %1111 = vst.msk [vmem:[#allocation2 + $0x98] sm:$0xff] %vm1093_vm5, %v1032_v36 }
  0x92   : > { %886 = vst.msk [vmem:[#allocation2 + $0xa0] sm:$0xff] %vm867_vm4, %v808_v32  ;;  %1025 = vrot.lane.b32.xlu0 %v3623_v38, %s3204_s18 }
  0x93   : > { %1027 = vrot.lane.b32.xlu1 %v3626_v52, %s3204_s18 }
  0x94   : > { %v998_v17 = vpop.permute.xlu0 %997 }
  0x95   : > { %v810_v62 = vpop.permute.xlu1 %809  ;;  %1094 = vst.msk [vmem:[#allocation2 + $0x10] sm:$0xff] %vm1093_vm5, %v998_v17 }
  0x96   : > { %887 = vst.msk [vmem:[#allocation2 + $0xa8] sm:$0xff] %vm867_vm4, %v810_v62 }
  0x98   : > { %v1000_v12 = vpop.permute.xlu0 %999  ;;  %v3818_v40 = vld [vmem:[#allocation2 + $0x98] sm:$0xff] }
  0x99   : > { %v1030_v3 = vpop.permute.xlu1 %1029  ;;  %1095 = vst.msk [vmem:[#allocation2 + $0x18] sm:$0xff] %vm1093_vm5, %v1000_v12 }
  0x9a   : > { %1110 = vst.msk [vmem:[#allocation2 + $0x90] sm:$0xff] %vm1093_vm5, %v1030_v3 }
  0x9c   : > { %v1034_v10 = vpop.permute.xlu0 %1033  ;;  %v3799_v26 = vld [vmem:[#allocation2 + $0x10] sm:$0xff] }
  0x9d   : > { %v776_v0 = vpop.permute.xlu1 %775  ;;  %1112 = vst.msk [vmem:[#allocation2 + $0xa0] sm:$0xff] %vm1093_vm5, %v1034_v10  ;;  %2990 = vmatprep.mubr.msk.f32.mxu0 %vm1130_vm3, %v3799_v26 }
  0x9e   : > { %870 = vst.msk [vmem:[#allocation2 + $0x20] sm:$0xff] %vm867_vm4, %v776_v0 }
  0xa0   : > { %v1036_v38 = vpop.permute.xlu0 %1035  ;;  %v3807_v35 = vld [vmem:[#allocation2 + $0x18] sm:$0xff] }
  0xa1   : > { %v3805_v52 = vld [vmem:[#allocation2 + $0x90] sm:$0xff]  ;;  %v778_v14 = vpop.permute.xlu1 %777  ;;  %1113 = vst.msk [vmem:[#allocation2 + $0xa8] sm:$0xff] %vm1093_vm5, %v1036_v38  ;;  %2991 = vmatmul.mubr.msk.f32.vlgmr.msra.gmra.mxu0 %vm1130_vm3, %v3807_v35 }
  0xa2   : > { %3014 = vmatprep.mubr.msk.f32.mxu1 %vm1130_vm3, %v3805_v52  ;;  %871 = vst.msk [vmem:[#allocation2 + $0x28] sm:$0xff] %vm867_vm4, %v778_v14  ;;  %3093 = vmatpush3.msra.mxu0 %v3733_v22 }
  0xa3   : > { %3015 = vmatmul.mubr.msk.f32.vlgmr.msra.gmra.mxu1 %vm1130_vm3, %v3818_v40  ;;  %3094 = vmatprep.subr.mxu0 %v2838_v46 }
  0xa4   : > { %3039 = vmatpush3.msra.mxu1 %v3722_v51  ;;  %v1002_v1 = vpop.permute.xlu0 %1001  ;;  %v3833_v27 = vld [vmem:[#allocation2 + $0xa0] sm:$0xff]  ;;  %3095 = vmatpush3.msra.mxu0 %v2838_v46 }
  0xa5   : > { %v812_v20 = vpop.permute.xlu1 %811  ;;  %3040 = vmatprep.subr.mxu1 %v1262_v34  ;;  %1096 = vst.msk [vmem:[#allocation2 + $0x20] sm:$0xff] %vm1093_vm5, %v1002_v1  ;;  %3017 = vmatprep.mubr.msk.f32.mxu1 %vm1130_vm3, %v3833_v27 }
  0xa6   : > { %888 = vst.msk [vmem:[#allocation2 + $0xb0] sm:$0xff] %vm867_vm4, %v812_v20  ;;  %3041 = vmatpush3.msra.mxu1 %v1262_v34  ;;  %3096 = vmatprep.subr.mxu0 %v2837_v47 }
  0xa7   : > { %3042 = vmatprep.subr.mxu1 %v1261_v8  ;;  %3097 = vmatpush3.msra.mxu0 %v2837_v47 }
  0xa8   : > { %3043 = vmatpush3.msra.mxu1 %v1261_v8  ;;  %v1004_v21 = vpop.permute.xlu0 %1003  ;;  %v3839_v18 = vld [vmem:[#allocation2 + $0xa8] sm:$0xff] }
  0xa9   : > { %v814_v63 = vpop.permute.xlu1 %813  ;;  %1097 = vst.msk [vmem:[#allocation2 + $0x28] sm:$0xff] %vm1093_vm5, %v1004_v21  ;;  %3018 = vmatmul.mubr.msk.f32.gmra.mxu1 %vm1130_vm3, %v3839_v18 }
  0xaa   : > { %889 = vst.msk [vmem:[#allocation2 + $0xb8] sm:$0xff] %vm867_vm4, %v814_v63 }
  0xac   : > { %v1038_v61 = vpop.permute.xlu0 %1037  ;;  %v3845_v29 = vld [vmem:[#allocation2 + $0x20] sm:$0xff] }
  0xad   : > { %v780_v33 = vpop.permute.xlu1 %779  ;;  %1114 = vst.msk [vmem:[#allocation2 + $0xb0] sm:$0xff] %vm1093_vm5, %v1038_v61  ;;  %2993 = vmatprep.mubr.msk.f32.mxu0 %vm1130_vm3, %v3845_v29 }
  0xae   : > { %872 = vst.msk [vmem:[#allocation2 + $0x30] sm:$0xff] %vm867_vm4, %v780_v33 }
  0xb0   : > { %v1040_v58 = vpop.permute.xlu0 %1039  ;;  %v3851_v13 = vld [vmem:[#allocation2 + $0x28] sm:$0xff] }
  0xb1   : > { %v782_v2 = vpop.permute.xlu1 %781  ;;  %1115 = vst.msk [vmem:[#allocation2 + $0xb8] sm:$0xff] %vm1093_vm5, %v1040_v58  ;;  %2994 = vmatmul.mubr.msk.f32.gmra.mxu0 %vm1130_vm3, %v3851_v13 }
  0xb2   : > { %873 = vst.msk [vmem:[#allocation2 + $0x38] sm:$0xff] %vm867_vm4, %v782_v2 }
  0xb4   : > { %v1006_v45 = vpop.permute.xlu0 %1005  ;;  %v3857_v6 = vld [vmem:[#allocation2 + $0xb0] sm:$0xff] }
  0xb5   : > { %v816_v44 = vpop.permute.xlu1 %815  ;;  %1098 = vst.msk [vmem:[#allocation2 + $0x30] sm:$0xff] %vm1093_vm5, %v1006_v45  ;;  %3020 = vmatprep.mubr.msk.f32.mxu1 %vm1130_vm3, %v3857_v6 }
  0xb6   : > { %890 = vst.msk [vmem:[#allocation2 + $0xc0] sm:$0xff] %vm867_vm4, %v816_v44 }
  0xb8   : > { %v1008_v28 = vpop.permute.xlu0 %1007  ;;  %v3863_v31 = vld [vmem:[#allocation2 + $0xb8] sm:$0xff] }
  0xb9   : > { %v818_v30 = vpop.permute.xlu1 %817  ;;  %1099 = vst.msk [vmem:[#allocation2 + $0x38] sm:$0xff] %vm1093_vm5, %v1008_v28  ;;  %3021 = vmatmul.mubr.msk.f32.gmra.mxu1 %vm1130_vm3, %v3863_v31 }
  0xba   : > { %891 = vst.msk [vmem:[#allocation2 + $0xc8] sm:$0xff] %vm867_vm4, %v818_v30 }
  0xbc   : > { %v1042_v37 = vpop.permute.xlu0 %1041  ;;  %v3869_v4 = vld [vmem:[#allocation2 + $0x30] sm:$0xff] }
  0xbd   : > { %v784_v54 = vpop.permute.xlu1 %783  ;;  %1116 = vst.msk [vmem:[#allocation2 + $0xc0] sm:$0xff] %vm1093_vm5, %v1042_v37  ;;  %2996 = vmatprep.mubr.msk.f32.mxu0 %vm1130_vm3, %v3869_v4 }
  0xbe   : > { %874 = vst.msk [vmem:[#allocation2 + $0x40] sm:$0xff] %vm867_vm4, %v784_v54 }
  0xc0   : > { %v1044_v16 = vpop.permute.xlu0 %1043  ;;  %v3875_v15 = vld [vmem:[#allocation2 + $0x38] sm:$0xff] }
  0xc1   : > { %v786_v39 = vpop.permute.xlu1 %785  ;;  %1117 = vst.msk [vmem:[#allocation2 + $0xc8] sm:$0xff] %vm1093_vm5, %v1044_v16  ;;  %2997 = vmatmul.mubr.msk.f32.gmra.mxu0 %vm1130_vm3, %v3875_v15 }
  0xc2   : > { %875 = vst.msk [vmem:[#allocation2 + $0x48] sm:$0xff] %vm867_vm4, %v786_v39  ;;  %v1229_v39 = vld [vmem:[#allocation2] sm:$0xff] }
  0xc4   : > { %v1010_v57 = vpop.permute.xlu0 %1009  ;;  %v3881_v60 = vld [vmem:[#allocation2 + $0xc0] sm:$0xff] }
  0xc5   : > { %v820_v59 = vpop.permute.xlu1 %819  ;;  %1100 = vst.msk [vmem:[#allocation2 + $0x40] sm:$0xff] %vm1093_vm5, %v1010_v57  ;;  %3023 = vmatprep.mubr.msk.f32.mxu1 %vm1130_vm3, %v3881_v60 }
  0xc6   : > { %892 = vst.msk [vmem:[#allocation2 + $0xd0] sm:$0xff] %vm867_vm4, %v820_v59  ;;  %v1230_v59 = vld [vmem:[#allocation2 + $0x8] sm:$0xff] }
  0xc8   : > { %v1012_v50 = vpop.permute.xlu0 %1011  ;;  %v3887_v56 = vld [vmem:[#allocation2 + $0xc8] sm:$0xff] }
  0xc9   : > { %v822_v53 = vpop.permute.xlu1 %821  ;;  %1101 = vst.msk [vmem:[#allocation2 + $0x48] sm:$0xff] %vm1093_vm5, %v1012_v50  ;;  %3024 = vmatmul.mubr.msk.f32.gmra.mxu1 %vm1130_vm3, %v3887_v56 }
  0xca   : > { %893 = vst.msk [vmem:[#allocation2 + $0xd8] sm:$0xff] %vm867_vm4, %v822_v53 }
  0xcc   : > { %v1046_v51 = vpop.permute.xlu0 %1045  ;;  %v3893_v22 = vld [vmem:[#allocation2 + $0x40] sm:$0xff] }
  0xcd   : > { %v788_v7 = vpop.permute.xlu1 %787  ;;  %1118 = vst.msk [vmem:[#allocation2 + $0xd0] sm:$0xff] %vm1093_vm5, %v1046_v51  ;;  %2999 = vmatprep.mubr.msk.f32.mxu0 %vm1130_vm3, %v3893_v22 }
  0xce   : > { %876 = vst.msk [vmem:[#allocation2 + $0x50] sm:$0xff] %vm867_vm4, %v788_v7 }
  0xd0   : > { %v1048_v23 = vpop.permute.xlu0 %1047  ;;  %v3899_v19 = vld [vmem:[#allocation2 + $0x48] sm:$0xff] }
  0xd1   : > { %v790_v11 = vpop.permute.xlu1 %789  ;;  %1119 = vst.msk [vmem:[#allocation2 + $0xd8] sm:$0xff] %vm1093_vm5, %v1048_v23  ;;  %3000 = vmatmul.mubr.msk.f32.gmra.mxu0 %vm1130_vm3, %v3899_v19 }
  0xd2   : > { %877 = vst.msk [vmem:[#allocation2 + $0x58] sm:$0xff] %vm867_vm4, %v790_v11 }
  0xd4   : > { %v1014_v41 = vpop.permute.xlu0 %1013  ;;  %v3905_v55 = vld [vmem:[#allocation2 + $0xd0] sm:$0xff] }
  0xd5   : > { %v824_v42 = vpop.permute.xlu1 %823  ;;  %1102 = vst.msk [vmem:[#allocation2 + $0x50] sm:$0xff] %vm1093_vm5, %v1014_v41  ;;  %3026 = vmatprep.mubr.msk.f32.mxu1 %vm1130_vm3, %v3905_v55 }
  0xd6   : > { %894 = vst.msk [vmem:[#allocation2 + $0xe0] sm:$0xff] %vm867_vm4, %v824_v42 }
  0xd8   : > { %v1016_v43 = vpop.permute.xlu0 %1015  ;;  %v3911_v49 = vld [vmem:[#allocation2 + $0xd8] sm:$0xff] }
  0xd9   : > { %v826_v48 = vpop.permute.xlu1 %825  ;;  %1103 = vst.msk [vmem:[#allocation2 + $0x58] sm:$0xff] %vm1093_vm5, %v1016_v43  ;;  %3027 = vmatmul.mubr.msk.f32.gmra.mxu1 %vm1130_vm3, %v3911_v49 }
  0xda   : > { %895 = vst.msk [vmem:[#allocation2 + $0xe8] sm:$0xff] %vm867_vm4, %v826_v48 }
  0xdc   : > { %v1050_v5 = vpop.permute.xlu0 %1049  ;;  %v3917_v25 = vld [vmem:[#allocation2 + $0x50] sm:$0xff] }
  0xdd   : > { %v792_v24 = vpop.permute.xlu1 %791  ;;  %1120 = vst.msk [vmem:[#allocation2 + $0xe0] sm:$0xff] %vm1093_vm5, %v1050_v5  ;;  %3002 = vmatprep.mubr.msk.f32.mxu0 %vm1130_vm3, %v3917_v25 }
  0xde   : > { %878 = vst.msk [vmem:[#allocation2 + $0x60] sm:$0xff] %vm867_vm4, %v792_v24 }
  0xe0   : > { %v1052_v9 = vpop.permute.xlu0 %1051  ;;  %v3923_v32 = vld [vmem:[#allocation2 + $0x58] sm:$0xff] }
  0xe1   : > { %v794_v36 = vpop.permute.xlu1 %793  ;;  %1121 = vst.msk [vmem:[#allocation2 + $0xe8] sm:$0xff] %vm1093_vm5, %v1052_v9  ;;  %3003 = vmatmul.mubr.msk.f32.gmra.mxu0 %vm1130_vm3, %v3923_v32 }
  0xe2   : > { %879 = vst.msk [vmem:[#allocation2 + $0x68] sm:$0xff] %vm867_vm4, %v794_v36 }
  0xe4   : > { %v1018_v62 = vpop.permute.xlu0 %1017  ;;  %v3929_v3 = vld [vmem:[#allocation2 + $0xe0] sm:$0xff] }
  0xe5   : > { %v828_v17 = vpop.permute.xlu1 %827  ;;  %1104 = vst.msk [vmem:[#allocation2 + $0x60] sm:$0xff] %vm1093_vm5, %v1018_v62  ;;  %3029 = vmatprep.mubr.msk.f32.mxu1 %vm1130_vm3, %v3929_v3 }
  0xe6   : > { %896 = vst.msk [vmem:[#allocation2 + $0xf0] sm:$0xff] %vm867_vm4, %v828_v17 }
  0xe8   : > { %v1020_v12 = vpop.permute.xlu0 %1019  ;;  %v3935_v0 = vld [vmem:[#allocation2 + $0xe8] sm:$0xff] }
  0xe9   : > { %v830_v10 = vpop.permute.xlu1 %829  ;;  %1105 = vst.msk [vmem:[#allocation2 + $0x68] sm:$0xff] %vm1093_vm5, %v1020_v12  ;;  %3030 = vmatmul.mubr.msk.f32.gmra.mxu1 %vm1130_vm3, %v3935_v0 }
  0xea   : > { %897 = vst.msk [vmem:[#allocation2 + $0xf8] sm:$0xff] %vm867_vm4, %v830_v10 }
  0xec   : > { %v1054_v38 = vpop.permute.xlu0 %1053  ;;  %v3941_v46 = vld [vmem:[#allocation2 + $0x60] sm:$0xff] }
  0xed   : > { %v796_v14 = vpop.permute.xlu1 %795  ;;  %1122 = vst.msk [vmem:[#allocation2 + $0xf0] sm:$0xff] %vm1093_vm5, %v1054_v38  ;;  %3005 = vmatprep.mubr.msk.f32.mxu0 %vm1130_vm3, %v3941_v46 }
  0xee   : > { %880 = vst.msk [vmem:[#allocation2 + $0x70] sm:$0xff] %vm867_vm4, %v796_v14 }
  0xf0   : > { %v1056_v34 = vpop.permute.xlu0 %1055  ;;  %v3947_v47 = vld [vmem:[#allocation2 + $0x68] sm:$0xff] }
  0xf1   : > { %v798_v8 = vpop.permute.xlu1 %797  ;;  %1123 = vst.msk [vmem:[#allocation2 + $0xf8] sm:$0xff] %vm1093_vm5, %v1056_v34  ;;  %3006 = vmatmul.mubr.msk.f32.gmra.mxu0 %vm1130_vm3, %v3947_v47 }
  0xf2   : > { %881 = vst.msk [vmem:[#allocation2 + $0x78] sm:$0xff] %vm867_vm4, %v798_v8 }
  0xf4   : > { %v1022_v1 = vpop.permute.xlu0 %1021  ;;  %v3953_v21 = vld [vmem:[#allocation2 + $0xf0] sm:$0xff] }
  0xf5   : > { %v832_v20 = vpop.permute.xlu1 %831  ;;  %1106 = vst.msk [vmem:[#allocation2 + $0x70] sm:$0xff] %vm1093_vm5, %v1022_v1  ;;  %3032 = vmatprep.mubr.msk.f32.mxu1 %vm1130_vm3, %v3953_v21 }
  0xf6   : > { %898 = vst.msk [vmem:[#allocation2 + $0x100] sm:$0xff] %vm867_vm4, %v832_v20 }
  0xf8   : > { %v1024_v63 = vpop.permute.xlu0 %1023  ;;  %v3959_v33 = vld [vmem:[#allocation2 + $0xf8] sm:$0xff] }
  0xf9   : > { %v834_v61 = vpop.permute.xlu1 %833  ;;  %1107 = vst.msk [vmem:[#allocation2 + $0x78] sm:$0xff] %vm1093_vm5, %v1024_v63  ;;  %3033 = vmatmul.mubr.msk.f32.gmra.mxu1 %vm1130_vm3, %v3959_v33 }
  0xfa   : > { %899 = vst.msk [vmem:[#allocation2 + $0x108] sm:$0xff] %vm867_vm4, %v834_v61 }
  0xfc   : > { %v1058_v58 = vpop.permute.xlu0 %1057  ;;  %v1276_v45 = vld [vmem:[#allocation2 + $0x70] sm:$0xff] }
  0xfd   : > { %v800_v2 = vpop.permute.xlu1 %799  ;;  %1124 = vst.msk [vmem:[#allocation2 + $0x100] sm:$0xff] %vm1093_vm5, %v1058_v58  ;;  %3008 = vmatprep.mubr.msk.f32.mxu0 %vm1130_vm3, %v1276_v45 }
  0xfe   : > { %882 = vst.msk [vmem:[#allocation2 + $0x80] sm:$0xff] %vm867_vm4, %v800_v2 }
 0x100   : > { %v1060_v44 = vpop.permute.xlu0 %1059  ;;  %v1277_v30 = vld [vmem:[#allocation2 + $0x78] sm:$0xff] }
 0x101   : > { %v802_v28 = vpop.permute.xlu1 %801  ;;  %1125 = vst.msk [vmem:[#allocation2 + $0x108] sm:$0xff] %vm1093_vm5, %v1060_v44  ;;  %3009 = vmatmul.mubr.msk.f32.gmra.mxu0 %vm1130_vm3, %v1277_v30 }
 0x102   : > { %883 = vst.msk [vmem:[#allocation2 + $0x88] sm:$0xff] %vm867_vm4, %v802_v28 }
 0x104   : > { %v1026_v37 = vpop.permute.xlu0 %1025  ;;  %v3971_v16 = vld [vmem:[#allocation2 + $0x100] sm:$0xff] }
 0x105   : > { %v1028_v54 = vpop.permute.xlu1 %1027  ;;  %1108 = vst.msk [vmem:[#allocation2 + $0x80] sm:$0xff] %vm1093_vm5, %v1026_v37  ;;  %3035 = vmatprep.mubr.msk.f32.mxu1 %vm1130_vm3, %v3971_v16 }
 0x106   : > { %1109 = vst.msk [vmem:[#allocation2 + $0x88] sm:$0xff] %vm1093_vm5, %v1028_v54 }
 0x108   : > { %v3977_v57 = vld [vmem:[#allocation2 + $0x108] sm:$0xff] }
 0x109   : > { %3036 = vmatmul.mubr.msk.f32.gmra.mxu1 %vm1130_vm3, %v3977_v57 }
 0x10a   : > { %3044 = vmatprep.mubr.msk.f32.mxu1 %vm1130_vm3, %v1229_v39 }
 0x10c   : > { %v1278_v50 = vld [vmem:[#allocation2 + $0x80] sm:$0xff] }
 0x10d   : > { %v1279_v53 = vld [vmem:[#allocation2 + $0x88] sm:$0xff]  ;;  %3011 = vmatprep.mubr.msk.f32.mxu0 %vm1130_vm3, %v1278_v50  ;;  %3045 = vmatmul.mubr.msk.f32.vlgmr.msra.gmra.mxu1 %vm1130_vm3, %v1230_v59 }
 0x10e   : > { %3012 = vmatmul.mubr.msk.f32.gmra.mxu0 %vm1130_vm3, %v1279_v53  ;;  %3047 = vmatprep.mubr.msk.f32.mxu1 %vm1130_vm3, %v3799_v26  ;;  %v1974_v26 = vld [vmem:[#allocation2 + $0x110] sm:$0xff] }
 0x10f   : > { %3098 = vmatprep.mubr.msk.f32.mxu0 %vm1130_vm3, %v3845_v29 }
 0x111   : > { %3048 = vmatmul.mubr.msk.f32.gmra.mxu1 %vm1130_vm3, %v3807_v35 }
 0x112   : > { %3050 = vmatprep.mubr.msk.f32.mxu1 %vm1130_vm3, %v3845_v29  ;;  %3099 = vmatmul.mubr.msk.f32.vlgmr.msra.gmra.mxu0 %vm1130_vm3, %v3851_v13 }
 0x113   : > { %3101 = vmatprep.mubr.msk.f32.mxu0 %vm1130_vm3, %v3869_v4 }
 0x115   : > { %3051 = vmatmul.mubr.msk.f32.gmra.mxu1 %vm1130_vm3, %v3851_v13 }
 0x116   : > { %3053 = vmatprep.mubr.msk.f32.mxu1 %vm1130_vm3, %v3869_v4  ;;  %3102 = vmatmul.mubr.msk.f32.gmra.mxu0 %vm1130_vm3, %v3875_v15 }
 0x117   : > { %3104 = vmatprep.mubr.msk.f32.mxu0 %vm1130_vm3, %v3893_v22 }
 0x119   : > { %3054 = vmatmul.mubr.msk.f32.gmra.mxu1 %vm1130_vm3, %v3875_v15 }
 0x11a   : > { %3056 = vmatprep.mubr.msk.f32.mxu1 %vm1130_vm3, %v3893_v22  ;;  %3105 = vmatmul.mubr.msk.f32.gmra.mxu0 %vm1130_vm3, %v3899_v19 }
 0x11b   : > { %3107 = vmatprep.mubr.msk.f32.mxu0 %vm1130_vm3, %v3917_v25 }
 0x11d   : > { %3057 = vmatmul.mubr.msk.f32.gmra.mxu1 %vm1130_vm3, %v3899_v19 }
 0x11e   : > { %3059 = vmatprep.mubr.msk.f32.mxu1 %vm1130_vm3, %v3917_v25  ;;  %3108 = vmatmul.mubr.msk.f32.gmra.mxu0 %vm1130_vm3, %v3923_v32 }
 0x11f   : > { %3110 = vmatprep.mubr.msk.f32.mxu0 %vm1130_vm3, %v3941_v46 }
 0x121   : > { %3060 = vmatmul.mubr.msk.f32.gmra.mxu1 %vm1130_vm3, %v3923_v32 }
 0x122   : > { %3062 = vmatprep.mubr.msk.f32.mxu1 %vm1130_vm3, %v3941_v46  ;;  %3111 = vmatmul.mubr.msk.f32.gmra.mxu0 %vm1130_vm3, %v3947_v47 }
 0x123   : > { %3113 = vmatprep.mubr.msk.f32.mxu0 %vm1130_vm3, %v1276_v45 }
 0x125   : > { %3063 = vmatmul.mubr.msk.f32.gmra.mxu1 %vm1130_vm3, %v3947_v47 }
 0x126   : > { %3065 = vmatprep.mubr.msk.f32.mxu1 %vm1130_vm3, %v1276_v45  ;;  %3114 = vmatmul.mubr.msk.f32.gmra.mxu0 %vm1130_vm3, %v1277_v30 }
 0x127   : > { %3116 = vmatprep.mubr.msk.f32.mxu0 %vm1130_vm3, %v1278_v50 }
 0x129   : > { %3066 = vmatmul.mubr.msk.f32.gmra.mxu1 %vm1130_vm3, %v1277_v30 }
 0x12a   : > { %3068 = vmatprep.mubr.msk.f32.mxu1 %vm1130_vm3, %v1278_v50  ;;  %3117 = vmatmul.mubr.msk.f32.gmra.mxu0 %vm1130_vm3, %v1279_v53 }
 0x12b   : > { %3119 = vmatprep.mubr.msk.f32.mxu0 %vm1130_vm3, %v3805_v52 }
 0x12d   : > { %3069 = vmatmul.mubr.msk.f32.gmra.mxu1 %vm1130_vm3, %v1279_v53 }
 0x12e   : > { %3071 = vmatprep.mubr.msk.f32.mxu1 %vm1130_vm3, %v3805_v52  ;;  %3120 = vmatmul.mubr.msk.f32.gmra.mxu0 %vm1130_vm3, %v3818_v40  ;;  %v1975_v52 = vld [vmem:[#allocation2 + $0x118] sm:$0xff] }
 0x12f   : > { %3122 = vmatprep.mubr.msk.f32.mxu0 %vm1130_vm3, %v3833_v27 }
 0x131   : > { %3072 = vmatmul.mubr.msk.f32.gmra.mxu1 %vm1130_vm3, %v3818_v40 }
 0x132   : > { %3074 = vmatprep.mubr.msk.f32.mxu1 %vm1130_vm3, %v3833_v27  ;;  %3123 = vmatmul.mubr.msk.f32.gmra.mxu0 %vm1130_vm3, %v3839_v18 }
 0x133   : > { %3125 = vmatprep.mubr.msk.f32.mxu0 %vm1130_vm3, %v3857_v6 }
 0x135   : > { %3075 = vmatmul.mubr.msk.f32.gmra.mxu1 %vm1130_vm3, %v3839_v18 }
 0x136   : > { %3077 = vmatprep.mubr.msk.f32.mxu1 %vm1130_vm3, %v3857_v6  ;;  %3126 = vmatmul.mubr.msk.f32.gmra.mxu0 %vm1130_vm3, %v3863_v31 }
 0x137   : > { %3128 = vmatprep.mubr.msk.f32.mxu0 %vm1130_vm3, %v3881_v60 }
 0x139   : > { %3078 = vmatmul.mubr.msk.f32.gmra.mxu1 %vm1130_vm3, %v3863_v31 }
 0x13a   : > { %3080 = vmatprep.mubr.msk.f32.mxu1 %vm1130_vm3, %v3881_v60  ;;  %3129 = vmatmul.mubr.msk.f32.gmra.mxu0 %vm1130_vm3, %v3887_v56 }
 0x13b   : > { %3131 = vmatprep.mubr.msk.f32.mxu0 %vm1130_vm3, %v3905_v55 }
 0x13d   : > { %3081 = vmatmul.mubr.msk.f32.gmra.mxu1 %vm1130_vm3, %v3887_v56 }
 0x13e   : > { %3083 = vmatprep.mubr.msk.f32.mxu1 %vm1130_vm3, %v3905_v55  ;;  %3132 = vmatmul.mubr.msk.f32.gmra.mxu0 %vm1130_vm3, %v3911_v49 }
 0x13f   : > { %3134 = vmatprep.mubr.msk.f32.mxu0 %vm1130_vm3, %v3929_v3 }
 0x141   : > { %3084 = vmatmul.mubr.msk.f32.gmra.mxu1 %vm1130_vm3, %v3911_v49 }
 0x142   : > { %3086 = vmatprep.mubr.msk.f32.mxu1 %vm1130_vm3, %v3929_v3  ;;  %3135 = vmatmul.mubr.msk.f32.gmra.mxu0 %vm1130_vm3, %v3935_v0 }
 0x143   : > { %3137 = vmatprep.mubr.msk.f32.mxu0 %vm1130_vm3, %v3953_v21 }
 0x145   : > { %3087 = vmatmul.mubr.msk.f32.gmra.mxu1 %vm1130_vm3, %v3935_v0 }
 0x146   : > { %3089 = vmatprep.mubr.msk.f32.mxu1 %vm1130_vm3, %v3953_v21  ;;  %3138 = vmatmul.mubr.msk.f32.gmra.mxu0 %vm1130_vm3, %v3959_v33 }
 0x147   : > { %3140 = vmatprep.mubr.msk.f32.mxu0 %vm1130_vm3, %v3971_v16 }
 0x149   : > { %3090 = vmatmul.mubr.msk.f32.gmra.mxu1 %vm1130_vm3, %v3959_v33 }
 0x14a   : > { %3141 = vmatmul.mubr.msk.f32.gmra.mxu0 %vm1130_vm3, %v3977_v57 }
 0x14b   : > { %3143 = vmatprep.mubr.msk.f32.mxu0 %vm1130_vm3, %v1974_v26 }
 0x14e   : > { %3144 = vmatmul.mubr.msk.f32.gmra.mxu0 %vm1130_vm3, %v1975_v52 }
 0x161   : > { %v2992_v27 = vpop.f32.mrf.mxu0 }
 0x163   : > { %v4099_v35 = vpop.f32.mrf.mxu1  ;;  %v1463_v29 = vpop.f32.mrf.mxu0 }
 0x165   : > { %v4101_v40 = vpop.f32.mrf.mxu1 }
 0x169   : > { %v4103_v18 = vpop.f32.mrf.mxu1 }
 0x16b   : > { %v4105_v13 = vpop.f32.mrf.mxu1 }
 0x171   : > { %v2995_v6 = vpop.f32.mrf.mxu0 }
 0x173   : > { %v1473_v4 = vpop.f32.mrf.mxu0 }
 0x179   : > { %v4107_v31 = vpop.f32.mrf.mxu1 }
 0x17b   : > { %v4109_v15 = vpop.f32.mrf.mxu1 }
 0x181   : > { %v2998_v60 = vpop.f32.mrf.mxu0 }
 0x183   : > { %v1483_v51 = vpop.f32.mrf.mxu0 }
 0x189   : > { %v4111_v56 = vpop.f32.mrf.mxu1 }
 0x18b   : > { %v4113_v7 = vpop.f32.mrf.mxu1 }
 0x191   : > { %v3001_v22 = vpop.f32.mrf.mxu0 }
 0x193   : > { %v1493_v11 = vpop.f32.mrf.mxu0 }
 0x199   : > { %v4115_v23 = vpop.f32.mrf.mxu1 }
 0x19b   : > { %v4117_v19 = vpop.f32.mrf.mxu1 }
 0x1a1   : > { %v3004_v41 = vpop.f32.mrf.mxu0 }
 0x1a3   : > { %v1503_v55 = vpop.f32.mrf.mxu0 }
 0x1a9   : > { %v4119_v42 = vpop.f32.mrf.mxu1 }
 0x1ab   : > { %v4121_v43 = vpop.f32.mrf.mxu1 }
 0x1b1   : > { %v3007_v48 = vpop.f32.mrf.mxu0 }
 0x1b3   : > { %v4125_v5 = vpop.f32.mrf.mxu0 }
 0x1b9   : > { %v4123_v49 = vpop.f32.mrf.mxu1 }
 0x1bb   : > { %v4127_v24 = vpop.f32.mrf.mxu1 }
 0x1c1   : > { %v4129_v25 = vpop.f32.mrf.mxu0 }
 0x1c3   : > { %v4135_v32 = vpop.f32.mrf.mxu0 }
 0x1c9   : > { %v4131_v9 = vpop.f32.mrf.mxu1 }
 0x1cb   : > { %v4133_v36 = vpop.f32.mrf.mxu1 }
 0x1cd   : > { %v3046_v62 = vpop.f32.mrf.mxu1 }
 0x1ce   : > { %v4137_v17 = vpop.f32.mrf.mxu0  ;;  %v1790_v10 = vadd.f32 %v3046_v62, %v2992_v27 }
 0x1cf   : > { %v1784_v3 = vpop.f32.mrf.mxu1 }
 0x1d0   : > { %v4139_v12 = vpop.f32.mrf.mxu0  ;;  %v1785_v14 = vadd.f32 %v1784_v3, %v1463_v29 }
 0x1d1   : > { %v3049_v0 = vpop.f32.mrf.mxu1 }
 0x1d2   : > { %v3100_v38 = vpop.f32.mrf.mxu0  ;;  %v1800_v47 = vadd.f32 %v3049_v0, %v2995_v6 }
 0x1d3   : > { %v4148_v46 = vadd.f32 %v3100_v38, %v1790_v10  ;;  %v1794_v34 = vpop.f32.mrf.mxu1 }
 0x1d4   : > { %v2142_v8 = vpop.f32.mrf.mxu0  ;;  %v1795_v63 = vadd.f32 %v1794_v34, %v1473_v4 }
 0x1d5   : > { %2334 = vst.msk [vmem:[%s4146_s13 + $0x8] sm:$0xff] %vm738_vm2, %v4148_v46  ;;  %v4153_v1 = vadd.f32 %v2142_v8, %v1785_v14  ;;  %v3052_v20 = vpop.f32.mrf.mxu1 }
 0x1d6   : > { %v3103_v21 = vpop.f32.mrf.mxu0  ;;  %v1810_v2 = vadd.f32 %v3052_v20, %v2998_v60 }
 0x1d7   : > { %2333 = vst.msk [vmem:[%s4146_s13] sm:$0xff] %vm738_vm2, %v4153_v1  ;;  %v4158_v61 = vadd.f32 %v3103_v21, %v1800_v47  ;;  %v1804_v33 = vpop.f32.mrf.mxu1 }
 0x1d8   : > { %v2152_v58 = vpop.f32.mrf.mxu0  ;;  %v1805_v30 = vadd.f32 %v1804_v33, %v1483_v51  ;;  %v2365_v33 = vsel %vm738_vm2, %v4153_v1, 0.0 }
 0x1d9   : > { %2336 = vst.msk [vmem:[%s4146_s13 + $0x18] sm:$0xff] %vm738_vm2, %v4158_v61  ;;  %v4163_v45 = vadd.f32 %v2152_v58, %v1795_v63  ;;  %v3055_v44 = vpop.f32.mrf.mxu1  ;;  %v2397_v38 = vsel %vm738_vm2, %v4158_v61, 0.0 }
 0x1da   : > { %v3106_v28 = vpop.f32.mrf.mxu0  ;;  %v1820_v39 = vadd.f32 %v3055_v44, %v3001_v22 }
 0x1db   : > { %2335 = vst.msk [vmem:[%s4146_s13 + $0x10] sm:$0xff] %vm738_vm2, %v4163_v45  ;;  %v4168_v37 = vadd.f32 %v3106_v28, %v1810_v2  ;;  %v1814_v54 = vpop.f32.mrf.mxu1  ;;  %v2366_v47 = vsel %vm738_vm2, %v4163_v45, 0.0 }
 0x1dc   : > { %v2162_v16 = vpop.f32.mrf.mxu0  ;;  %v1815_v53 = vadd.f32 %v1814_v54, %v1493_v11 }
 0x1dd   : > { %2338 = vst.msk [vmem:[%s4146_s13 + $0x28] sm:$0xff] %vm738_vm2, %v4168_v37  ;;  %v4173_v57 = vadd.f32 %v2162_v16, %v1805_v30  ;;  %v3058_v59 = vpop.f32.mrf.mxu1  ;;  %v2399_v20 = vsel %vm738_vm2, %v4168_v37, 0.0  ;;  %v2367_v16 = vadd.f32 %v2366_v47, %v2365_v33 }
 0x1de   : > { %v3109_v50 = vpop.f32.mrf.mxu0  ;;  %v1830_v29 = vadd.f32 %v3058_v59, %v3004_v41 }
 0x1df   : > { %2337 = vst.msk [vmem:[%s4146_s13 + $0x20] sm:$0xff] %vm738_vm2, %v4173_v57  ;;  %v4178_v26 = vadd.f32 %v3109_v50, %v1820_v39  ;;  %v1824_v52 = vpop.f32.mrf.mxu1  ;;  %v2368_v44 = vsel %vm738_vm2, %v4173_v57, 0.0 }
 0x1e0   : > { %v2172_v27 = vpop.f32.mrf.mxu0  ;;  %v1825_v51 = vadd.f32 %v1824_v52, %v1503_v55 }
 0x1e1   : > { %2340 = vst.msk [vmem:[%s4146_s13 + $0x38] sm:$0xff] %vm738_vm2, %v4178_v26  ;;  %v4183_v6 = vadd.f32 %v2172_v27, %v1815_v53  ;;  %v3061_v4 = vpop.f32.mrf.mxu1  ;;  %v2401_v28 = vsel %vm738_vm2, %v4178_v26, 0.0 }
 0x1e2   : > { %v3112_v60 = vpop.f32.mrf.mxu0  ;;  %v1840_v3 = vadd.f32 %v3061_v4, %v3007_v48  ;;  %v2396_v48 = vsel %vm738_vm2, %v4148_v46, 0.0 }
 0x1e3   : > { %2339 = vst.msk [vmem:[%s4146_s13 + $0x30] sm:$0xff] %vm738_vm2, %v4183_v6  ;;  %v4188_v22 = vadd.f32 %v3112_v60, %v1830_v29  ;;  %v1834_v11 = vpop.f32.mrf.mxu1  ;;  %v2398_v58 = vadd.f32 %v2397_v38, %v2396_v48  ;;  %v2370_v50 = vsel %vm738_vm2, %v4183_v6, 0.0  ;;  %v2369_v29 = vadd.f32 %v2368_v44, %v2367_v16 }
 0x1e4   : > { %v2182_v62 = vpop.f32.mrf.mxu0  ;;  %v1835_v55 = vadd.f32 %v1834_v11, %v4125_v5 }
 0x1e5   : > { %2342 = vst.msk [vmem:[%s4146_s13 + $0x48] sm:$0xff] %vm738_vm2, %v4188_v22  ;;  %v4193_v41 = vadd.f32 %v2182_v62, %v1825_v51  ;;  %v3064_v10 = vpop.f32.mrf.mxu1  ;;  %v2400_v39 = vadd.f32 %v2399_v20, %v2398_v58  ;;  %v2403_v53 = vsel %vm738_vm2, %v4188_v22, 0.0 }
 0x1e6   : > { %v3115_v0 = vpop.f32.mrf.mxu0  ;;  %v1850_v21 = vadd.f32 %v3064_v10, %v4129_v25  ;;  %v2371_v10 = vadd.f32 %v2370_v50, %v2369_v29 }
 0x1e7   : > { %2341 = vst.msk [vmem:[%s4146_s13 + $0x40] sm:$0xff] %vm738_vm2, %v4193_v41  ;;  %v4201_v14 = vadd.f32 %v3115_v0, %v1840_v3  ;;  %v1844_v34 = vpop.f32.mrf.mxu1  ;;  %v2402_v4 = vadd.f32 %v2401_v28, %v2400_v39  ;;  %v2372_v51 = vsel %vm738_vm2, %v4193_v41, 0.0 }
 0x1e8   : > { %v2192_v8 = vpop.f32.mrf.mxu0  ;;  %v1845_v25 = vadd.f32 %v1844_v34, %v4135_v32  ;;  %v2373_v47 = vadd.f32 %v2372_v51, %v2371_v10 }
 0x1e9   : > { %2344 = vst.msk [vmem:[%s4146_s13 + $0x58] sm:$0xff] %vm738_vm2, %v4201_v14  ;;  %v4213_v5 = vadd.f32 %v2192_v8, %v1835_v55  ;;  %v3067_v63 = vpop.f32.mrf.mxu1  ;;  %v2405_v11 = vsel %vm738_vm2, %v4201_v14, 0.0  ;;  %v2404_v0 = vadd.f32 %v2403_v53, %v2402_v4 }
 0x1ea   : > { %v3118_v2 = vpop.f32.mrf.mxu0  ;;  %v1860_v52 = vadd.f32 %v3067_v63, %v4137_v17 }
 0x1eb   : > { %2343 = vst.msk [vmem:[%s4146_s13 + $0x50] sm:$0xff] %vm738_vm2, %v4213_v5  ;;  %v4225_v30 = vadd.f32 %v3118_v2, %v1850_v21  ;;  %v1854_v54 = vpop.f32.mrf.mxu1  ;;  %v2374_v55 = vsel %vm738_vm2, %v4213_v5, 0.0  ;;  %v2406_v20 = vadd.f32 %v2405_v11, %v2404_v0 }
 0x1ec   : > { %v2202_v59 = vpop.f32.mrf.mxu0  ;;  %v1855_v62 = vadd.f32 %v1854_v54, %v4139_v12  ;;  %v2375_v44 = vadd.f32 %v2374_v55, %v2373_v47 }
 0x1ed   : > { %2346 = vst.msk [vmem:[%s4146_s13 + $0x68] sm:$0xff] %vm738_vm2, %v4225_v30  ;;  %v4235_v32 = vadd.f32 %v2202_v59, %v1845_v25  ;;  %v3070_v27 = vpop.f32.mrf.mxu1  ;;  %v2407_v34 = vsel %vm738_vm2, %v4225_v30, 0.0 }
 0x1ee   : > { %v3121_v60 = vpop.f32.mrf.mxu0  ;;  %v1870_v48 = vadd.f32 %v3070_v27, %v4099_v35  ;;  %v2408_v28 = vadd.f32 %v2407_v34, %v2406_v20 }
 0x1ef   : > { %2345 = vst.msk [vmem:[%s4146_s13 + $0x60] sm:$0xff] %vm738_vm2, %v4235_v32  ;;  %v4245_v17 = vadd.f32 %v3121_v60, %v1860_v52  ;;  %v1864_v3 = vpop.f32.mrf.mxu1  ;;  %v2376_v63 = vsel %vm738_vm2, %v4235_v32, 0.0 }
 0x1f0   : > { %v2212_v38 = vpop.f32.mrf.mxu0  ;;  %v1865_v58 = vadd.f32 %v1864_v3, %v4101_v40  ;;  %v2377_v50 = vadd.f32 %v2376_v63, %v2375_v44 }
 0x1f1   : > { %2348 = vst.msk [vmem:[%s4146_s13 + $0x78] sm:$0xff] %vm738_vm2, %v4245_v17  ;;  %v4255_v12 = vadd.f32 %v2212_v38, %v1855_v62  ;;  %v3073_v8 = vpop.f32.mrf.mxu1  ;;  %v2409_v33 = vsel %vm738_vm2, %v4245_v17, 0.0 }
 0x1f2   : > { %v3124_v21 = vpop.f32.mrf.mxu0  ;;  %v1880_v16 = vadd.f32 %v3073_v8, %v4103_v18  ;;  %v2410_v53 = vadd.f32 %v2409_v33, %v2408_v28 }
 0x1f3   : > { %2347 = vst.msk [vmem:[%s4146_s13 + $0x70] sm:$0xff] %vm738_vm2, %v4255_v12  ;;  %v4265_v35 = vadd.f32 %v3124_v21, %v1870_v48  ;;  %v1874_v2 = vpop.f32.mrf.mxu1  ;;  %v2378_v54 = vsel %vm738_vm2, %v4255_v12, 0.0 }
 0x1f4   : > { %v2222_v25 = vpop.f32.mrf.mxu0  ;;  %v1875_v27 = vadd.f32 %v1874_v2, %v4105_v13  ;;  %v2379_v60 = vadd.f32 %v2378_v54, %v2377_v50 }
 0x1f5   : > { %2350 = vst.msk [vmem:[%s4146_s13 + $0x88] sm:$0xff] %vm738_vm2, %v4265_v35  ;;  %v2411_v40 = vsel %vm738_vm2, %v4265_v35, 0.0  ;;  %v4275_v39 = vadd.f32 %v2222_v25, %v1865_v58  ;;  %v3076_v59 = vpop.f32.mrf.mxu1 }
 0x1f6   : > { %v3127_v52 = vpop.f32.mrf.mxu0  ;;  %v2412_v51 = vadd.f32 %v2411_v40, %v2410_v53  ;;  %v1890_v62 = vadd.f32 %v3076_v59, %v4107_v31 }
 0x1f7   : > { %2349 = vst.msk [vmem:[%s4146_s13 + $0x80] sm:$0xff] %vm738_vm2, %v4275_v39  ;;  %v2380_v18 = vsel %vm738_vm2, %v4275_v39, 0.0  ;;  %v4283_v29 = vadd.f32 %v3127_v52, %v1880_v16  ;;  %v1884_v4 = vpop.f32.mrf.mxu1 }
 0x1f8   : > { %v2232_v11 = vpop.f32.mrf.mxu0  ;;  %v2381_v0 = vadd.f32 %v2380_v18, %v2379_v60  ;;  %v1885_v34 = vadd.f32 %v1884_v4, %v4109_v15 }
 0x1f9   : > { %2352 = vst.msk [vmem:[%s4146_s13 + $0x98] sm:$0xff] %vm738_vm2, %v4283_v29  ;;  %v2413_v13 = vsel %vm738_vm2, %v4283_v29, 0.0  ;;  %v4291_v3 = vadd.f32 %v2232_v11, %v1875_v27  ;;  %v3079_v10 = vpop.f32.mrf.mxu1 }
 0x1fa   : > { %v2414_v38 = vadd.f32 %v2413_v13, %v2412_v51  ;;  %v3130_v55 = vpop.f32.mrf.mxu0  ;;  %v1900_v21 = vadd.f32 %v3079_v10, %v4111_v56 }
 0x1fb   : > { %2351 = vst.msk [vmem:[%s4146_s13 + $0x90] sm:$0xff] %vm738_vm2, %v4291_v3  ;;  %v2382_v31 = vsel %vm738_vm2, %v4291_v3, 0.0  ;;  %v4299_v48 = vadd.f32 %v3130_v55, %v1890_v62  ;;  %v1894_v8 = vpop.f32.mrf.mxu1 }
 0x1fc   : > { %v2383_v47 = vadd.f32 %v2382_v31, %v2381_v0  ;;  %v2242_v20 = vpop.f32.mrf.mxu0  ;;  %v1895_v44 = vadd.f32 %v1894_v8, %v4113_v7 }
 0x1fd   : > { %2354 = vst.msk [vmem:[%s4146_s13 + $0xa8] sm:$0xff] %vm738_vm2, %v4299_v48  ;;  %v2415_v15 = vsel %vm738_vm2, %v4299_v48, 0.0  ;;  %v4307_v63 = vadd.f32 %v2242_v20, %v1885_v34  ;;  %v3082_v33 = vpop.f32.mrf.mxu1 }
 0x1fe   : > { %v2416_v58 = vadd.f32 %v2415_v15, %v2414_v38  ;;  %v3133_v2 = vpop.f32.mrf.mxu0  ;;  %v1910_v40 = vadd.f32 %v3082_v33, %v4115_v23 }
 0x1ff   : > { %2353 = vst.msk [vmem:[%s4146_s13 + $0xa0] sm:$0xff] %vm738_vm2, %v4307_v63  ;;  %v2384_v56 = vsel %vm738_vm2, %v4307_v63, 0.0  ;;  %v4315_v28 = vadd.f32 %v3133_v2, %v1900_v21  ;;  %v1904_v25 = vpop.f32.mrf.mxu1 }
 0x200   : > { %v2385_v54 = vadd.f32 %v2384_v56, %v2383_v47  ;;  %v2252_v16 = vpop.f32.mrf.mxu0  ;;  %v1905_v27 = vadd.f32 %v1904_v25, %v4117_v19 }
 0x201   : > { %2356 = vst.msk [vmem:[%s4146_s13 + $0xb8] sm:$0xff] %vm738_vm2, %v4315_v28  ;;  %v2417_v7 = vsel %vm738_vm2, %v4315_v28, 0.0  ;;  %v4323_v59 = vadd.f32 %v2252_v16, %v1895_v44  ;;  %v3085_v50 = vpop.f32.mrf.mxu1 }
 0x202   : > { %v2418_v53 = vadd.f32 %v2417_v7, %v2416_v58  ;;  %v3136_v52 = vpop.f32.mrf.mxu0  ;;  %v1920_v11 = vadd.f32 %v3085_v50, %v4119_v42 }
 0x203   : > { %2355 = vst.msk [vmem:[%s4146_s13 + $0xb0] sm:$0xff] %vm738_vm2, %v4323_v59  ;;  %v2386_v23 = vsel %vm738_vm2, %v4323_v59, 0.0  ;;  %v4331_v18 = vadd.f32 %v3136_v52, %v1910_v40  ;;  %v1914_v4 = vpop.f32.mrf.mxu1 }
 0x204   : > { %v2387_v60 = vadd.f32 %v2386_v23, %v2385_v54  ;;  %v2262_v51 = vpop.f32.mrf.mxu0  ;;  %v1915_v38 = vadd.f32 %v1914_v4, %v4121_v43 }
 0x205   : > { %2358 = vst.msk [vmem:[%s4146_s13 + $0xc8] sm:$0xff] %vm738_vm2, %v4331_v18  ;;  %v2419_v19 = vsel %vm738_vm2, %v4331_v18, 0.0  ;;  %v4339_v62 = vadd.f32 %v2262_v51, %v1905_v27  ;;  %v3088_v13 = vpop.f32.mrf.mxu1 }
 0x206   : > { %v2420_v10 = vadd.f32 %v2419_v19, %v2418_v53  ;;  %v3139_v0 = vpop.f32.mrf.mxu0  ;;  %v1930_v47 = vadd.f32 %v3088_v13, %v4123_v49 }
 0x207   : > { %2357 = vst.msk [vmem:[%s4146_s13 + $0xc0] sm:$0xff] %vm738_vm2, %v4339_v62  ;;  %v2388_v42 = vsel %vm738_vm2, %v4339_v62, 0.0  ;;  %v4347_v55 = vadd.f32 %v3139_v0, %v1920_v11  ;;  %v1924_v34 = vpop.f32.mrf.mxu1 }
 0x208   : > { %v2389_v31 = vadd.f32 %v2388_v42, %v2387_v60  ;;  %v2272_v8 = vpop.f32.mrf.mxu0  ;;  %v1925_v58 = vadd.f32 %v1924_v34, %v4127_v24 }
 0x209   : > { %2360 = vst.msk [vmem:[%s4146_s13 + $0xd8] sm:$0xff] %vm738_vm2, %v4347_v55  ;;  %v2421_v43 = vsel %vm738_vm2, %v4347_v55, 0.0  ;;  %v2327_v20 = vadd.f32 %v2272_v8, %v1915_v38  ;;  %v3091_v21 = vpop.f32.mrf.mxu1 }
 0x20a   : > { %v2422_v15 = vadd.f32 %v2421_v43, %v2420_v10  ;;  %v3142_v33 = vpop.f32.mrf.mxu0  ;;  %v1940_v54 = vadd.f32 %v3091_v21, %v4131_v9 }
 0x20b   : > { %2359 = vst.msk [vmem:[%s4146_s13 + $0xd0] sm:$0xff] %vm738_vm2, %v2327_v20  ;;  %v2390_v2 = vsel %vm738_vm2, %v2327_v20, 0.0  ;;  %v2330_v44 = vadd.f32 %v3142_v33, %v1930_v47  ;;  %v1934_v56 = vpop.f32.mrf.mxu1 }
 0x20c   : > { %v2391_v49 = vadd.f32 %v2390_v2, %v2389_v31  ;;  %v2282_v25 = vpop.f32.mrf.mxu0  ;;  %v1935_v24 = vadd.f32 %v1934_v56, %v4133_v36 }
 0x20d   : > { %2362 = vst.msk [vmem:[%s4146_s13 + $0xe8] sm:$0xff] %vm738_vm2, %v2330_v44  ;;  %v2423_v16 = vsel %vm738_vm2, %v2330_v44, 0.0  ;;  %v2329_v40 = vadd.f32 %v2282_v25, %v1925_v58 }
 0x20e   : > { %v2424_v7 = vadd.f32 %v2423_v16, %v2422_v15  ;;  %v3145_v50 = vpop.f32.mrf.mxu0 }
 0x20f   : > { %2361 = vst.msk [vmem:[%s4146_s13 + $0xe0] sm:$0xff] %vm738_vm2, %v2329_v40  ;;  %v2392_v53 = vsel %vm738_vm2, %v2329_v40, 0.0  ;;  %v2332_v52 = vadd.f32 %v3145_v50, %v1940_v54 }
 0x210   : > { %v2393_v27 = vadd.f32 %v2392_v53, %v2391_v49  ;;  %v2292_v23 = vpop.f32.mrf.mxu0 }
 0x211   : > { %2364 = vst.msk [vmem:[%s4146_s13 + $0xf8] sm:$0xff] %vm738_vm2, %v2332_v52  ;;  %v2425_v9 = vsel %vm738_vm2, %v2332_v52, 0.0  ;;  %v2331_v4 = vadd.f32 %v2292_v23, %v1935_v24 }
 0x212   : > { %v2426_v60 = vadd.f32 %v2425_v9, %v2424_v7 }
 0x213   : > { %2363 = vst.msk [vmem:[%s4146_s13 + $0xf0] sm:$0xff] %vm738_vm2, %v2331_v4  ;;  %v2394_v51 = vsel %vm738_vm2, %v2331_v4, 0.0 }
 0x214   : > { %v2395_v11 = vadd.f32 %v2394_v51, %v2393_v27  ;;  %v2428_v36 = vsel %vm738_vm2, %v2426_v60, 0.0 }
 0x216   : > { %v2427_v19 = vsel %vm738_vm2, %v2395_v11, 0.0 }
 0x217   : > { %v2429_v13 = vadd.f32 %v2428_v36, %v2427_v19 }
 0x219   : > { %v2430_v10 = vrot.slane %v2429_v13, 4 }
 0x21b   : > { %v2431_v0 = vadd.f32 %v2430_v10, %v2429_v13 }
 0x21d   : > { %v2432_v38 = vrot.slane %v2431_v0, 2 }
 0x21f   : > { %v2433_v42 = vadd.f32 %v2432_v38, %v2431_v0 }
 0x221   : > { %v2434_v34 = vrot.slane %v2433_v42, 1 }
 0x223   : > { %v2435_v31 = vadd.f32 %v2434_v34, %v2433_v42 }
 0x225   : > { %v2436_v8 = vmul.f32 0.00390625, %v2435_v31  ;;  %2573 = vst.msk [vmem:[%s4379_s16] sm:$0x1] %vm2572_vm6, %v2435_v31 }
 0x227   : > { %v2447_v47 = vsub.f32 %v4213_v5, %v2436_v8  ;;  %v2448_v43 = vsub.f32 %v4201_v14, %v2436_v8  ;;  %v2449_v21 = vsub.f32 %v4235_v32, %v2436_v8  ;;  %v2450_v15 = vsub.f32 %v4225_v30, %v2436_v8 }
 0x228   : > { %v2451_v33 = vsub.f32 %v4255_v12, %v2436_v8  ;;  %v4389_v58 = vsub.f32 %v4245_v17, %v2436_v8  ;;  %v2453_v2 = vsub.f32 %v4275_v39, %v2436_v8  ;;  %v4393_v49 = vsub.f32 %v4265_v35, %v2436_v8 }
 0x229   : > { %v4396_v56 = vsub.f32 %v4291_v3, %v2436_v8  ;;  %v4399_v5 = vsub.f32 %v4283_v29, %v2436_v8  ;;  %v4402_v14 = vsub.f32 %v4307_v63, %v2436_v8  ;;  %v4405_v30 = vsub.f32 %v4299_v48, %v2436_v8 }
 0x22a   : > { %v4408_v32 = vsub.f32 %v4323_v59, %v2436_v8  ;;  %v4411_v17 = vsub.f32 %v4315_v28, %v2436_v8  ;;  %v4414_v12 = vsub.f32 %v4339_v62, %v2436_v8  ;;  %v4417_v35 = vsub.f32 %v4331_v18, %v2436_v8 }
 0x22b   : > { %v4419_v39 = vsub.f32 %v2327_v20, %v2436_v8  ;;  %v4422_v29 = vsub.f32 %v4347_v55, %v2436_v8  ;;  %v4424_v3 = vsub.f32 %v2329_v40, %v2436_v8  ;;  %v4426_v48 = vsub.f32 %v2330_v44, %v2436_v8 }
 0x22c   : > { %v4428_v63 = vsub.f32 %v2331_v4, %v2436_v8  ;;  %v4430_v59 = vsub.f32 %v2332_v52, %v2436_v8  ;;  %v2437_v28 = vsub.f32 %v4153_v1, %v2436_v8  ;;  %v2439_v62 = vsub.f32 %v4163_v45, %v2436_v8 }
 0x22d   : > { %v2441_v18 = vsub.f32 %v4173_v57, %v2436_v8  ;;  %v2438_v20 = vsub.f32 %v4148_v46, %v2436_v8  ;;  %v2440_v25 = vsub.f32 %v4158_v61, %v2436_v8  ;;  %v2443_v55 = vsub.f32 %v4183_v6, %v2436_v8 }
 0x22e   : > { %v2469_v54 = vmul.f32 %v2437_v28, %v2437_v28  ;;  %v2471_v16 = vmul.f32 %v2439_v62, %v2439_v62  ;;  %v2442_v44 = vsub.f32 %v4168_v37, %v2436_v8  ;;  %v2445_v40 = vsub.f32 %v4193_v41, %v2436_v8 }
 0x22f   : > { %v2473_v7 = vmul.f32 %v2441_v18, %v2441_v18  ;;  %v2444_v50 = vsub.f32 %v4178_v26, %v2436_v8  ;;  %v2470_v1 = vmul.f32 %v2438_v20, %v2438_v20  ;;  %v2472_v24 = vmul.f32 %v2440_v25, %v2440_v25 }
 0x230   : > { %v2475_v45 = vmul.f32 %v2443_v55, %v2443_v55  ;;  %v2501_v57 = vsel %vm738_vm2, %v2469_v54, 0.0  ;;  %v2502_v46 = vsel %vm738_vm2, %v2471_v16, 0.0  ;;  %v2446_v61 = vsub.f32 %v4188_v22, %v2436_v8 }
 0x231   : > { %v2503_v53 = vadd.f32 %v2502_v46, %v2501_v57  ;;  %v2474_v6 = vmul.f32 %v2442_v44, %v2442_v44  ;;  %v2477_v52 = vmul.f32 %v2445_v40, %v2445_v40  ;;  %v2504_v27 = vsel %vm738_vm2, %v2473_v7, 0.0 }
 0x232   : > { %v2476_v37 = vmul.f32 %v2444_v50, %v2444_v50  ;;  %v2479_v41 = vmul.f32 %v2447_v47, %v2447_v47  ;;  %v2506_v9 = vsel %vm738_vm2, %v2475_v45, 0.0  ;;  %v2532_v26 = vsel %vm738_vm2, %v2470_v1, 0.0 }
 0x233   : > { %v2505_v23 = vadd.f32 %v2504_v27, %v2503_v53  ;;  %v2533_v4 = vsel %vm738_vm2, %v2472_v24, 0.0  ;;  %v2478_v11 = vmul.f32 %v2446_v61, %v2446_v61  ;;  %v2481_v36 = vmul.f32 %v2449_v21, %v2449_v21 }
 0x234   : > { %v2534_v51 = vadd.f32 %v2533_v4, %v2532_v26  ;;  %v2508_v19 = vsel %vm738_vm2, %v2477_v52, 0.0  ;;  %v2535_v22 = vsel %vm738_vm2, %v2474_v6, 0.0  ;;  %v2480_v0 = vmul.f32 %v2448_v43, %v2448_v43 }
 0x235   : > { %v2507_v60 = vadd.f32 %v2506_v9, %v2505_v23  ;;  %v2483_v38 = vmul.f32 %v2451_v33, %v2451_v33  ;;  %v2510_v42 = vsel %vm738_vm2, %v2479_v41, 0.0  ;;  %v2537_v34 = vsel %vm738_vm2, %v2476_v37, 0.0 }
 0x236   : > { %v2536_v10 = vadd.f32 %v2535_v22, %v2534_v51  ;;  %v2482_v47 = vmul.f32 %v2450_v15, %v2450_v15  ;;  %v2485_v28 = vmul.f32 %v2453_v2, %v2453_v2  ;;  %v2512_v62 = vsel %vm738_vm2, %v2481_v36, 0.0 }
 0x237   : > { %v2509_v13 = vadd.f32 %v2508_v19, %v2507_v60  ;;  %v2539_v21 = vsel %vm738_vm2, %v2478_v11, 0.0  ;;  %v2484_v25 = vmul.f32 %v4389_v58, %v4389_v58  ;;  %v2487_v43 = vmul.f32 %v4396_v56, %v4396_v56 }
 0x238   : > { %v2538_v8 = vadd.f32 %v2537_v34, %v2536_v10  ;;  %v2514_v33 = vsel %vm738_vm2, %v2483_v38, 0.0  ;;  %v2541_v55 = vsel %vm738_vm2, %v2480_v0, 0.0  ;;  %v2486_v15 = vmul.f32 %v4393_v49, %v4393_v49 }
 0x239   : > { %v2511_v31 = vadd.f32 %v2510_v42, %v2509_v13  ;;  %v2489_v2 = vmul.f32 %v4402_v14, %v4402_v14  ;;  %v2516_v44 = vsel %vm738_vm2, %v2485_v28, 0.0  ;;  %v2543_v40 = vsel %vm738_vm2, %v2482_v47, 0.0 }
 0x23a   : > { %v2540_v20 = vadd.f32 %v2539_v21, %v2538_v8  ;;  %v2488_v56 = vmul.f32 %v4399_v5, %v4399_v5  ;;  %v2491_v50 = vmul.f32 %v4408_v32, %v4408_v32  ;;  %v2518_v1 = vsel %vm738_vm2, %v2487_v43, 0.0 }
 0x23b   : > { %v2513_v18 = vadd.f32 %v2512_v62, %v2511_v31  ;;  %v2545_v24 = vsel %vm738_vm2, %v2484_v25, 0.0  ;;  %v2490_v14 = vmul.f32 %v4405_v30, %v4405_v30  ;;  %v2493_v57 = vmul.f32 %v4414_v12, %v4414_v12 }
 0x23c   : > { %v2542_v16 = vadd.f32 %v2541_v55, %v2540_v20  ;;  %v2520_v46 = vsel %vm738_vm2, %v2489_v2, 0.0  ;;  %v2547_v53 = vsel %vm738_vm2, %v2486_v15, 0.0  ;;  %v2492_v32 = vmul.f32 %v4411_v17, %v4411_v17 }
 0x23d   : > { %v2515_v54 = vadd.f32 %v2514_v33, %v2513_v18  ;;  %v2495_v6 = vmul.f32 %v4419_v39, %v4419_v39  ;;  %v2522_v52 = vsel %vm738_vm2, %v2491_v50, 0.0  ;;  %v2549_v27 = vsel %vm738_vm2, %v2488_v56, 0.0 }
 0x23e   : > { %v2544_v7 = vadd.f32 %v2543_v40, %v2542_v16  ;;  %v2494_v12 = vmul.f32 %v4417_v35, %v4417_v35  ;;  %v2497_v23 = vmul.f32 %v4424_v3, %v4424_v3  ;;  %v2524_v41 = vsel %vm738_vm2, %v2493_v57, 0.0 }
 0x23f   : > { %v2517_v58 = vadd.f32 %v2516_v44, %v2515_v54  ;;  %v2551_v9 = vsel %vm738_vm2, %v2490_v14, 0.0  ;;  %v2496_v39 = vmul.f32 %v4422_v29, %v4422_v29  ;;  %v2499_v4 = vmul.f32 %v4428_v63, %v4428_v63 }
 0x240   : > { %v2546_v45 = vadd.f32 %v2545_v24, %v2544_v7  ;;  %v2526_v60 = vsel %vm738_vm2, %v2495_v6, 0.0  ;;  %v2553_v51 = vsel %vm738_vm2, %v2492_v32, 0.0  ;;  %v2498_v3 = vmul.f32 %v4426_v48, %v4426_v48 }
 0x241   : > { %v2519_v49 = vadd.f32 %v2518_v1, %v2517_v58  ;;  %v2528_v36 = vsel %vm738_vm2, %v2497_v23, 0.0  ;;  %v2555_v19 = vsel %vm738_vm2, %v2494_v12, 0.0  ;;  %v2500_v29 = vmul.f32 %v4430_v59, %v4430_v59 }
 0x242   : > { %v2548_v61 = vadd.f32 %v2547_v53, %v2546_v45  ;;  %v2530_v63 = vsel %vm738_vm2, %v2499_v4, 0.0  ;;  %v2557_v10 = vsel %vm738_vm2, %v2496_v39, 0.0  ;;  %v2559_v42 = vsel %vm738_vm2, %v2498_v3, 0.0 }
 0x243   : > { %v2521_v5 = vadd.f32 %v2520_v46, %v2519_v49  ;;  %v2561_v48 = vsel %vm738_vm2, %v2500_v29, 0.0 }
 0x244   : > { %v2550_v37 = vadd.f32 %v2549_v27, %v2548_v61 }
 0x245   : > { %v2523_v30 = vadd.f32 %v2522_v52, %v2521_v5 }
 0x246   : > { %v2552_v26 = vadd.f32 %v2551_v9, %v2550_v37 }
 0x247   : > { %v2525_v17 = vadd.f32 %v2524_v41, %v2523_v30 }
 0x248   : > { %v2554_v11 = vadd.f32 %v2553_v51, %v2552_v26 }
 0x249   : > { %v2527_v35 = vadd.f32 %v2526_v60, %v2525_v17 }
 0x24a   : > { %v2556_v13 = vadd.f32 %v2555_v19, %v2554_v11 }
 0x24b   : > { %v2529_v22 = vadd.f32 %v2528_v36, %v2527_v35 }
 0x24c   : > { %v2558_v38 = vadd.f32 %v2557_v10, %v2556_v13 }
 0x24d   : > { %v2531_v0 = vadd.f32 %v2530_v63, %v2529_v22 }
 0x24e   : > { %v2560_v34 = vadd.f32 %v2559_v42, %v2558_v38 }
 0x24f   : > { %v2563_v8 = vsel %vm738_vm2, %v2531_v0, 0.0 }
 0x250   : > { %v2562_v31 = vadd.f32 %v2561_v48, %v2560_v34 }
 0x252   : > { %v2564_v47 = vsel %vm738_vm2, %v2562_v31, 0.0 }
 0x253   : > { %v2565_v28 = vadd.f32 %v2564_v47, %v2563_v8 }
 0x255   : > { %v2566_v62 = vrot.slane %v2565_v28, 4 }
 0x257   : > { %v2567_v59 = vadd.f32 %v2566_v62, %v2565_v28 }
 0x259   : > { %v2568_v21 = vrot.slane %v2567_v59, 2 }
 0x25b   : > { %v2569_v18 = vadd.f32 %v2568_v21, %v2567_v59 }
 0x25d   : > { %v2570_v20 = vrot.slane %v2569_v18, 1 }
 0x25f   : > { %v2571_v25 = vadd.f32 %v2570_v20, %v2569_v18 }
 0x261   : > { %2574 = vst.msk [vmem:[%s4379_s16 + $0x1] sm:$0x1] %vm2572_vm6, %v2571_v25 }
 0x262 PF: > { %s18_s2 = sadd.s32 1, %s3201_s2   ;;  %s4527_s24 = smov %s3197_s1 }
 0x263   : > { %p15_p5 = scmp.ge.s32.totalorder %s18_s2, 4   ;;  %s4528_s1 = smov %s4530_s25 }
 0x265   :  { %17 = sbr.rel (!%p15_p5) target bundleno = 2 (0x2), region = 114 }

// kernel: double_conv.3
= control target key start
LH: loop header
LB: loop body
LE: loop exit
PB: predicated region body
PF: predicated region fallthrough
CT: control target
= control target key end

     0   :  { %s3056_s18 = smov 0   ;;  %s3058_s19 = smov 0   ;;  %s4209_s0 = inlined_call_operand.vmem [shape: f32[2,16,16,4], index: 0, kind: input, shape index: {}, may-alias: {0,1,2}]   ;;  %s4210_s1 = inlined_call_operand.vmem [shape: f32[2,16,16,4], index: 1, kind: input, shape index: {}, may-alias: {0,1,2}]   ;;  %s4211_s2 = inlined_call_operand.vmem [shape: f32[2,16,16,4], index: 2, kind: input, shape index: {}, may-alias: {0,1,2}]   ;;  %s4212_s3 = inlined_call_operand.vmem [shape: f32[3,12,8], index: 3, kind: input, shape index: {}]   ;;  %s4213_s4 = inlined_call_operand.vmem [shape: f32[2,16,16,8], index: 4, kind: output, shape index: {0}]   ;;  %s4214_s5 = inlined_call_operand.vmem [shape: f32[2,1,2,8], index: 5, kind: output, shape index: {1}]  }
   0x1   :  { %s3060_s20 = smov 0  }
   0x2 LB: > { %s28_s1 = sadd.s32 1, %s3017_s19  ;;  %p2590_p0 = scmp.ge.s32.totalorder %s3021_s20, 1  ;;  %s3021_s20 = sphi %s3060_s20, %s16_s20   ;;  %s3017_s19 = sphi %s3058_s19, %s4216_s19   ;;  %s3013_s18 = sphi %s3056_s18, %s4215_s18  }
   0x3   : > { %p30_p1 = scmp.ge.s32.totalorder %s28_s1, 2  ;;  %p278_p2 = scmp.lt.s32.totalorder %s3021_s20, 3 }
   0x5   : > { %s4218_s1 = smov (%p30_p1, %s28_s1), 0  ;;  %p279_p3 = pnand %p2590_p0, %p278_p2 }
   0x6   : > { %p350_p4 = scmp.lt.s32.totalorder (!%p279_p3), %s3013_s18, 1  ;;  %s3023_s24 = smov (!%p279_p3), 4  }
   0x7   : > { %282 = sbr.rel (%p279_p3) target bundleno = 604 (0x25c), region = 36  ;;  %s3024_s25 = smov (!%p279_p3), 8  }
   0xc   : > { %s4220_s18 = smov (!%p350_p4, %s3013_s18), 1  ;;  %vm736_vm0 = vcmask 1046528   ;;  %vm1219_vm1 = vcmask 1043456   ;;  %vm476_vm2 = vcmask 1040384   ;;  %v2601_v16 = vld [vmem:[%s4212_s3 + $0x18] sm:$0xf] }
   0xd   : > { %s2705_s2 = sshll.u32 %s4220_s18, 8  ;;  %vm574_vm3 = vcmask 31744   ;;  %2968 = vmatprep.subr.msk.mxu1 %vm1219_vm1, %v2601_v16  ;;  %v2600_v21 = vld [vmem:[%s4212_s3 + $0x10] sm:$0xff]  ;;  %2812 = vmatprep.subr.msk.mxu0 %vm1219_vm1, %v2601_v16  ;;  %vm966_vm4 = vcmask 97280   ;;  %vm703_vm5 = vcmask 64544   ;;  %vm929_vm6 = vcmask 97344  }
   0xe   : > { %s3082_s23 = scalar_lea.vmem %s4209_s0, %s2705_s2  ;;  %2970 = vmatpush3.msk.msra.mxu1 %vm1219_vm1, %v2601_v16  ;;  %2813 = vmatpush3.msk.msra.mxu0 %vm1219_vm1, %v2601_v16  ;;  %s3836_s15 = scalar_lea.vmem %s4213_s4, %s2705_s2  ;;  %vm2164_vm7 = vcmask 64512   ;;  %vm2404_vm8 = vcmask 57344  }
   0xf   : > { %v3085_v0 = vld [vmem:[%s3082_s23 + $0x80] sm:$0xff]  ;;  %v3091_v2 = vld [vmem:[%s3082_s23 + $0x88] sm:$0xff]  ;;  %v3113_v10 = vld [vmem:[%s3082_s23 + $0x98] sm:$0xff]  ;;  %2969 = vmatprep.subr.mxu1 %v2600_v21  ;;  %2814 = vmatprep.subr.mxu0 %v2600_v21  ;;  %s2599_s16 = sshll.u32 %s4220_s18, 1 }
  0x10   : > { %v3088_v1 = vld [vmem:[%s3082_s23] sm:$0xff]  ;;  %639 = vrot.lane.b32.xlu0 %v3085_v0, %s3023_s24  ;;  %v761_v3 = vrot.slane %v3085_v0, 1  ;;  %v3099_v4 = vld [vmem:[%s3082_s23 + $0x8] sm:$0xff]  ;;  %v762_v5 = vrot.slane %v3091_v2, 1  ;;  %v3117_v12 = vld [vmem:[%s3082_s23 + $0x90] sm:$0xff]  ;;  %v765_v14 = vrot.slane %v3113_v10, 1  ;;  %2971 = vmatpush3.msra.mxu1 %v2600_v21  ;;  %s4069_s21 = scalar_lea.vmem %s4214_s5, %s2599_s16 }
  0x11   : > { %607 = vrot.lane.b32.xlu1 %v3088_v1, %s3023_s24  ;;  %v737_v6 = vrot.slane %v3088_v1, 1  ;;  %v738_v7 = vrot.slane %v3099_v4, 1  ;;  %v764_v13 = vrot.slane %v3117_v12, 1  ;;  %v3125_v15 = vld [vmem:[%s3082_s23 + $0xd8] sm:$0xff]  ;;  %v501_v17 = vrot.slane %v3085_v0, 7  ;;  %v3133_v19 = vld [vmem:[%s3082_s23 + $0xd0] sm:$0xff]  ;;  %2815 = vmatpush3.msra.mxu0 %v2600_v21 }
  0x12   : > { %v809_v8 = vsel %vm736_vm0, %v762_v5, 0.0  ;;  %v763_v9 = vsel %vm736_vm0, %v761_v3, %v762_v5  ;;  %v3136_v20 = vld [vmem:[%s3082_s23 + $0x58] sm:$0xff]  ;;  %v477_v22 = vrot.slane %v3088_v1, 7  ;;  %v502_v23 = vrot.slane %v3091_v2, 7  ;;  %v3147_v25 = vld [vmem:[%s3082_s23 + $0x10] sm:$0xff]  ;;  %v3163_v33 = vld [vmem:[%s3082_s23 + $0xe8] sm:$0xff] }
  0x13   : > { %v739_v11 = vsel %vm736_vm0, %v737_v6, %v738_v7  ;;  %v801_v18 = vsel %vm736_vm0, %v738_v7, 0.0  ;;  %v478_v24 = vrot.slane %v3099_v4, 7  ;;  %v776_v26 = vrot.slane %v3133_v19, 1  ;;  %v3156_v30 = vld [vmem:[%s3082_s23 + $0x18] sm:$0xff]  ;;  %v3160_v32 = vld [vmem:[%s3082_s23 + $0x50] sm:$0xff]  ;;  %v3173_v38 = vld [vmem:[%s3082_s23 + $0xe0] sm:$0xff] }
  0x14   : > { %641 = vrot.lane.b32.xlu0 %v3091_v2, %s3023_s24  ;;  %v504_v27 = vrot.slane %v3117_v12, 7  ;;  %v505_v28 = vrot.slane %v3113_v10, 7  ;;  %v766_v29 = vsel %vm736_vm0, %v764_v13, %v765_v14  ;;  %v777_v31 = vrot.slane %v3125_v15, 1  ;;  %v3176_v39 = vld [vmem:[%s3082_s23 + $0x68] sm:$0xff]  ;;  %v3188_v45 = vld [vmem:[%s3082_s23 + $0xa0] sm:$0xff]  ;;  %v3201_v50 = vld [vmem:[%s3082_s23 + $0xf8] sm:$0xff] }
  0x15   : > { %609 = vrot.lane.b32.xlu1 %v3099_v4, %s3023_s24  ;;  %v480_v34 = vrot.slane %v3147_v25, 7  ;;  %v740_v35 = vrot.slane %v3147_v25, 1  ;;  %v752_v36 = vrot.slane %v3160_v32, 1  ;;  %v753_v37 = vrot.slane %v3136_v20, 1  ;;  %v3198_v49 = vld [vmem:[%s3082_s23 + $0x60] sm:$0xff]  ;;  %v3206_v53 = vld [vmem:[%s3082_s23 + $0xa8] sm:$0xff] }
  0x16   : > { %v810_v40 = vsel %vm736_vm0, %v765_v14, 0.0  ;;  %v3180_v41 = vsel %vm736_vm0, %v776_v26, %v777_v31  ;;  %v3183_v42 = vsel %vm736_vm0, %v777_v31, 0.0  ;;  %v779_v43 = vrot.slane %v3173_v38, 1  ;;  %v3211_v56 = vld [vmem:[%s3082_s23 + $0xf0] sm:$0xff]  ;;  %v3218_v58 = vld [vmem:[%s3082_s23 + $0x20] sm:$0xff]  ;;  %v3229_v63 = vld [vmem:[%s3082_s23 + $0x28] sm:$0xff] }
  0x17   : > { %v481_v44 = vrot.slane %v3156_v30, 7  ;;  %v3191_v46 = vsel %vm736_vm0, %v752_v36, %v753_v37  ;;  %v3194_v47 = vsel %vm736_vm0, %v753_v37, 0.0  ;;  %v780_v48 = vrot.slane %v3163_v33, 1  ;;  %v3239_v7 = vld [vmem:[%s3082_s23 + $0x70] sm:$0xff] }
  0x18   : > { %867 = vrot.lane.b32.xlu0 %v809_v8, %s3024_s25  ;;  %v741_v51 = vrot.slane %v3156_v30, 1  ;;  %v507_v52 = vrot.slane %v3188_v45, 7  ;;  %v755_v54 = vrot.slane %v3198_v49, 1  ;;  %v756_v55 = vrot.slane %v3176_v39, 1  ;;  %v3242_v8 = vld [vmem:[%s3082_s23 + $0x78] sm:$0xff]  ;;  %v3253_v16 = vld [vmem:[%s3082_s23 + $0xb0] sm:$0xff] }
  0x19   : > { %865 = vrot.lane.b32.xlu1 %v763_v9, %s3024_s25  ;;  %v508_v57 = vrot.slane %v3206_v53, 7  ;;  %v3221_v59 = vsel %vm736_vm0, %v779_v43, %v780_v48  ;;  %v3224_v60 = vsel %vm736_vm0, %v780_v48, 0.0  ;;  %v782_v61 = vrot.slane %v3211_v56, 1  ;;  %v418_v43 = vld [vmem:[%s3082_s23 + $0x30] sm:$0xff] }
  0x1a   : > { %v483_v62 = vrot.slane %v3218_v58, 7  ;;  %v3232_v3 = vsel %vm736_vm0, %v755_v54, %v756_v55  ;;  %v3235_v5 = vsel %vm736_vm0, %v756_v55, 0.0  ;;  %v783_v6 = vrot.slane %v3201_v50, 1 }
  0x1b   : > { %v484_v9 = vrot.slane %v3229_v63, 7  ;;  %v557_v13 = vsel %vm476_vm2, 0.0, %v477_v22  ;;  %v758_v14 = vrot.slane %v3239_v7, 1  ;;  %v503_v21 = vsel %vm476_vm2, %v501_v17, %v502_v23 }
  0x1c   : > { %833 = vrot.lane.b32.xlu0 %v739_v11, %s3024_s25  ;;  %v565_v11 = vsel %vm476_vm2, 0.0, %v501_v17  ;;  %575 = vst.msk [vmem:[#allocation2 + $0x10] sm:$0xff] %vm574_vm3, %v557_v13  ;;  %v3271_v26 = vsel %vm736_vm0, %v783_v6, 0.0  ;;  %v742_v2 = vsel %vm736_vm0, %v740_v35, %v741_v51  ;;  %v510_v0 = vrot.slane %v3253_v16, 7  ;;  %592 = vst.msk [vmem:[#allocation2 + $0x98] sm:$0xff] %vm574_vm3, %v503_v21  ;;  %v435_v35 = vld [vmem:[%s3082_s23 + $0xb8] sm:$0xff] }
  0x1d   : > { %643 = vrot.lane.b32.xlu1 %v3117_v12, %s3023_s24  ;;  %591 = vst.msk [vmem:[#allocation2 + $0x90] sm:$0xff] %vm574_vm3, %v565_v11  ;;  %v759_v1 = vrot.slane %v3242_v8, 1  ;;  %v566_v4 = vsel %vm476_vm2, 0.0, %v504_v27  ;;  %v506_v17 = vsel %vm476_vm2, %v504_v27, %v505_v28  ;;  %v482_v23 = vsel %vm476_vm2, %v480_v34, %v481_v44 }
  0x1e   : > { %593 = vst.msk [vmem:[#allocation2 + $0xa0] sm:$0xff] %vm574_vm3, %v566_v4  ;;  %594 = vst.msk [vmem:[#allocation2 + $0xa8] sm:$0xff] %vm574_vm3, %v506_v17  ;;  %v559_v12 = vsel %vm476_vm2, 0.0, %v483_v62  ;;  %v485_v27 = vsel %vm476_vm2, %v483_v62, %v484_v9  ;;  %v767_v28 = vrot.slane %v3188_v45, 1  ;;  %v802_v31 = vsel %vm736_vm0, %v741_v51, 0.0  ;;  %v421_v17 = vld [vmem:[%s3082_s23 + $0x48] sm:$0xff] }
  0x1f   : > { %578 = vst.msk [vmem:[#allocation2 + $0x28] sm:$0xff] %vm574_vm3, %v482_v23  ;;  %579 = vst.msk [vmem:[#allocation2 + $0x30] sm:$0xff] %vm574_vm3, %v559_v12  ;;  %v511_v36 = vrot.slane %v435_v35, 7  ;;  %v568_v37 = vsel %vm476_vm2, 0.0, %v510_v0  ;;  %v486_v44 = vrot.slane %v418_v43, 7  ;;  %v743_v48 = vrot.slane %v3218_v58, 1 }
  0x20   : > { %835 = vrot.lane.b32.xlu0 %v801_v18, %s3024_s25  ;;  %v3258_v18 = vsel %vm736_vm0, %v782_v61, %v783_v6  ;;  %580 = vst.msk [vmem:[#allocation2 + $0x38] sm:$0xff] %vm574_vm3, %v485_v27  ;;  %597 = vst.msk [vmem:[#allocation2 + $0xc0] sm:$0xff] %vm574_vm3, %v568_v37  ;;  %v436_v61 = vld [vmem:[%s3082_s23 + $0xc0] sm:$0xff]  ;;  %v770_v6 = vrot.slane %v3253_v16, 1  ;;  %v771_v11 = vrot.slane %v435_v35, 1  ;;  %v492_v37 = vrot.slane %v3160_v32, 7 }
  0x21   : > { %645 = vrot.lane.b32.xlu1 %v3113_v10, %s3023_s24  ;;  %v509_v10 = vsel %vm476_vm2, %v507_v52, %v508_v57  ;;  %v560_v55 = vsel %vm476_vm2, 0.0, %v486_v44  ;;  %v773_v27 = vrot.slane %v436_v61, 1 }
  0x22   : > { %596 = vst.msk [vmem:[#allocation2 + $0xb8] sm:$0xff] %vm574_vm3, %v509_v10  ;;  %581 = vst.msk [vmem:[#allocation2 + $0x40] sm:$0xff] %vm574_vm3, %v560_v55  ;;  %v772_v21 = vsel %vm736_vm0, %v770_v6, %v771_v11  ;;  %v516_v10 = vrot.slane %v3133_v19, 7 }
  0x24   : > { %869 = vrot.lane.b32.xlu0 %v766_v29, %s3024_s25  ;;  %v3294_v29 = vsel %vm736_vm0, %v758_v14, %v759_v1 }
  0x25   : > { %611 = vrot.lane.b32.xlu1 %v3147_v25, %s3023_s24  ;;  %v479_v25 = vsel %vm476_vm2, %v477_v22, %v478_v24  ;;  %v558_v22 = vsel %vm476_vm2, 0.0, %v480_v34  ;;  %v567_v24 = vsel %vm476_vm2, 0.0, %v507_v52  ;;  %v768_v34 = vrot.slane %v3206_v53, 1 }
  0x26   : > { %576 = vst.msk [vmem:[#allocation2 + $0x18] sm:$0xff] %vm574_vm3, %v479_v25  ;;  %577 = vst.msk [vmem:[#allocation2 + $0x20] sm:$0xff] %vm574_vm3, %v558_v22  ;;  %v744_v52 = vrot.slane %v3229_v63, 1  ;;  %v420_v25 = vld [vmem:[%s3082_s23 + $0x40] sm:$0xff]  ;;  %v490_v22 = vrot.slane %v421_v17, 7 }
  0x27   : > { %595 = vst.msk [vmem:[#allocation2 + $0xb0] sm:$0xff] %vm574_vm3, %v567_v24  ;;  %v811_v51 = vsel %vm736_vm0, %v768_v34, 0.0 }
  0x28   : > { %871 = vrot.lane.b32.xlu0 %v810_v40, %s3024_s25  ;;  %v769_v40 = vsel %vm736_vm0, %v767_v28, %v768_v34  ;;  %v745_v57 = vsel %vm736_vm0, %v743_v48, %v744_v52  ;;  %v803_v9 = vsel %vm736_vm0, %v744_v52, 0.0  ;;  %v517_v34 = vrot.slane %v3125_v15, 7 }
  0x29   : > { %613 = vrot.lane.b32.xlu1 %v3156_v30, %s3023_s24  ;;  %v3297_v30 = vsel %vm736_vm0, %v759_v1, 0.0  ;;  %v812_v1 = vsel %vm736_vm0, %v771_v11, 0.0  ;;  %v493_v48 = vrot.slane %v3136_v20, 7 }
  0x2c   : > { %837 = vrot.lane.b32.xlu0 %v742_v2, %s3024_s25  ;;  %v489_v2 = vrot.slane %v420_v25, 7 }
  0x2d   : > { %647 = vrot.lane.b32.xlu1 %v3188_v45, %s3023_s24  ;;  %v512_v45 = vsel %vm476_vm2, %v510_v0, %v511_v36  ;;  %v746_v0 = vrot.slane %v418_v43, 1 }
  0x2e   : > { %598 = vst.msk [vmem:[#allocation2 + $0xc8] sm:$0xff] %vm574_vm3, %v512_v45  ;;  %v561_v23 = vsel %vm476_vm2, 0.0, %v489_v2  ;;  %v491_v12 = vsel %vm476_vm2, %v489_v2, %v490_v22  ;;  %v750_v45 = vrot.slane %v421_v17, 1 }
  0x2f   : > { %583 = vst.msk [vmem:[#allocation2 + $0x50] sm:$0xff] %vm574_vm3, %v561_v23  ;;  %584 = vst.msk [vmem:[#allocation2 + $0x58] sm:$0xff] %vm574_vm3, %v491_v12 }
  0x30   : > { %839 = vrot.lane.b32.xlu0 %v802_v31, %s3024_s25  ;;  %v805_v55 = vsel %vm736_vm0, %v750_v45, 0.0 }
  0x31   : > { %649 = vrot.lane.b32.xlu1 %v3206_v53, %s3023_s24  ;;  %v419_v53 = vld [vmem:[%s3082_s23 + $0x38] sm:$0xff] }
  0x32   : > { %v487_v54 = vrot.slane %v419_v53, 7  ;;  %v747_v4 = vrot.slane %v419_v53, 1 }
  0x34   : > { %873 = vrot.lane.b32.xlu0 %v769_v40, %s3024_s25  ;;  %v488_v62 = vsel %vm476_vm2, %v486_v44, %v487_v54  ;;  %v748_v24 = vsel %vm736_vm0, %v746_v0, %v747_v4  ;;  %v804_v28 = vsel %vm736_vm0, %v747_v4, 0.0  ;;  %v518_v40 = vsel %vm476_vm2, %v516_v10, %v517_v34 }
  0x35   : > { %615 = vrot.lane.b32.xlu1 %v3218_v58, %s3023_s24  ;;  %v513_v58 = vrot.slane %v436_v61, 7  ;;  %582 = vst.msk [vmem:[#allocation2 + $0x48] sm:$0xff] %vm574_vm3, %v488_v62  ;;  %602 = vst.msk [vmem:[#allocation2 + $0xe8] sm:$0xff] %vm574_vm3, %v518_v40  ;;  %v494_v54 = vsel %vm476_vm2, %v492_v37, %v493_v48 }
  0x36   : > { %586 = vst.msk [vmem:[#allocation2 + $0x68] sm:$0xff] %vm574_vm3, %v494_v54 }
  0x37   : > { %v569_v14 = vsel %vm476_vm2, 0.0, %v513_v58 }
  0x38   : > { %875 = vrot.lane.b32.xlu0 %v811_v51, %s3024_s25  ;;  %599 = vst.msk [vmem:[#allocation2 + $0xd0] sm:$0xff] %vm574_vm3, %v569_v14  ;;  %v562_v51 = vsel %vm476_vm2, 0.0, %v492_v37 }
  0x39   : > { %617 = vrot.lane.b32.xlu1 %v3229_v63, %s3023_s24  ;;  %v437_v63 = vld [vmem:[%s3082_s23 + $0xc8] sm:$0xff]  ;;  %585 = vst.msk [vmem:[#allocation2 + $0x60] sm:$0xff] %vm574_vm3, %v562_v51 }
  0x3a   : > { %v514_v13 = vrot.slane %v437_v63, 7  ;;  %v774_v31 = vrot.slane %v437_v63, 1 }
  0x3c   : > { %841 = vrot.lane.b32.xlu0 %v745_v57, %s3024_s25  ;;  %v775_v36 = vsel %vm736_vm0, %v773_v27, %v774_v31  ;;  %v813_v44 = vsel %vm736_vm0, %v774_v31, 0.0  ;;  %v520_v57 = vrot.slane %v3163_v33, 7 }
  0x3d   : > { %651 = vrot.lane.b32.xlu1 %v3253_v16, %s3023_s24  ;;  %v515_v16 = vsel %vm476_vm2, %v513_v58, %v514_v13  ;;  %v495_v58 = vrot.slane %v3198_v49, 7 }
  0x3e   : > { %600 = vst.msk [vmem:[#allocation2 + $0xd8] sm:$0xff] %vm574_vm3, %v515_v16  ;;  %v2668_v16 = vld [vmem:[%s4212_s3 + $0x20] sm:$0xff] }
  0x3f   : > { %v563_v6 = vsel %vm476_vm2, 0.0, %v495_v58 }
  0x40   : > { %843 = vrot.lane.b32.xlu0 %v803_v9, %s3024_s25  ;;  %587 = vst.msk [vmem:[#allocation2 + $0x70] sm:$0xff] %vm574_vm3, %v563_v6  ;;  %v3427_v9 = vld [vmem:[%s4212_s3 + $0x28] sm:$0xf] }
  0x41   : > { %653 = vrot.lane.b32.xlu1 %v435_v35, %s3023_s24  ;;  %v570_v35 = vsel %vm476_vm2, 0.0, %v516_v10  ;;  %2916 = vmatprep.subr.msk.mxu0 %vm1219_vm1, %v3427_v9 }
  0x42   : > { %601 = vst.msk [vmem:[#allocation2 + $0xe0] sm:$0xff] %vm574_vm3, %v570_v35 }
  0x44   : > { %877 = vrot.lane.b32.xlu0 %v772_v21, %s3024_s25 }
  0x45   : > { %619 = vrot.lane.b32.xlu1 %v418_v43, %s3023_s24  ;;  %v749_v43 = vrot.slane %v420_v25, 1 }
  0x47   : > { %v751_v52 = vsel %vm736_vm0, %v749_v43, %v750_v45 }
  0x48   : > { %879 = vrot.lane.b32.xlu0 %v812_v1, %s3024_s25 }
  0x49   : > { %621 = vrot.lane.b32.xlu1 %v419_v53, %s3023_s24  ;;  %v519_v53 = vrot.slane %v3173_v38, 7 }
  0x4b   : > { %v521_v62 = vsel %vm476_vm2, %v519_v53, %v520_v57 }
  0x4c   : > { %845 = vrot.lane.b32.xlu0 %v748_v24, %s3024_s25  ;;  %604 = vst.msk [vmem:[#allocation2 + $0xf8] sm:$0xff] %vm574_vm3, %v521_v62 }
  0x4d   : > { %655 = vrot.lane.b32.xlu1 %v436_v61, %s3023_s24  ;;  %v571_v61 = vsel %vm476_vm2, 0.0, %v519_v53 }
  0x4e   : > { %603 = vst.msk [vmem:[#allocation2 + $0xf0] sm:$0xff] %vm574_vm3, %v571_v61 }
  0x50   : > { %847 = vrot.lane.b32.xlu0 %v804_v28, %s3024_s25 }
  0x51   : > { %657 = vrot.lane.b32.xlu1 %v437_v63, %s3023_s24 }
  0x54   : > { %881 = vrot.lane.b32.xlu0 %v775_v36, %s3024_s25 }
  0x55   : > { %623 = vrot.lane.b32.xlu1 %v420_v25, %s3023_s24 }
  0x58   : > { %883 = vrot.lane.b32.xlu0 %v813_v44, %s3024_s25 }
  0x59   : > { %625 = vrot.lane.b32.xlu1 %v421_v17, %s3023_s24 }
  0x5c   : > { %849 = vrot.lane.b32.xlu0 %v751_v52, %s3024_s25 }
  0x5d   : > { %659 = vrot.lane.b32.xlu1 %v3133_v19, %s3023_s24  ;;  %v496_v19 = vrot.slane %v3176_v39, 7 }
  0x60   : > { %851 = vrot.lane.b32.xlu0 %v805_v55, %s3024_s25 }
  0x61   : > { %661 = vrot.lane.b32.xlu1 %v3125_v15, %s3023_s24  ;;  %v3414_v15 = vld [vmem:[%s4212_s3 + $0x8] sm:$0xf] }
  0x62   : > { %2864 = vmatprep.subr.msk.mxu1 %vm1219_vm1, %v3414_v15 }
  0x64   : > { %885 = vrot.lane.b32.xlu0 %v3180_v41, %s3024_s25  ;;  %v497_v41 = vsel %vm476_vm2, %v495_v58, %v496_v19 }
  0x65   : > { %627 = vrot.lane.b32.xlu1 %v3160_v32, %s3023_s24  ;;  %v522_v32 = vrot.slane %v3211_v56, 7  ;;  %588 = vst.msk [vmem:[#allocation2 + $0x78] sm:$0xff] %vm574_vm3, %v497_v41 }
  0x68   : > { %887 = vrot.lane.b32.xlu0 %v3183_v42, %s3024_s25  ;;  %v572_v42 = vsel %vm476_vm2, 0.0, %v522_v32 }
  0x69   : > { %629 = vrot.lane.b32.xlu1 %v3136_v20, %s3023_s24  ;;  %v523_v20 = vrot.slane %v3201_v50, 7  ;;  %605 = vst.msk [vmem:[#allocation2 + $0x100] sm:$0xff] %vm574_vm3, %v572_v42 }
  0x6b   : > { %v524_v11 = vsel %vm476_vm2, %v522_v32, %v523_v20 }
  0x6c   : > { %853 = vrot.lane.b32.xlu0 %v3191_v46, %s3024_s25  ;;  %v498_v46 = vrot.slane %v3239_v7, 7  ;;  %606 = vst.msk [vmem:[#allocation2 + $0x108] sm:$0xff] %vm574_vm3, %v524_v11 }
  0x6d   : > { %663 = vrot.lane.b32.xlu1 %v3173_v38, %s3023_s24  ;;  %v499_v38 = vrot.slane %v3242_v8, 7 }
  0x6e   : > { %v564_v63 = vsel %vm476_vm2, 0.0, %v498_v46 }
  0x6f   : > { %589 = vst.msk [vmem:[#allocation2 + $0x80] sm:$0xff] %vm574_vm3, %v564_v63 }
  0x70   : > { %855 = vrot.lane.b32.xlu0 %v3194_v47, %s3024_s25  ;;  %v3025_v47 = vmov 0.0  }
  0x71   : > { %665 = vrot.lane.b32.xlu1 %v3163_v33, %s3023_s24  ;;  %v500_v33 = vsel %vm476_vm2, %v498_v46, %v499_v38  ;;  %967 = vst.msk [vmem:[#allocation2] sm:$0xff] %vm966_vm4, %v3025_v47  ;;  %968 = vst.msk [vmem:[#allocation2 + $0x8] sm:$0xff] %vm966_vm4, %v3025_v47 }
  0x72   : > { %590 = vst.msk [vmem:[#allocation2 + $0x88] sm:$0xff] %vm574_vm3, %v500_v33 }
  0x73   : > { %1012 = vst.msk [vmem:[#allocation2 + $0x110] sm:$0xff] %vm966_vm4, %v3025_v47  ;;  %1013 = vst.msk [vmem:[#allocation2 + $0x118] sm:$0xff] %vm966_vm4, %v3025_v47 }
  0x74   : > { %889 = vrot.lane.b32.xlu0 %v3221_v59, %s3024_s25 }
  0x75   : > { %631 = vrot.lane.b32.xlu1 %v3198_v49, %s3023_s24 }
  0x78   : > { %891 = vrot.lane.b32.xlu0 %v3224_v60, %s3024_s25 }
  0x79   : > { %633 = vrot.lane.b32.xlu1 %v3176_v39, %s3023_s24 }
  0x7c   : > { %857 = vrot.lane.b32.xlu0 %v3232_v3, %s3024_s25 }
  0x7d   : > { %667 = vrot.lane.b32.xlu1 %v3211_v56, %s3023_s24 }
  0x80   : > { %859 = vrot.lane.b32.xlu0 %v3235_v5, %s3024_s25 }
  0x81   : > { %669 = vrot.lane.b32.xlu1 %v3201_v50, %s3023_s24 }
  0x82   : > { %v640_v39 = vpop.permute.xlu0 %639 }
  0x83   : > { %v608_v49 = vpop.permute.xlu1 %607  ;;  %720 = vst.msk [vmem:[#allocation2 + $0x90] sm:$0xff] %vm703_vm5, %v640_v39 }
  0x84   : > { %704 = vst.msk [vmem:[#allocation2 + $0x10] sm:$0xff] %vm703_vm5, %v608_v49  ;;  %893 = vrot.lane.b32.xlu0 %v3258_v18, %s3024_s25 }
  0x85   : > { %635 = vrot.lane.b32.xlu1 %v3239_v7, %s3023_s24 }
  0x86   : > { %v642_v56 = vpop.permute.xlu0 %641 }
  0x87   : > { %v610_v59 = vpop.permute.xlu1 %609  ;;  %721 = vst.msk [vmem:[#allocation2 + $0x98] sm:$0xff] %vm703_vm5, %v642_v56 }
  0x88   : > { %705 = vst.msk [vmem:[#allocation2 + $0x18] sm:$0xff] %vm703_vm5, %v610_v59  ;;  %895 = vrot.lane.b32.xlu0 %v3271_v26, %s3024_s25 }
  0x89   : > { %637 = vrot.lane.b32.xlu1 %v3242_v8, %s3023_s24 }
  0x8a   : > { %v868_v50 = vpop.permute.xlu0 %867 }
  0x8b   : > { %v866_v60 = vpop.permute.xlu1 %865  ;;  %947 = vst.msk [vmem:[#allocation2 + $0x98] sm:$0xff] %vm929_vm6, %v868_v50 }
  0x8c   : > { %946 = vst.msk [vmem:[#allocation2 + $0x90] sm:$0xff] %vm929_vm6, %v866_v60  ;;  %861 = vrot.lane.b32.xlu0 %v3294_v29, %s3024_s25  ;;  %v1085_v29 = vld [vmem:[%s4212_s3] sm:$0xff] }
  0x8d   : > { %863 = vrot.lane.b32.xlu1 %v3297_v30, %s3024_s25 }
  0x8e   : > { %v834_v3 = vpop.permute.xlu0 %833 }
  0x8f   : > { %v644_v5 = vpop.permute.xlu1 %643  ;;  %930 = vst.msk [vmem:[#allocation2 + $0x10] sm:$0xff] %vm929_vm6, %v834_v3 }
  0x90   : > { %722 = vst.msk [vmem:[#allocation2 + $0xa0] sm:$0xff] %vm703_vm5, %v644_v5 }
  0x92   : > { %v836_v7 = vpop.permute.xlu0 %835  ;;  %v3493_v26 = vld [vmem:[#allocation2 + $0x98] sm:$0xff] }
  0x93   : > { %v3491_v8 = vld [vmem:[#allocation2 + $0x90] sm:$0xff]  ;;  %v646_v18 = vpop.permute.xlu1 %645  ;;  %931 = vst.msk [vmem:[#allocation2 + $0x18] sm:$0xff] %vm929_vm6, %v836_v7 }
  0x94   : > { %2840 = vmatprep.mubr.msk.f32.mxu1 %vm966_vm4, %v3491_v8  ;;  %723 = vst.msk [vmem:[#allocation2 + $0xa8] sm:$0xff] %vm703_vm5, %v646_v18 }
  0x95   : > { %2841 = vmatmul.mubr.msk.f32.vlgmr.msra.gmra.mxu1 %vm966_vm4, %v3493_v26 }
  0x96   : > { %2865 = vmatpush3.msk.msra.mxu1 %vm1219_vm1, %v3414_v15  ;;  %v870_v30 = vpop.permute.xlu0 %869  ;;  %v3506_v14 = vld [vmem:[#allocation2 + $0x10] sm:$0xff] }
  0x97   : > { %v612_v13 = vpop.permute.xlu1 %611  ;;  %2866 = vmatprep.subr.mxu1 %v1085_v29  ;;  %948 = vst.msk [vmem:[#allocation2 + $0xa0] sm:$0xff] %vm929_vm6, %v870_v30  ;;  %2816 = vmatprep.mubr.msk.f32.mxu0 %vm966_vm4, %v3506_v14 }
  0x98   : > { %706 = vst.msk [vmem:[#allocation2 + $0x20] sm:$0xff] %vm703_vm5, %v612_v13  ;;  %2867 = vmatpush3.msra.mxu1 %v1085_v29 }
  0x9a   : > { %v872_v21 = vpop.permute.xlu0 %871  ;;  %v3512_v2 = vld [vmem:[#allocation2 + $0x18] sm:$0xff] }
  0x9b   : > { %v614_v25 = vpop.permute.xlu1 %613  ;;  %949 = vst.msk [vmem:[#allocation2 + $0xa8] sm:$0xff] %vm929_vm6, %v872_v21  ;;  %2817 = vmatmul.mubr.msk.f32.vlgmr.msra.gmra.mxu0 %vm966_vm4, %v3512_v2 }
  0x9c   : > { %707 = vst.msk [vmem:[#allocation2 + $0x28] sm:$0xff] %vm703_vm5, %v614_v25  ;;  %2917 = vmatpush3.msk.msra.mxu0 %vm1219_vm1, %v3427_v9 }
  0x9d   : > { %2918 = vmatprep.subr.mxu0 %v2668_v16 }
  0x9e   : > { %v838_v0 = vpop.permute.xlu0 %837  ;;  %v3523_v4 = vld [vmem:[#allocation2 + $0xa0] sm:$0xff]  ;;  %2919 = vmatpush3.msra.mxu0 %v2668_v16 }
  0x9f   : > { %v648_v1 = vpop.permute.xlu1 %647  ;;  %932 = vst.msk [vmem:[#allocation2 + $0x20] sm:$0xff] %vm929_vm6, %v838_v0  ;;  %2843 = vmatprep.mubr.msk.f32.mxu1 %vm966_vm4, %v3523_v4 }
  0xa0   : > { %724 = vst.msk [vmem:[#allocation2 + $0xb0] sm:$0xff] %vm703_vm5, %v648_v1 }
  0xa2   : > { %v840_v17 = vpop.permute.xlu0 %839  ;;  %v3529_v23 = vld [vmem:[#allocation2 + $0xa8] sm:$0xff] }
  0xa3   : > { %v650_v22 = vpop.permute.xlu1 %649  ;;  %933 = vst.msk [vmem:[#allocation2 + $0x28] sm:$0xff] %vm929_vm6, %v840_v17  ;;  %2844 = vmatmul.mubr.msk.f32.gmra.mxu1 %vm966_vm4, %v3529_v23 }
  0xa4   : > { %725 = vst.msk [vmem:[#allocation2 + $0xb8] sm:$0xff] %vm703_vm5, %v650_v22 }
  0xa6   : > { %v874_v24 = vpop.permute.xlu0 %873  ;;  %v3535_v12 = vld [vmem:[#allocation2 + $0x20] sm:$0xff] }
  0xa7   : > { %v616_v10 = vpop.permute.xlu1 %615  ;;  %950 = vst.msk [vmem:[#allocation2 + $0xb0] sm:$0xff] %vm929_vm6, %v874_v24  ;;  %2819 = vmatprep.mubr.msk.f32.mxu0 %vm966_vm4, %v3535_v12 }
  0xa8   : > { %708 = vst.msk [vmem:[#allocation2 + $0x30] sm:$0xff] %vm703_vm5, %v616_v10 }
  0xaa   : > { %v876_v27 = vpop.permute.xlu0 %875  ;;  %v3541_v31 = vld [vmem:[#allocation2 + $0x28] sm:$0xff] }
  0xab   : > { %v618_v28 = vpop.permute.xlu1 %617  ;;  %951 = vst.msk [vmem:[#allocation2 + $0xb8] sm:$0xff] %vm929_vm6, %v876_v27  ;;  %2820 = vmatmul.mubr.msk.f32.gmra.mxu0 %vm966_vm4, %v3541_v31 }
  0xac   : > { %709 = vst.msk [vmem:[#allocation2 + $0x38] sm:$0xff] %vm703_vm5, %v618_v28 }
  0xae   : > { %v842_v34 = vpop.permute.xlu0 %841  ;;  %v3547_v36 = vld [vmem:[#allocation2 + $0xb0] sm:$0xff] }
  0xaf   : > { %v652_v35 = vpop.permute.xlu1 %651  ;;  %934 = vst.msk [vmem:[#allocation2 + $0x30] sm:$0xff] %vm929_vm6, %v842_v34  ;;  %2846 = vmatprep.mubr.msk.f32.mxu1 %vm966_vm4, %v3547_v36 }
  0xb0   : > { %726 = vst.msk [vmem:[#allocation2 + $0xc0] sm:$0xff] %vm703_vm5, %v652_v35 }
  0xb2   : > { %v844_v37 = vpop.permute.xlu0 %843  ;;  %v3553_v43 = vld [vmem:[#allocation2 + $0xb8] sm:$0xff] }
  0xb3   : > { %v654_v40 = vpop.permute.xlu1 %653  ;;  %935 = vst.msk [vmem:[#allocation2 + $0x38] sm:$0xff] %vm929_vm6, %v844_v37  ;;  %2847 = vmatmul.mubr.msk.f32.gmra.mxu1 %vm966_vm4, %v3553_v43 }
  0xb4   : > { %727 = vst.msk [vmem:[#allocation2 + $0xc8] sm:$0xff] %vm703_vm5, %v654_v40 }
  0xb6   : > { %v878_v44 = vpop.permute.xlu0 %877  ;;  %v3559_v48 = vld [vmem:[#allocation2 + $0x30] sm:$0xff] }
  0xb7   : > { %v620_v45 = vpop.permute.xlu1 %619  ;;  %952 = vst.msk [vmem:[#allocation2 + $0xc0] sm:$0xff] %vm929_vm6, %v878_v44  ;;  %2822 = vmatprep.mubr.msk.f32.mxu0 %vm966_vm4, %v3559_v48 }
  0xb8   : > { %710 = vst.msk [vmem:[#allocation2 + $0x40] sm:$0xff] %vm703_vm5, %v620_v45 }
  0xba   : > { %v880_v51 = vpop.permute.xlu0 %879  ;;  %v3565_v53 = vld [vmem:[#allocation2 + $0x38] sm:$0xff] }
  0xbb   : > { %v622_v52 = vpop.permute.xlu1 %621  ;;  %953 = vst.msk [vmem:[#allocation2 + $0xc8] sm:$0xff] %vm929_vm6, %v880_v51  ;;  %2823 = vmatmul.mubr.msk.f32.gmra.mxu0 %vm966_vm4, %v3565_v53 }
  0xbc   : > { %711 = vst.msk [vmem:[#allocation2 + $0x48] sm:$0xff] %vm703_vm5, %v622_v52  ;;  %v1053_v52 = vld [vmem:[#allocation2] sm:$0xff] }
  0xbe   : > { %v846_v54 = vpop.permute.xlu0 %845  ;;  %v3571_v57 = vld [vmem:[#allocation2 + $0xc0] sm:$0xff] }
  0xbf   : > { %v656_v55 = vpop.permute.xlu1 %655  ;;  %936 = vst.msk [vmem:[#allocation2 + $0x40] sm:$0xff] %vm929_vm6, %v846_v54  ;;  %2849 = vmatprep.mubr.msk.f32.mxu1 %vm966_vm4, %v3571_v57 }
  0xc0   : > { %728 = vst.msk [vmem:[#allocation2 + $0xd0] sm:$0xff] %vm703_vm5, %v656_v55  ;;  %v1054_v55 = vld [vmem:[#allocation2 + $0x8] sm:$0xff] }
  0xc2   : > { %v848_v61 = vpop.permute.xlu0 %847  ;;  %v3577_v62 = vld [vmem:[#allocation2 + $0xc8] sm:$0xff] }
  0xc3   : > { %v658_v58 = vpop.permute.xlu1 %657  ;;  %937 = vst.msk [vmem:[#allocation2 + $0x48] sm:$0xff] %vm929_vm6, %v848_v61  ;;  %2850 = vmatmul.mubr.msk.f32.gmra.mxu1 %vm966_vm4, %v3577_v62 }
  0xc4   : > { %729 = vst.msk [vmem:[#allocation2 + $0xd8] sm:$0xff] %vm703_vm5, %v658_v58 }
  0xc6   : > { %v882_v19 = vpop.permute.xlu0 %881  ;;  %v3583_v15 = vld [vmem:[#allocation2 + $0x40] sm:$0xff] }
  0xc7   : > { %v624_v6 = vpop.permute.xlu1 %623  ;;  %954 = vst.msk [vmem:[#allocation2 + $0xd0] sm:$0xff] %vm929_vm6, %v882_v19  ;;  %2825 = vmatprep.mubr.msk.f32.mxu0 %vm966_vm4, %v3583_v15 }
  0xc8   : > { %712 = vst.msk [vmem:[#allocation2 + $0x50] sm:$0xff] %vm703_vm5, %v624_v6 }
  0xca   : > { %v884_v32 = vpop.permute.xlu0 %883  ;;  %v3589_v9 = vld [vmem:[#allocation2 + $0x48] sm:$0xff] }
  0xcb   : > { %v626_v41 = vpop.permute.xlu1 %625  ;;  %955 = vst.msk [vmem:[#allocation2 + $0xd8] sm:$0xff] %vm929_vm6, %v884_v32  ;;  %2826 = vmatmul.mubr.msk.f32.gmra.mxu0 %vm966_vm4, %v3589_v9 }
  0xcc   : > { %713 = vst.msk [vmem:[#allocation2 + $0x58] sm:$0xff] %vm703_vm5, %v626_v41 }
  0xce   : > { %v850_v20 = vpop.permute.xlu0 %849  ;;  %v3595_v46 = vld [vmem:[#allocation2 + $0xd0] sm:$0xff] }
  0xcf   : > { %v660_v42 = vpop.permute.xlu1 %659  ;;  %938 = vst.msk [vmem:[#allocation2 + $0x50] sm:$0xff] %vm929_vm6, %v850_v20  ;;  %2852 = vmatprep.mubr.msk.f32.mxu1 %vm966_vm4, %v3595_v46 }
  0xd0   : > { %730 = vst.msk [vmem:[#allocation2 + $0xe0] sm:$0xff] %vm703_vm5, %v660_v42 }
  0xd2   : > { %v852_v11 = vpop.permute.xlu0 %851  ;;  %v3601_v63 = vld [vmem:[#allocation2 + $0xd8] sm:$0xff] }
  0xd3   : > { %v662_v38 = vpop.permute.xlu1 %661  ;;  %939 = vst.msk [vmem:[#allocation2 + $0x58] sm:$0xff] %vm929_vm6, %v852_v11  ;;  %2853 = vmatmul.mubr.msk.f32.gmra.mxu1 %vm966_vm4, %v3601_v63 }
  0xd4   : > { %731 = vst.msk [vmem:[#allocation2 + $0xe8] sm:$0xff] %vm703_vm5, %v662_v38 }
  0xd6   : > { %v886_v33 = vpop.permute.xlu0 %885  ;;  %v3607_v39 = vld [vmem:[#allocation2 + $0x50] sm:$0xff] }
  0xd7   : > { %v628_v47 = vpop.permute.xlu1 %627  ;;  %956 = vst.msk [vmem:[#allocation2 + $0xe0] sm:$0xff] %vm929_vm6, %v886_v33  ;;  %2828 = vmatprep.mubr.msk.f32.mxu0 %vm966_vm4, %v3607_v39 }
  0xd8   : > { %714 = vst.msk [vmem:[#allocation2 + $0x60] sm:$0xff] %vm703_vm5, %v628_v47 }
  0xda   : > { %v888_v49 = vpop.permute.xlu0 %887  ;;  %v3613_v59 = vld [vmem:[#allocation2 + $0x58] sm:$0xff] }
  0xdb   : > { %v630_v56 = vpop.permute.xlu1 %629  ;;  %957 = vst.msk [vmem:[#allocation2 + $0xe8] sm:$0xff] %vm929_vm6, %v888_v49  ;;  %2829 = vmatmul.mubr.msk.f32.gmra.mxu0 %vm966_vm4, %v3613_v59 }
  0xdc   : > { %715 = vst.msk [vmem:[#allocation2 + $0x68] sm:$0xff] %vm703_vm5, %v630_v56 }
  0xde   : > { %v854_v50 = vpop.permute.xlu0 %853  ;;  %v3619_v3 = vld [vmem:[#allocation2 + $0xe0] sm:$0xff] }
  0xdf   : > { %v664_v60 = vpop.permute.xlu1 %663  ;;  %940 = vst.msk [vmem:[#allocation2 + $0x60] sm:$0xff] %vm929_vm6, %v854_v50  ;;  %2855 = vmatprep.mubr.msk.f32.mxu1 %vm966_vm4, %v3619_v3 }
  0xe0   : > { %732 = vst.msk [vmem:[#allocation2 + $0xf0] sm:$0xff] %vm703_vm5, %v664_v60 }
  0xe2   : > { %v856_v5 = vpop.permute.xlu0 %855  ;;  %v3625_v18 = vld [vmem:[#allocation2 + $0xe8] sm:$0xff] }
  0xe3   : > { %v666_v7 = vpop.permute.xlu1 %665  ;;  %941 = vst.msk [vmem:[#allocation2 + $0x68] sm:$0xff] %vm929_vm6, %v856_v5  ;;  %2856 = vmatmul.mubr.msk.f32.gmra.mxu1 %vm966_vm4, %v3625_v18 }
  0xe4   : > { %733 = vst.msk [vmem:[#allocation2 + $0xf8] sm:$0xff] %vm703_vm5, %v666_v7 }
  0xe6   : > { %v890_v29 = vpop.permute.xlu0 %889  ;;  %v3631_v13 = vld [vmem:[#allocation2 + $0x60] sm:$0xff] }
  0xe7   : > { %v632_v30 = vpop.permute.xlu1 %631  ;;  %958 = vst.msk [vmem:[#allocation2 + $0xf0] sm:$0xff] %vm929_vm6, %v890_v29  ;;  %2831 = vmatprep.mubr.msk.f32.mxu0 %vm966_vm4, %v3631_v13 }
  0xe8   : > { %716 = vst.msk [vmem:[#allocation2 + $0x70] sm:$0xff] %vm703_vm5, %v632_v30 }
  0xea   : > { %v892_v21 = vpop.permute.xlu0 %891  ;;  %v3637_v16 = vld [vmem:[#allocation2 + $0x68] sm:$0xff] }
  0xeb   : > { %v634_v25 = vpop.permute.xlu1 %633  ;;  %959 = vst.msk [vmem:[#allocation2 + $0xf8] sm:$0xff] %vm929_vm6, %v892_v21  ;;  %2832 = vmatmul.mubr.msk.f32.gmra.mxu0 %vm966_vm4, %v3637_v16 }
  0xec   : > { %717 = vst.msk [vmem:[#allocation2 + $0x78] sm:$0xff] %vm703_vm5, %v634_v25 }
  0xee   : > { %v858_v0 = vpop.permute.xlu0 %857  ;;  %v3643_v17 = vld [vmem:[#allocation2 + $0xf0] sm:$0xff] }
  0xef   : > { %v668_v1 = vpop.permute.xlu1 %667  ;;  %942 = vst.msk [vmem:[#allocation2 + $0x70] sm:$0xff] %vm929_vm6, %v858_v0  ;;  %2858 = vmatprep.mubr.msk.f32.mxu1 %vm966_vm4, %v3643_v17 }
  0xf0   : > { %734 = vst.msk [vmem:[#allocation2 + $0x100] sm:$0xff] %vm703_vm5, %v668_v1 }
  0xf2   : > { %v860_v22 = vpop.permute.xlu0 %859  ;;  %v3649_v10 = vld [vmem:[#allocation2 + $0xf8] sm:$0xff] }
  0xf3   : > { %v670_v24 = vpop.permute.xlu1 %669  ;;  %943 = vst.msk [vmem:[#allocation2 + $0x78] sm:$0xff] %vm929_vm6, %v860_v22  ;;  %2859 = vmatmul.mubr.msk.f32.gmra.mxu1 %vm966_vm4, %v3649_v10 }
  0xf4   : > { %735 = vst.msk [vmem:[#allocation2 + $0x108] sm:$0xff] %vm703_vm5, %v670_v24 }
  0xf6   : > { %v894_v27 = vpop.permute.xlu0 %893  ;;  %v1099_v34 = vld [vmem:[#allocation2 + $0x70] sm:$0xff] }
  0xf7   : > { %v636_v28 = vpop.permute.xlu1 %635  ;;  %960 = vst.msk [vmem:[#allocation2 + $0x100] sm:$0xff] %vm929_vm6, %v894_v27  ;;  %2834 = vmatprep.mubr.msk.f32.mxu0 %vm966_vm4, %v1099_v34 }
  0xf8   : > { %718 = vst.msk [vmem:[#allocation2 + $0x80] sm:$0xff] %vm703_vm5, %v636_v28 }
  0xfa   : > { %v896_v35 = vpop.permute.xlu0 %895  ;;  %v1100_v40 = vld [vmem:[#allocation2 + $0x78] sm:$0xff] }
  0xfb   : > { %v638_v37 = vpop.permute.xlu1 %637  ;;  %961 = vst.msk [vmem:[#allocation2 + $0x108] sm:$0xff] %vm929_vm6, %v896_v35  ;;  %2835 = vmatmul.mubr.msk.f32.gmra.mxu0 %vm966_vm4, %v1100_v40 }
  0xfc   : > { %719 = vst.msk [vmem:[#allocation2 + $0x88] sm:$0xff] %vm703_vm5, %v638_v37 }
  0xfe   : > { %v862_v44 = vpop.permute.xlu0 %861  ;;  %v3661_v51 = vld [vmem:[#allocation2 + $0x100] sm:$0xff] }
  0xff   : > { %v864_v45 = vpop.permute.xlu1 %863  ;;  %944 = vst.msk [vmem:[#allocation2 + $0x80] sm:$0xff] %vm929_vm6, %v862_v44  ;;  %2861 = vmatprep.mubr.msk.f32.mxu1 %vm966_vm4, %v3661_v51 }
 0x100   : > { %945 = vst.msk [vmem:[#allocation2 + $0x88] sm:$0xff] %vm929_vm6, %v864_v45 }
 0x102   : > { %v3667_v54 = vld [vmem:[#allocation2 + $0x108] sm:$0xff] }
 0x103   : > { %2862 = vmatmul.mubr.msk.f32.gmra.mxu1 %vm966_vm4, %v3667_v54 }
 0x104   : > { %2868 = vmatprep.mubr.msk.f32.mxu1 %vm966_vm4, %v1053_v52 }
 0x106   : > { %v1101_v61 = vld [vmem:[#allocation2 + $0x80] sm:$0xff] }
 0x107   : > { %v1102_v58 = vld [vmem:[#allocation2 + $0x88] sm:$0xff]  ;;  %2837 = vmatprep.mubr.msk.f32.mxu0 %vm966_vm4, %v1101_v61  ;;  %2869 = vmatmul.mubr.msk.f32.vlgmr.msra.gmra.mxu1 %vm966_vm4, %v1054_v55 }
 0x108   : > { %2838 = vmatmul.mubr.msk.f32.gmra.mxu0 %vm966_vm4, %v1102_v58  ;;  %2871 = vmatprep.mubr.msk.f32.mxu1 %vm966_vm4, %v3506_v14 }
 0x109   : > { %2920 = vmatprep.mubr.msk.f32.mxu0 %vm966_vm4, %v3535_v12 }
 0x10b   : > { %2872 = vmatmul.mubr.msk.f32.gmra.mxu1 %vm966_vm4, %v3512_v2 }
 0x10c   : > { %2874 = vmatprep.mubr.msk.f32.mxu1 %vm966_vm4, %v3535_v12  ;;  %2921 = vmatmul.mubr.msk.f32.vlgmr.msra.gmra.mxu0 %vm966_vm4, %v3541_v31 }
 0x10d   : > { %2923 = vmatprep.mubr.msk.f32.mxu0 %vm966_vm4, %v3559_v48 }
 0x10f   : > { %2875 = vmatmul.mubr.msk.f32.gmra.mxu1 %vm966_vm4, %v3541_v31 }
 0x110   : > { %2877 = vmatprep.mubr.msk.f32.mxu1 %vm966_vm4, %v3559_v48  ;;  %2924 = vmatmul.mubr.msk.f32.gmra.mxu0 %vm966_vm4, %v3565_v53 }
 0x111   : > { %2926 = vmatprep.mubr.msk.f32.mxu0 %vm966_vm4, %v3583_v15 }
 0x113   : > { %2878 = vmatmul.mubr.msk.f32.gmra.mxu1 %vm966_vm4, %v3565_v53 }
 0x114   : > { %2880 = vmatprep.mubr.msk.f32.mxu1 %vm966_vm4, %v3583_v15  ;;  %2927 = vmatmul.mubr.msk.f32.gmra.mxu0 %vm966_vm4, %v3589_v9 }
 0x115   : > { %2929 = vmatprep.mubr.msk.f32.mxu0 %vm966_vm4, %v3607_v39 }
 0x117   : > { %2881 = vmatmul.mubr.msk.f32.gmra.mxu1 %vm966_vm4, %v3589_v9 }
 0x118   : > { %2883 = vmatprep.mubr.msk.f32.mxu1 %vm966_vm4, %v3607_v39  ;;  %2930 = vmatmul.mubr.msk.f32.gmra.mxu0 %vm966_vm4, %v3613_v59 }
 0x119   : > { %2932 = vmatprep.mubr.msk.f32.mxu0 %vm966_vm4, %v3631_v13 }
 0x11b   : > { %2884 = vmatmul.mubr.msk.f32.gmra.mxu1 %vm966_vm4, %v3613_v59 }
 0x11c   : > { %2886 = vmatprep.mubr.msk.f32.mxu1 %vm966_vm4, %v3631_v13  ;;  %2933 = vmatmul.mubr.msk.f32.gmra.mxu0 %vm966_vm4, %v3637_v16 }
 0x11d   : > { %2935 = vmatprep.mubr.msk.f32.mxu0 %vm966_vm4, %v1099_v34 }
 0x11f   : > { %2887 = vmatmul.mubr.msk.f32.gmra.mxu1 %vm966_vm4, %v3637_v16 }
 0x120   : > { %2889 = vmatprep.mubr.msk.f32.mxu1 %vm966_vm4, %v1099_v34  ;;  %2936 = vmatmul.mubr.msk.f32.gmra.mxu0 %vm966_vm4, %v1100_v40 }
 0x121   : > { %2938 = vmatprep.mubr.msk.f32.mxu0 %vm966_vm4, %v1101_v61 }
 0x123   : > { %2890 = vmatmul.mubr.msk.f32.gmra.mxu1 %vm966_vm4, %v1100_v40 }
 0x124   : > { %2892 = vmatprep.mubr.msk.f32.mxu1 %vm966_vm4, %v1101_v61  ;;  %2939 = vmatmul.mubr.msk.f32.gmra.mxu0 %vm966_vm4, %v1102_v58 }
 0x125   : > { %2941 = vmatprep.mubr.msk.f32.mxu0 %vm966_vm4, %v3491_v8 }
 0x127   : > { %2893 = vmatmul.mubr.msk.f32.gmra.mxu1 %vm966_vm4, %v1102_v58 }
 0x128   : > { %2895 = vmatprep.mubr.msk.f32.mxu1 %vm966_vm4, %v3491_v8  ;;  %2942 = vmatmul.mubr.msk.f32.gmra.mxu0 %vm966_vm4, %v3493_v26  ;;  %v1803_v8 = vld [vmem:[#allocation2 + $0x110] sm:$0xff] }
 0x129   : > { %2944 = vmatprep.mubr.msk.f32.mxu0 %vm966_vm4, %v3523_v4 }
 0x12b   : > { %2896 = vmatmul.mubr.msk.f32.gmra.mxu1 %vm966_vm4, %v3493_v26  ;;  %v1804_v26 = vld [vmem:[#allocation2 + $0x118] sm:$0xff] }
 0x12c   : > { %2898 = vmatprep.mubr.msk.f32.mxu1 %vm966_vm4, %v3523_v4  ;;  %2945 = vmatmul.mubr.msk.f32.gmra.mxu0 %vm966_vm4, %v3529_v23 }
 0x12d   : > { %2947 = vmatprep.mubr.msk.f32.mxu0 %vm966_vm4, %v3547_v36 }
 0x12f   : > { %2899 = vmatmul.mubr.msk.f32.gmra.mxu1 %vm966_vm4, %v3529_v23 }
 0x130   : > { %2901 = vmatprep.mubr.msk.f32.mxu1 %vm966_vm4, %v3547_v36  ;;  %2948 = vmatmul.mubr.msk.f32.gmra.mxu0 %vm966_vm4, %v3553_v43 }
 0x131   : > { %2950 = vmatprep.mubr.msk.f32.mxu0 %vm966_vm4, %v3571_v57 }
 0x133   : > { %2902 = vmatmul.mubr.msk.f32.gmra.mxu1 %vm966_vm4, %v3553_v43 }
 0x134   : > { %2904 = vmatprep.mubr.msk.f32.mxu1 %vm966_vm4, %v3571_v57  ;;  %2951 = vmatmul.mubr.msk.f32.gmra.mxu0 %vm966_vm4, %v3577_v62 }
 0x135   : > { %2953 = vmatprep.mubr.msk.f32.mxu0 %vm966_vm4, %v3595_v46 }
 0x137   : > { %2905 = vmatmul.mubr.msk.f32.gmra.mxu1 %vm966_vm4, %v3577_v62 }
 0x138   : > { %2907 = vmatprep.mubr.msk.f32.mxu1 %vm966_vm4, %v3595_v46  ;;  %2954 = vmatmul.mubr.msk.f32.gmra.mxu0 %vm966_vm4, %v3601_v63 }
 0x139   : > { %2956 = vmatprep.mubr.msk.f32.mxu0 %vm966_vm4, %v3619_v3 }
 0x13b   : > { %2908 = vmatmul.mubr.msk.f32.gmra.mxu1 %vm966_vm4, %v3601_v63 }
 0x13c   : > { %2910 = vmatprep.mubr.msk.f32.mxu1 %vm966_vm4, %v3619_v3  ;;  %2957 = vmatmul.mubr.msk.f32.gmra.mxu0 %vm966_vm4, %v3625_v18 }
 0x13d   : > { %2959 = vmatprep.mubr.msk.f32.mxu0 %vm966_vm4, %v3643_v17 }
 0x13f   : > { %2911 = vmatmul.mubr.msk.f32.gmra.mxu1 %vm966_vm4, %v3625_v18 }
 0x140   : > { %2913 = vmatprep.mubr.msk.f32.mxu1 %vm966_vm4, %v3643_v17  ;;  %2960 = vmatmul.mubr.msk.f32.gmra.mxu0 %vm966_vm4, %v3649_v10 }
 0x141   : > { %2962 = vmatprep.mubr.msk.f32.mxu0 %vm966_vm4, %v3661_v51 }
 0x143   : > { %2914 = vmatmul.mubr.msk.f32.gmra.mxu1 %vm966_vm4, %v3649_v10 }
 0x144   : > { %2963 = vmatmul.mubr.msk.f32.gmra.mxu0 %vm966_vm4, %v3667_v54 }
 0x145   : > { %2965 = vmatprep.mubr.msk.f32.mxu0 %vm966_vm4, %v1803_v8 }
 0x148   : > { %2966 = vmatmul.mubr.msk.f32.gmra.mxu0 %vm966_vm4, %v1804_v26 }
 0x155   : > { %v3789_v14 = vpop.f32.mrf.mxu1 }
 0x157   : > { %v3791_v2 = vpop.f32.mrf.mxu1 }
 0x15b   : > { %v2818_v4 = vpop.f32.mrf.mxu0 }
 0x15d   : > { %v1289_v12 = vpop.f32.mrf.mxu0 }
 0x163   : > { %v3793_v23 = vpop.f32.mrf.mxu1 }
 0x165   : > { %v3795_v31 = vpop.f32.mrf.mxu1 }
 0x16b   : > { %v2821_v36 = vpop.f32.mrf.mxu0 }
 0x16d   : > { %v1299_v48 = vpop.f32.mrf.mxu0 }
 0x173   : > { %v3797_v43 = vpop.f32.mrf.mxu1 }
 0x175   : > { %v3799_v53 = vpop.f32.mrf.mxu1 }
 0x17b   : > { %v2824_v57 = vpop.f32.mrf.mxu0 }
 0x17d   : > { %v1309_v19 = vpop.f32.mrf.mxu0 }
 0x183   : > { %v3801_v62 = vpop.f32.mrf.mxu1 }
 0x185   : > { %v3803_v6 = vpop.f32.mrf.mxu1 }
 0x18b   : > { %v2827_v15 = vpop.f32.mrf.mxu0 }
 0x18d   : > { %v1319_v41 = vpop.f32.mrf.mxu0 }
 0x193   : > { %v3805_v32 = vpop.f32.mrf.mxu1 }
 0x195   : > { %v3807_v9 = vpop.f32.mrf.mxu1 }
 0x19b   : > { %v2830_v20 = vpop.f32.mrf.mxu0 }
 0x19d   : > { %v1329_v46 = vpop.f32.mrf.mxu0 }
 0x1a3   : > { %v3809_v42 = vpop.f32.mrf.mxu1 }
 0x1a5   : > { %v3811_v11 = vpop.f32.mrf.mxu1 }
 0x1ab   : > { %v2833_v38 = vpop.f32.mrf.mxu0 }
 0x1ad   : > { %v3815_v33 = vpop.f32.mrf.mxu0 }
 0x1b3   : > { %v3813_v63 = vpop.f32.mrf.mxu1 }
 0x1b5   : > { %v3817_v47 = vpop.f32.mrf.mxu1 }
 0x1bb   : > { %v3819_v39 = vpop.f32.mrf.mxu0 }
 0x1bd   : > { %v3825_v59 = vpop.f32.mrf.mxu0 }
 0x1c3   : > { %v3821_v49 = vpop.f32.mrf.mxu1 }
 0x1c5   : > { %v3823_v56 = vpop.f32.mrf.mxu1 }
 0x1c7   : > { %v2870_v50 = vpop.f32.mrf.mxu1 }
 0x1c8   : > { %v3827_v60 = vpop.f32.mrf.mxu0  ;;  %v1619_v7 = vadd.f32 %v2870_v50, %v2818_v4 }
 0x1c9   : > { %v1613_v3 = vpop.f32.mrf.mxu1 }
 0x1ca   : > { %v3829_v5 = vpop.f32.mrf.mxu0  ;;  %v1614_v30 = vadd.f32 %v1613_v3, %v1289_v12 }
 0x1cb   : > { %v2873_v18 = vpop.f32.mrf.mxu1 }
 0x1cc   : > { %v2922_v29 = vpop.f32.mrf.mxu0  ;;  %v1629_v16 = vadd.f32 %v2873_v18, %v2821_v36 }
 0x1cd   : > { %v3838_v13 = vadd.f32 %v2922_v29, %v1619_v7  ;;  %v1623_v21 = vpop.f32.mrf.mxu1 }
 0x1ce   : > { %v1973_v25 = vpop.f32.mrf.mxu0  ;;  %v1624_v22 = vadd.f32 %v1623_v21, %v1299_v48 }
 0x1cf   : > { %2166 = vst.msk [vmem:[%s3836_s15 + $0x8] sm:$0xff] %vm2164_vm7, %v3838_v13  ;;  %v3843_v0 = vadd.f32 %v1973_v25, %v1614_v30  ;;  %v2876_v1 = vpop.f32.mrf.mxu1 }
 0x1d0   : > { %v2925_v17 = vpop.f32.mrf.mxu0  ;;  %v1639_v28 = vadd.f32 %v2876_v1, %v2824_v57 }
 0x1d1   : > { %2165 = vst.msk [vmem:[%s3836_s15] sm:$0xff] %vm2164_vm7, %v3843_v0  ;;  %v3848_v24 = vadd.f32 %v2925_v17, %v1629_v16  ;;  %v1633_v10 = vpop.f32.mrf.mxu1 }
 0x1d2   : > { %v1983_v27 = vpop.f32.mrf.mxu0  ;;  %v1634_v40 = vadd.f32 %v1633_v10, %v1309_v19  ;;  %v2197_v10 = vsel %vm2164_vm7, %v3843_v0, 0.0 }
 0x1d3   : > { %2168 = vst.msk [vmem:[%s3836_s15 + $0x18] sm:$0xff] %vm2164_vm7, %v3848_v24  ;;  %v3853_v34 = vadd.f32 %v1983_v27, %v1624_v22  ;;  %v2879_v35 = vpop.f32.mrf.mxu1  ;;  %v2229_v29 = vsel %vm2164_vm7, %v3848_v24, 0.0 }
 0x1d4   : > { %v2928_v37 = vpop.f32.mrf.mxu0  ;;  %v1649_v52 = vadd.f32 %v2879_v35, %v2827_v15 }
 0x1d5   : > { %2167 = vst.msk [vmem:[%s3836_s15 + $0x10] sm:$0xff] %vm2164_vm7, %v3853_v34  ;;  %v3858_v44 = vadd.f32 %v2928_v37, %v1639_v28  ;;  %v1643_v45 = vpop.f32.mrf.mxu1  ;;  %v2198_v16 = vsel %vm2164_vm7, %v3853_v34, 0.0 }
 0x1d6   : > { %v1993_v51 = vpop.f32.mrf.mxu0  ;;  %v1644_v58 = vadd.f32 %v1643_v45, %v1319_v41 }
 0x1d7   : > { %2170 = vst.msk [vmem:[%s3836_s15 + $0x28] sm:$0xff] %vm2164_vm7, %v3858_v44  ;;  %v3863_v54 = vadd.f32 %v1993_v51, %v1634_v40  ;;  %v2882_v55 = vpop.f32.mrf.mxu1  ;;  %v2231_v1 = vsel %vm2164_vm7, %v3858_v44, 0.0  ;;  %v2199_v51 = vadd.f32 %v2198_v16, %v2197_v10 }
 0x1d8   : > { %v2931_v61 = vpop.f32.mrf.mxu0  ;;  %v1659_v12 = vadd.f32 %v2882_v55, %v2830_v20 }
 0x1d9   : > { %2169 = vst.msk [vmem:[%s3836_s15 + $0x20] sm:$0xff] %vm2164_vm7, %v3863_v54  ;;  %v3868_v8 = vadd.f32 %v2931_v61, %v1649_v52  ;;  %v1653_v26 = vpop.f32.mrf.mxu1  ;;  %v2200_v35 = vsel %vm2164_vm7, %v3863_v54, 0.0 }
 0x1da   : > { %v2003_v4 = vpop.f32.mrf.mxu0  ;;  %v1654_v19 = vadd.f32 %v1653_v26, %v1329_v46 }
 0x1db   : > { %2172 = vst.msk [vmem:[%s3836_s15 + $0x38] sm:$0xff] %vm2164_vm7, %v3868_v8  ;;  %v3873_v36 = vadd.f32 %v2003_v4, %v1644_v58  ;;  %v2885_v48 = vpop.f32.mrf.mxu1  ;;  %v2233_v37 = vsel %vm2164_vm7, %v3868_v8, 0.0 }
 0x1dc   : > { %v2934_v57 = vpop.f32.mrf.mxu0  ;;  %v1669_v3 = vadd.f32 %v2885_v48, %v2833_v38  ;;  %v2228_v38 = vsel %vm2164_vm7, %v3838_v13, 0.0 }
 0x1dd   : > { %2171 = vst.msk [vmem:[%s3836_s15 + $0x30] sm:$0xff] %vm2164_vm7, %v3873_v36  ;;  %v3878_v15 = vadd.f32 %v2934_v57, %v1659_v12  ;;  %v1663_v41 = vpop.f32.mrf.mxu1  ;;  %v2230_v27 = vadd.f32 %v2229_v29, %v2228_v38  ;;  %v2202_v61 = vsel %vm2164_vm7, %v3873_v36, 0.0  ;;  %v2201_v12 = vadd.f32 %v2200_v35, %v2199_v51 }
 0x1de   : > { %v2013_v50 = vpop.f32.mrf.mxu0  ;;  %v1664_v46 = vadd.f32 %v1663_v41, %v3815_v33 }
 0x1df   : > { %2174 = vst.msk [vmem:[%s3836_s15 + $0x48] sm:$0xff] %vm2164_vm7, %v3878_v15  ;;  %v3883_v20 = vadd.f32 %v2013_v50, %v1654_v19  ;;  %v2888_v7 = vpop.f32.mrf.mxu1  ;;  %v2232_v52 = vadd.f32 %v2231_v1, %v2230_v27  ;;  %v2235_v58 = vsel %vm2164_vm7, %v3878_v15, 0.0 }
 0x1e0   : > { %v2937_v18 = vpop.f32.mrf.mxu0  ;;  %v1679_v17 = vadd.f32 %v2888_v7, %v3819_v39  ;;  %v2203_v7 = vadd.f32 %v2202_v61, %v2201_v12 }
 0x1e1   : > { %2173 = vst.msk [vmem:[%s3836_s15 + $0x40] sm:$0xff] %vm2164_vm7, %v3883_v20  ;;  %v3891_v30 = vadd.f32 %v2937_v18, %v1669_v3  ;;  %v1673_v21 = vpop.f32.mrf.mxu1  ;;  %v2234_v48 = vadd.f32 %v2233_v37, %v2232_v52  ;;  %v2204_v19 = vsel %vm2164_vm7, %v3883_v20, 0.0 }
 0x1e2   : > { %v2023_v25 = vpop.f32.mrf.mxu0  ;;  %v1674_v39 = vadd.f32 %v1673_v21, %v3825_v59  ;;  %v2205_v16 = vadd.f32 %v2204_v19, %v2203_v7 }
 0x1e3   : > { %2176 = vst.msk [vmem:[%s3836_s15 + $0x58] sm:$0xff] %vm2164_vm7, %v3891_v30  ;;  %v3903_v33 = vadd.f32 %v2023_v25, %v1664_v46  ;;  %v2891_v22 = vpop.f32.mrf.mxu1  ;;  %v2237_v41 = vsel %vm2164_vm7, %v3891_v30, 0.0  ;;  %v2236_v18 = vadd.f32 %v2235_v58, %v2234_v48 }
 0x1e4   : > { %v2940_v28 = vpop.f32.mrf.mxu0  ;;  %v1689_v26 = vadd.f32 %v2891_v22, %v3827_v60 }
 0x1e5   : > { %2175 = vst.msk [vmem:[%s3836_s15 + $0x50] sm:$0xff] %vm2164_vm7, %v3903_v33  ;;  %v3915_v40 = vadd.f32 %v2940_v28, %v1679_v17  ;;  %v1683_v45 = vpop.f32.mrf.mxu1  ;;  %v2206_v46 = vsel %vm2164_vm7, %v3903_v33, 0.0  ;;  %v2238_v1 = vadd.f32 %v2237_v41, %v2236_v18 }
 0x1e6   : > { %v2033_v55 = vpop.f32.mrf.mxu0  ;;  %v1684_v50 = vadd.f32 %v1683_v45, %v3829_v5  ;;  %v2207_v35 = vadd.f32 %v2206_v46, %v2205_v16 }
 0x1e7   : > { %2178 = vst.msk [vmem:[%s3836_s15 + $0x68] sm:$0xff] %vm2164_vm7, %v3915_v40  ;;  %v3925_v59 = vadd.f32 %v2033_v55, %v1674_v39  ;;  %v2894_v4 = vpop.f32.mrf.mxu1  ;;  %v2239_v21 = vsel %vm2164_vm7, %v3915_v40, 0.0 }
 0x1e8   : > { %v2943_v57 = vpop.f32.mrf.mxu0  ;;  %v1699_v38 = vadd.f32 %v2894_v4, %v3789_v14  ;;  %v2240_v37 = vadd.f32 %v2239_v21, %v2238_v1 }
 0x1e9   : > { %2177 = vst.msk [vmem:[%s3836_s15 + $0x60] sm:$0xff] %vm2164_vm7, %v3925_v59  ;;  %v3935_v60 = vadd.f32 %v2943_v57, %v1689_v26  ;;  %v1693_v3 = vpop.f32.mrf.mxu1  ;;  %v2208_v22 = vsel %vm2164_vm7, %v3925_v59, 0.0 }
 0x1ea   : > { %v2043_v29 = vpop.f32.mrf.mxu0  ;;  %v1694_v27 = vadd.f32 %v1693_v3, %v3791_v2  ;;  %v2209_v61 = vadd.f32 %v2208_v22, %v2207_v35 }
 0x1eb   : > { %2180 = vst.msk [vmem:[%s3836_s15 + $0x78] sm:$0xff] %vm2164_vm7, %v3935_v60  ;;  %v3945_v5 = vadd.f32 %v2043_v29, %v1684_v50  ;;  %v2897_v25 = vpop.f32.mrf.mxu1  ;;  %v2241_v10 = vsel %vm2164_vm7, %v3935_v60, 0.0 }
 0x1ec   : > { %v2946_v17 = vpop.f32.mrf.mxu0  ;;  %v1709_v51 = vadd.f32 %v2897_v25, %v3793_v23  ;;  %v2242_v58 = vadd.f32 %v2241_v10, %v2240_v37 }
 0x1ed   : > { %2179 = vst.msk [vmem:[%s3836_s15 + $0x70] sm:$0xff] %vm2164_vm7, %v3945_v5  ;;  %v3955_v14 = vadd.f32 %v2946_v17, %v1699_v38  ;;  %v1703_v28 = vpop.f32.mrf.mxu1  ;;  %v2210_v45 = vsel %vm2164_vm7, %v3945_v5, 0.0 }
 0x1ee   : > { %v2053_v39 = vpop.f32.mrf.mxu0  ;;  %v1704_v4 = vadd.f32 %v1703_v28, %v3795_v31  ;;  %v2211_v57 = vadd.f32 %v2210_v45, %v2209_v61 }
 0x1ef   : > { %2182 = vst.msk [vmem:[%s3836_s15 + $0x88] sm:$0xff] %vm2164_vm7, %v3955_v14  ;;  %v2243_v2 = vsel %vm2164_vm7, %v3955_v14, 0.0  ;;  %v3965_v52 = vadd.f32 %v2053_v39, %v1694_v27  ;;  %v2900_v55 = vpop.f32.mrf.mxu1 }
 0x1f0   : > { %v2949_v26 = vpop.f32.mrf.mxu0  ;;  %v2244_v19 = vadd.f32 %v2243_v2, %v2242_v58  ;;  %v1719_v50 = vadd.f32 %v2900_v55, %v3797_v43 }
 0x1f1   : > { %2181 = vst.msk [vmem:[%s3836_s15 + $0x80] sm:$0xff] %vm2164_vm7, %v3965_v52  ;;  %v2212_v23 = vsel %vm2164_vm7, %v3965_v52, 0.0  ;;  %v3973_v12 = vadd.f32 %v2949_v26, %v1709_v51  ;;  %v1713_v48 = vpop.f32.mrf.mxu1 }
 0x1f2   : > { %v2063_v41 = vpop.f32.mrf.mxu0  ;;  %v2213_v18 = vadd.f32 %v2212_v23, %v2211_v57  ;;  %v1714_v21 = vadd.f32 %v1713_v48, %v3799_v53 }
 0x1f3   : > { %2184 = vst.msk [vmem:[%s3836_s15 + $0x98] sm:$0xff] %vm2164_vm7, %v3973_v12  ;;  %v2245_v31 = vsel %vm2164_vm7, %v3973_v12, 0.0  ;;  %v3981_v3 = vadd.f32 %v2063_v41, %v1704_v4  ;;  %v2903_v7 = vpop.f32.mrf.mxu1 }
 0x1f4   : > { %v2246_v29 = vadd.f32 %v2245_v31, %v2244_v19  ;;  %v2952_v46 = vpop.f32.mrf.mxu0  ;;  %v1729_v17 = vadd.f32 %v2903_v7, %v3801_v62 }
 0x1f5   : > { %2183 = vst.msk [vmem:[%s3836_s15 + $0x90] sm:$0xff] %vm2164_vm7, %v3981_v3  ;;  %v2214_v43 = vsel %vm2164_vm7, %v3981_v3, 0.0  ;;  %v3989_v38 = vadd.f32 %v2952_v46, %v1719_v50  ;;  %v1723_v25 = vpop.f32.mrf.mxu1 }
 0x1f6   : > { %v2215_v16 = vadd.f32 %v2214_v43, %v2213_v18  ;;  %v2073_v1 = vpop.f32.mrf.mxu0  ;;  %v1724_v35 = vadd.f32 %v1723_v25, %v3803_v6 }
 0x1f7   : > { %2186 = vst.msk [vmem:[%s3836_s15 + $0xa8] sm:$0xff] %vm2164_vm7, %v3989_v38  ;;  %v2247_v53 = vsel %vm2164_vm7, %v3989_v38, 0.0  ;;  %v3997_v22 = vadd.f32 %v2073_v1, %v1714_v21  ;;  %v2906_v10 = vpop.f32.mrf.mxu1 }
 0x1f8   : > { %v2248_v27 = vadd.f32 %v2247_v53, %v2246_v29  ;;  %v2955_v28 = vpop.f32.mrf.mxu0  ;;  %v1739_v2 = vadd.f32 %v2906_v10, %v3805_v32 }
 0x1f9   : > { %2185 = vst.msk [vmem:[%s3836_s15 + $0xa0] sm:$0xff] %vm2164_vm7, %v3997_v22  ;;  %v2216_v62 = vsel %vm2164_vm7, %v3997_v22, 0.0  ;;  %v4005_v37 = vadd.f32 %v2955_v28, %v1729_v17  ;;  %v1733_v39 = vpop.f32.mrf.mxu1 }
 0x1fa   : > { %v2217_v45 = vadd.f32 %v2216_v62, %v2215_v16  ;;  %v2083_v51 = vpop.f32.mrf.mxu0  ;;  %v1734_v4 = vadd.f32 %v1733_v39, %v3807_v9 }
 0x1fb   : > { %2188 = vst.msk [vmem:[%s3836_s15 + $0xb8] sm:$0xff] %vm2164_vm7, %v4005_v37  ;;  %v2249_v6 = vsel %vm2164_vm7, %v4005_v37, 0.0  ;;  %v4013_v55 = vadd.f32 %v2083_v51, %v1724_v35  ;;  %v2909_v61 = vpop.f32.mrf.mxu1 }
 0x1fc   : > { %v2250_v58 = vadd.f32 %v2249_v6, %v2248_v27  ;;  %v2958_v26 = vpop.f32.mrf.mxu0  ;;  %v1749_v41 = vadd.f32 %v2909_v61, %v3809_v42 }
 0x1fd   : > { %2187 = vst.msk [vmem:[%s3836_s15 + $0xb0] sm:$0xff] %vm2164_vm7, %v4013_v55  ;;  %v2218_v32 = vsel %vm2164_vm7, %v4013_v55, 0.0  ;;  %v4021_v23 = vadd.f32 %v2958_v26, %v1739_v2  ;;  %v1743_v48 = vpop.f32.mrf.mxu1 }
 0x1fe   : > { %v2219_v57 = vadd.f32 %v2218_v32, %v2217_v45  ;;  %v2093_v19 = vpop.f32.mrf.mxu0  ;;  %v1744_v29 = vadd.f32 %v1743_v48, %v3811_v11 }
 0x1ff   : > { %2190 = vst.msk [vmem:[%s3836_s15 + $0xc8] sm:$0xff] %vm2164_vm7, %v4021_v23  ;;  %v2251_v9 = vsel %vm2164_vm7, %v4021_v23, 0.0  ;;  %v4029_v50 = vadd.f32 %v2093_v19, %v1734_v4  ;;  %v2912_v31 = vpop.f32.mrf.mxu1 }
 0x200   : > { %v2252_v7 = vadd.f32 %v2251_v9, %v2250_v58  ;;  %v2961_v18 = vpop.f32.mrf.mxu0  ;;  %v1759_v16 = vadd.f32 %v2912_v31, %v3813_v63 }
 0x201   : > { %2189 = vst.msk [vmem:[%s3836_s15 + $0xc0] sm:$0xff] %vm2164_vm7, %v4029_v50  ;;  %v2220_v42 = vsel %vm2164_vm7, %v4029_v50, 0.0  ;;  %v4037_v46 = vadd.f32 %v2961_v18, %v1749_v41  ;;  %v1753_v21 = vpop.f32.mrf.mxu1 }
 0x202   : > { %v2221_v43 = vadd.f32 %v2220_v42, %v2219_v57  ;;  %v2103_v25 = vpop.f32.mrf.mxu0  ;;  %v1754_v27 = vadd.f32 %v1753_v21, %v3817_v47 }
 0x203   : > { %2192 = vst.msk [vmem:[%s3836_s15 + $0xd8] sm:$0xff] %vm2164_vm7, %v4037_v46  ;;  %v2253_v11 = vsel %vm2164_vm7, %v4037_v46, 0.0  ;;  %v2158_v1 = vadd.f32 %v2103_v25, %v1744_v29  ;;  %v2915_v17 = vpop.f32.mrf.mxu1 }
 0x204   : > { %v2254_v53 = vadd.f32 %v2253_v11, %v2252_v7  ;;  %v2964_v10 = vpop.f32.mrf.mxu0  ;;  %v1769_v45 = vadd.f32 %v2915_v17, %v3821_v49 }
 0x205   : > { %2191 = vst.msk [vmem:[%s3836_s15 + $0xd0] sm:$0xff] %vm2164_vm7, %v2158_v1  ;;  %v2222_v28 = vsel %vm2164_vm7, %v2158_v1, 0.0  ;;  %v2161_v35 = vadd.f32 %v2964_v10, %v1759_v16  ;;  %v1763_v62 = vpop.f32.mrf.mxu1 }
 0x206   : > { %v2223_v63 = vadd.f32 %v2222_v28, %v2221_v43  ;;  %v2113_v39 = vpop.f32.mrf.mxu0  ;;  %v1764_v47 = vadd.f32 %v1763_v62, %v3823_v56 }
 0x207   : > { %2194 = vst.msk [vmem:[%s3836_s15 + $0xe8] sm:$0xff] %vm2164_vm7, %v2161_v35  ;;  %v2255_v51 = vsel %vm2164_vm7, %v2161_v35, 0.0  ;;  %v2160_v2 = vadd.f32 %v2113_v39, %v1754_v27 }
 0x208   : > { %v2256_v6 = vadd.f32 %v2255_v51, %v2254_v53  ;;  %v2967_v61 = vpop.f32.mrf.mxu0 }
 0x209   : > { %2193 = vst.msk [vmem:[%s3836_s15 + $0xe0] sm:$0xff] %vm2164_vm7, %v2160_v2  ;;  %v2224_v58 = vsel %vm2164_vm7, %v2160_v2, 0.0  ;;  %v2163_v26 = vadd.f32 %v2967_v61, %v1769_v45 }
 0x20a   : > { %v2225_v4 = vadd.f32 %v2224_v58, %v2223_v63  ;;  %v2123_v32 = vpop.f32.mrf.mxu0 }
 0x20b   : > { %2196 = vst.msk [vmem:[%s3836_s15 + $0xf8] sm:$0xff] %vm2164_vm7, %v2163_v26  ;;  %v2257_v49 = vsel %vm2164_vm7, %v2163_v26, 0.0  ;;  %v2162_v48 = vadd.f32 %v2123_v32, %v1764_v47 }
 0x20c   : > { %v2258_v57 = vadd.f32 %v2257_v49, %v2256_v6 }
 0x20d   : > { %2195 = vst.msk [vmem:[%s3836_s15 + $0xf0] sm:$0xff] %vm2164_vm7, %v2162_v48  ;;  %v2226_v19 = vsel %vm2164_vm7, %v2162_v48, 0.0 }
 0x20e   : > { %v2227_v41 = vadd.f32 %v2226_v19, %v2225_v4  ;;  %v2260_v56 = vsel %vm2164_vm7, %v2258_v57, 0.0 }
 0x210   : > { %v2259_v9 = vsel %vm2164_vm7, %v2227_v41, 0.0 }
 0x211   : > { %v2261_v31 = vadd.f32 %v2260_v56, %v2259_v9 }
 0x213   : > { %v2262_v7 = vrot.slane %v2261_v31, 4 }
 0x215   : > { %v2263_v18 = vadd.f32 %v2262_v7, %v2261_v31 }
 0x217   : > { %v2264_v29 = vrot.slane %v2263_v18, 2 }
 0x219   : > { %v2265_v42 = vadd.f32 %v2264_v29, %v2263_v18 }
 0x21b   : > { %v2266_v21 = vrot.slane %v2265_v42, 1 }
 0x21d   : > { %v2267_v43 = vadd.f32 %v2266_v21, %v2265_v42 }
 0x21f   : > { %v2268_v25 = vmul.f32 0.00390625, %v2267_v43  ;;  %2405 = vst.msk [vmem:[%s4069_s21] sm:$0x1] %vm2404_vm8, %v2267_v43 }
 0x221   : > { %v2279_v16 = vsub.f32 %v3903_v33, %v2268_v25  ;;  %v2280_v11 = vsub.f32 %v3891_v30, %v2268_v25  ;;  %v2281_v17 = vsub.f32 %v3925_v59, %v2268_v25  ;;  %v2282_v53 = vsub.f32 %v3915_v40, %v2268_v25 }
 0x222   : > { %v2283_v10 = vsub.f32 %v3945_v5, %v2268_v25  ;;  %v4079_v27 = vsub.f32 %v3935_v60, %v2268_v25  ;;  %v2285_v28 = vsub.f32 %v3965_v52, %v2268_v25  ;;  %v4083_v63 = vsub.f32 %v3955_v14, %v2268_v25 }
 0x223   : > { %v4086_v62 = vsub.f32 %v3981_v3, %v2268_v25  ;;  %v4089_v33 = vsub.f32 %v3973_v12, %v2268_v25  ;;  %v4092_v30 = vsub.f32 %v3997_v22, %v2268_v25  ;;  %v4095_v40 = vsub.f32 %v3989_v38, %v2268_v25 }
 0x224   : > { %v4098_v59 = vsub.f32 %v4013_v55, %v2268_v25  ;;  %v4101_v60 = vsub.f32 %v4005_v37, %v2268_v25  ;;  %v4104_v5 = vsub.f32 %v4029_v50, %v2268_v25  ;;  %v4107_v14 = vsub.f32 %v4021_v23, %v2268_v25 }
 0x225   : > { %v4109_v52 = vsub.f32 %v2158_v1, %v2268_v25  ;;  %v4112_v12 = vsub.f32 %v4037_v46, %v2268_v25  ;;  %v4114_v3 = vsub.f32 %v2160_v2, %v2268_v25  ;;  %v4116_v38 = vsub.f32 %v2161_v35, %v2268_v25 }
 0x226   : > { %v4118_v22 = vsub.f32 %v2162_v48, %v2268_v25  ;;  %v4120_v55 = vsub.f32 %v2163_v26, %v2268_v25  ;;  %v2269_v37 = vsub.f32 %v3843_v0, %v2268_v25  ;;  %v2271_v50 = vsub.f32 %v3853_v34, %v2268_v25 }
 0x227   : > { %v2273_v23 = vsub.f32 %v3863_v54, %v2268_v25  ;;  %v2270_v1 = vsub.f32 %v3838_v13, %v2268_v25  ;;  %v2272_v39 = vsub.f32 %v3848_v24, %v2268_v25  ;;  %v2275_v46 = vsub.f32 %v3873_v36, %v2268_v25 }
 0x228   : > { %v2301_v45 = vmul.f32 %v2269_v37, %v2269_v37  ;;  %v2303_v51 = vmul.f32 %v2271_v50, %v2271_v50  ;;  %v2274_v35 = vsub.f32 %v3858_v44, %v2268_v25  ;;  %v2277_v2 = vsub.f32 %v3883_v20, %v2268_v25 }
 0x229   : > { %v2305_v6 = vmul.f32 %v2273_v23, %v2273_v23  ;;  %v2276_v61 = vsub.f32 %v3868_v8, %v2268_v25  ;;  %v2302_v0 = vmul.f32 %v2270_v1, %v2270_v1  ;;  %v2304_v47 = vmul.f32 %v2272_v39, %v2272_v39 }
 0x22a   : > { %v2307_v34 = vmul.f32 %v2275_v46, %v2275_v46  ;;  %v2333_v54 = vsel %vm2164_vm7, %v2301_v45, 0.0  ;;  %v2334_v13 = vsel %vm2164_vm7, %v2303_v51, 0.0  ;;  %v2278_v24 = vsub.f32 %v3878_v15, %v2268_v25 }
 0x22b   : > { %v2335_v58 = vadd.f32 %v2334_v13, %v2333_v54  ;;  %v2306_v36 = vmul.f32 %v2274_v35, %v2274_v35  ;;  %v2309_v26 = vmul.f32 %v2277_v2, %v2277_v2  ;;  %v2336_v4 = vsel %vm2164_vm7, %v2305_v6, 0.0 }
 0x22c   : > { %v2308_v44 = vmul.f32 %v2276_v61, %v2276_v61  ;;  %v2311_v20 = vmul.f32 %v2279_v16, %v2279_v16  ;;  %v2338_v49 = vsel %vm2164_vm7, %v2307_v34, 0.0  ;;  %v2364_v8 = vsel %vm2164_vm7, %v2302_v0, 0.0 }
 0x22d   : > { %v2337_v32 = vadd.f32 %v2336_v4, %v2335_v58  ;;  %v2365_v48 = vsel %vm2164_vm7, %v2304_v47, 0.0  ;;  %v2310_v41 = vmul.f32 %v2278_v24, %v2278_v24  ;;  %v2313_v56 = vmul.f32 %v2281_v17, %v2281_v17 }
 0x22e   : > { %v2366_v19 = vadd.f32 %v2365_v48, %v2364_v8  ;;  %v2340_v9 = vsel %vm2164_vm7, %v2309_v26, 0.0  ;;  %v2367_v15 = vsel %vm2164_vm7, %v2306_v36, 0.0  ;;  %v2312_v18 = vmul.f32 %v2280_v11, %v2280_v11 }
 0x22f   : > { %v2339_v57 = vadd.f32 %v2338_v49, %v2337_v32  ;;  %v2315_v29 = vmul.f32 %v2283_v10, %v2283_v10  ;;  %v2342_v42 = vsel %vm2164_vm7, %v2311_v20, 0.0  ;;  %v2369_v21 = vsel %vm2164_vm7, %v2308_v44, 0.0 }
 0x230   : > { %v2368_v7 = vadd.f32 %v2367_v15, %v2366_v19  ;;  %v2314_v16 = vmul.f32 %v2282_v53, %v2282_v53  ;;  %v2317_v37 = vmul.f32 %v2285_v28, %v2285_v28  ;;  %v2344_v50 = vsel %vm2164_vm7, %v2313_v56, 0.0 }
 0x231   : > { %v2341_v31 = vadd.f32 %v2340_v9, %v2339_v57  ;;  %v2371_v17 = vsel %vm2164_vm7, %v2310_v41, 0.0  ;;  %v2316_v39 = vmul.f32 %v4079_v27, %v4079_v27  ;;  %v2319_v11 = vmul.f32 %v4086_v62, %v4086_v62 }
 0x232   : > { %v2370_v25 = vadd.f32 %v2369_v21, %v2368_v7  ;;  %v2346_v10 = vsel %vm2164_vm7, %v2315_v29, 0.0  ;;  %v2373_v46 = vsel %vm2164_vm7, %v2312_v18, 0.0  ;;  %v2318_v53 = vmul.f32 %v4083_v63, %v4083_v63 }
 0x233   : > { %v2343_v43 = vadd.f32 %v2342_v42, %v2341_v31  ;;  %v2321_v28 = vmul.f32 %v4092_v30, %v4092_v30  ;;  %v2348_v35 = vsel %vm2164_vm7, %v2317_v37, 0.0  ;;  %v2375_v2 = vsel %vm2164_vm7, %v2314_v16, 0.0 }
 0x234   : > { %v2372_v1 = vadd.f32 %v2371_v17, %v2370_v25  ;;  %v2320_v62 = vmul.f32 %v4089_v33, %v4089_v33  ;;  %v2323_v61 = vmul.f32 %v4098_v59, %v4098_v59  ;;  %v2350_v0 = vsel %vm2164_vm7, %v2319_v11, 0.0 }
 0x235   : > { %v2345_v23 = vadd.f32 %v2344_v50, %v2343_v43  ;;  %v2377_v47 = vsel %vm2164_vm7, %v2316_v39, 0.0  ;;  %v2322_v30 = vmul.f32 %v4095_v40, %v4095_v40  ;;  %v2325_v54 = vmul.f32 %v4104_v5, %v4104_v5 }
 0x236   : > { %v2374_v51 = vadd.f32 %v2373_v46, %v2372_v1  ;;  %v2352_v13 = vsel %vm2164_vm7, %v2321_v28, 0.0  ;;  %v2379_v58 = vsel %vm2164_vm7, %v2318_v53, 0.0  ;;  %v2324_v59 = vmul.f32 %v4101_v60, %v4101_v60 }
 0x237   : > { %v2347_v45 = vadd.f32 %v2346_v10, %v2345_v23  ;;  %v2327_v36 = vmul.f32 %v4109_v52, %v4109_v52  ;;  %v2354_v26 = vsel %vm2164_vm7, %v2323_v61, 0.0  ;;  %v2381_v4 = vsel %vm2164_vm7, %v2320_v62, 0.0 }
 0x238   : > { %v2376_v6 = vadd.f32 %v2375_v2, %v2374_v51  ;;  %v2326_v5 = vmul.f32 %v4107_v14, %v4107_v14  ;;  %v2329_v32 = vmul.f32 %v4114_v3, %v4114_v3  ;;  %v2356_v20 = vsel %vm2164_vm7, %v2325_v54, 0.0 }
 0x239   : > { %v2349_v27 = vadd.f32 %v2348_v35, %v2347_v45  ;;  %v2383_v49 = vsel %vm2164_vm7, %v2322_v30, 0.0  ;;  %v2328_v52 = vmul.f32 %v4112_v12, %v4112_v12  ;;  %v2331_v48 = vmul.f32 %v4118_v22, %v4118_v22 }
 0x23a   : > { %v2378_v34 = vadd.f32 %v2377_v47, %v2376_v6  ;;  %v2358_v57 = vsel %vm2164_vm7, %v2327_v36, 0.0  ;;  %v2385_v19 = vsel %vm2164_vm7, %v2324_v59, 0.0  ;;  %v2330_v3 = vmul.f32 %v4116_v38, %v4116_v38 }
 0x23b   : > { %v2351_v63 = vadd.f32 %v2350_v0, %v2349_v27  ;;  %v2360_v56 = vsel %vm2164_vm7, %v2329_v32, 0.0  ;;  %v2387_v9 = vsel %vm2164_vm7, %v2326_v5, 0.0  ;;  %v2332_v12 = vmul.f32 %v4120_v55, %v4120_v55 }
 0x23c   : > { %v2380_v24 = vadd.f32 %v2379_v58, %v2378_v34  ;;  %v2362_v22 = vsel %vm2164_vm7, %v2331_v48, 0.0  ;;  %v2389_v7 = vsel %vm2164_vm7, %v2328_v52, 0.0  ;;  %v2391_v42 = vsel %vm2164_vm7, %v2330_v3, 0.0 }
 0x23d   : > { %v2353_v33 = vadd.f32 %v2352_v13, %v2351_v63  ;;  %v2393_v38 = vsel %vm2164_vm7, %v2332_v12, 0.0 }
 0x23e   : > { %v2382_v44 = vadd.f32 %v2381_v4, %v2380_v24 }
 0x23f   : > { %v2355_v40 = vadd.f32 %v2354_v26, %v2353_v33 }
 0x240   : > { %v2384_v8 = vadd.f32 %v2383_v49, %v2382_v44 }
 0x241   : > { %v2357_v60 = vadd.f32 %v2356_v20, %v2355_v40 }
 0x242   : > { %v2386_v41 = vadd.f32 %v2385_v19, %v2384_v8 }
 0x243   : > { %v2359_v14 = vadd.f32 %v2358_v57, %v2357_v60 }
 0x244   : > { %v2388_v31 = vadd.f32 %v2387_v9, %v2386_v41 }
 0x245   : > { %v2361_v15 = vadd.f32 %v2360_v56, %v2359_v14 }
 0x246   : > { %v2390_v29 = vadd.f32 %v2389_v7, %v2388_v31 }
 0x247   : > { %v2363_v18 = vadd.f32 %v2362_v22, %v2361_v15 }
 0x248   : > { %v2392_v21 = vadd.f32 %v2391_v42, %v2390_v29 }
 0x249   : > { %v2395_v25 = vsel %vm2164_vm7, %v2363_v18, 0.0 }
 0x24a   : > { %v2394_v43 = vadd.f32 %v2393_v38, %v2392_v21 }
 0x24c   : > { %v2396_v16 = vsel %vm2164_vm7, %v2394_v43, 0.0 }
 0x24d   : > { %v2397_v37 = vadd.f32 %v2396_v16, %v2395_v25 }
 0x24f   : > { %v2398_v50 = vrot.slane %v2397_v37, 4 }
 0x251   : > { %v2399_v55 = vadd.f32 %v2398_v50, %v2397_v37 }
 0x253   : > { %v2400_v17 = vrot.slane %v2399_v55, 2 }
 0x255   : > { %v2401_v23 = vadd.f32 %v2400_v17, %v2399_v55 }
 0x257   : > { %v2402_v1 = vrot.slane %v2401_v23, 1 }
 0x259   : > { %v2403_v39 = vadd.f32 %v2402_v1, %v2401_v23 }
 0x25b   : > { %2406 = vst.msk [vmem:[%s4069_s21 + $0x1] sm:$0x1] %vm2404_vm8, %v2403_v39 }
 0x25c PF: > { %s16_s20 = sadd.s32 1, %s3021_s20   ;;  %s4215_s18 = smov %s3017_s19 }
 0x25d   : > { %p13_p5 = scmp.ge.s32.totalorder %s16_s20, 4   ;;  %s4216_s19 = smov %s4218_s1 }
 0x25f   :  { %15 = sbr.rel (!%p13_p5) target bundleno = 2 (0x2), region = 106 }

</bundles_post_ra>
